<compile_context>
chip_gen: v6e
topology: v6e:2x2x1
jax: 0.10.0
libtpu: 0.0.40
codegen_flags: <defaults>
</compile_context>

<pallas_src>
import functools

import numpy as np
import jax
import jax.numpy as jnp
from jax import lax
from jax.experimental import pallas as pl
from jax.experimental.pallas import tpu as pltpu


# ------------------------------ Pallas kernel --------------------------------

def _gatv2_layer(h, w, b, attn_blk, expd, meanh, bias,
                 mask_e, rep_src, rep_dst, agg_dst):
    """DGL-style GATv2Conv followed by mean over heads (lane-dense, edge-major).

    h:(P,Fin)  w:(Fin,2*H*D)=[fc_src|fc_dst]  b:(1,2*H*D)
    attn_blk:(H*D,H) block-diag attn   expd:(H,H*D) 0/1 head expander
    meanh:(H*D,D) head-mean reducer    bias:(1,D) (already head-averaged)
    mask_e:(P*P,1) edge mask           rep_src/rep_dst:(P*P,P)  agg_dst:(P,P*P)
    Edge row index is  src*P + dst.    Returns (P, D).
    """
    n_pad = h.shape[0]
    hd = attn_blk.shape[0]
    n_heads = attn_blk.shape[1]

    feat = jnp.dot(h, w, preferred_element_type=jnp.float32) + b        # (P,2HD)
    src = feat[:, :hd]                                                  # fc_src(h)
    dst = feat[:, hd:]                                                  # fc_dst(h)
    src_e = jnp.dot(rep_src, src, preferred_element_type=jnp.float32)   # (PP,HD)
    dst_e = jnp.dot(rep_dst, dst, preferred_element_type=jnp.float32)   # (PP,HD)
    e = src_e + dst_e
    e = jnp.where(e > 0.0, e, 0.2 * e)                                  # LeakyReLU
    s = jnp.dot(e, attn_blk, preferred_element_type=jnp.float32)        # (PP,H)
    s = jnp.where(mask_e > 0.5, s, jnp.float32(-1e30))

    # Edge softmax per (destination node, head).  The max/sum over sources use
    # a sublane-tile-aligned (PP,H)->(P,P,H) split and a leading-axis reduce.
    m_node = jnp.max(s.reshape(n_pad, n_pad, n_heads), axis=0)          # (P,H)
    m_e = jnp.dot(rep_dst, m_node, preferred_element_type=jnp.float32)  # (PP,H)
    p = jnp.exp(s - m_e) * mask_e                                       # (PP,H)
    denom = jnp.dot(agg_dst, p, preferred_element_type=jnp.float32)     # (P,H)
    inv = pl.reciprocal(jnp.maximum(denom, jnp.float32(1e-20)), approx=True)
    alpha = p * jnp.dot(rep_dst, inv, preferred_element_type=jnp.float32)

    # message = alpha * fc_src(h_src); aggregate over sources; mean over heads.
    msg = jnp.dot(alpha, expd, preferred_element_type=jnp.float32) * src_e
    agg = jnp.dot(agg_dst, msg, preferred_element_type=jnp.float32)     # (P,HD)
    return jnp.dot(agg, meanh, preferred_element_type=jnp.float32) + bias


def _cpc_gnn_kernel(
        # data
        x_ref, fut_ref, hide_ref, time_ref,
        # static graph structure
        sel_ref, mask_e_ref, pool_ref, rep_src_ref, rep_dst_ref, agg_dst_ref,
        # EncoderRNN (LSTM) params
        wih_ref, whh_ref, lstmb_ref,
        # GATv2 conv1 / conv2 params
        c1w_ref, c1b_ref, c1attn_ref, c1expd_ref, c1meanh_ref, c1bias_ref,
        c2w_ref, c2b_ref, c2attn_ref, c2expd_ref, c2meanh_ref, c2bias_ref,
        # CPC params
        wkw_ref, wkb_ref, linblk_ref, linb_ref,
        # outputs
        out_ref, loss_ref,
        # scratch
        gx_ref,
        *, seq_len, num_timesteps):
    hidden = whh_ref.shape[0]
    n_pad = gx_ref.shape[0] // seq_len
    batch = pool_ref.shape[0]

    # ---------------- EncoderRNN (dgl.batch folded into `sel`) ---------------
    # TODO(synk): EncoderRNN assumed: single-layer batch_first LSTM, zero init
    # state, last hidden state as output.
    gx_all = jnp.dot(x_ref[...], wih_ref[...],
                     preferred_element_type=jnp.float32)          # (B*T*A, 4H)
    gx_ref[...] = jnp.dot(sel_ref[...], gx_all,
                          preferred_element_type=jnp.float32) + lstmb_ref[...]

    whh = whh_ref[...]
    h = jnp.zeros((n_pad, hidden), jnp.float32)
    c = jnp.zeros((n_pad, hidden), jnp.float32)
    for t in range(seq_len):        # static unroll; 8-row aligned gate blocks
        gates = gx_ref[t * n_pad:(t + 1) * n_pad, :] + jnp.dot(
            h, whh, preferred_element_type=jnp.float32)           # (P, 4H)
        sg = jax.nn.sigmoid(gates)  # one EUP pass over all four gate blocks
        tg = jnp.tanh(gates)        # one EUP pass over all four gate blocks
        i_g = sg[:, 0 * hidden:1 * hidden]
        f_g = sg[:, 1 * hidden:2 * hidden]
        g_g = tg[:, 2 * hidden:3 * hidden]
        o_g = sg[:, 3 * hidden:4 * hidden]
        c = f_g * c + i_g * g_g
        h = o_g * jnp.tanh(c)

    # ---------------- GATv2 conv1 (8 heads -> mean) + conv2 (1 head) ---------
    mask_e = mask_e_ref[...]
    rep_src = rep_src_ref[...]
    rep_dst = rep_dst_ref[...]
    agg_dst = agg_dst_ref[...]
    h1 = _gatv2_layer(h, c1w_ref[...], c1b_ref[...], c1attn_ref[...],
                      c1expd_ref[...], c1meanh_ref[...], c1bias_ref[...],
                      mask_e, rep_src, rep_dst, agg_dst)
    h2 = _gatv2_layer(h1, c2w_ref[...], c2b_ref[...], c2attn_ref[...],
                      c2expd_ref[...], c2meanh_ref[...], c2bias_ref[...],
                      mask_e, rep_src, rep_dst, agg_dst)

    # ---------------- per-graph avg-pool + context output --------------------
    ctx = jnp.dot(pool_ref[...], h2, preferred_element_type=jnp.float32)  # (B,G)
    g_dim = ctx.shape[1]
    hide_w = hide_ref.shape[1]
    out_ref[:, 0:g_dim] = ctx
    out_ref[:, g_dim:g_dim + hide_w] = hide_ref[...]
    out_ref[:, g_dim + hide_w:] = time_ref[...]

    # --------- Wk predictions (one matmul), future projection, InfoNCE -------
    c_dim = linb_ref.shape[1] // num_timesteps
    preds = jnp.dot(ctx, wkw_ref[...],
                    preferred_element_type=jnp.float32) + wkb_ref[...]  # (B,T*C)
    proj = jnp.dot(fut_ref[...], linblk_ref[...],
                   preferred_element_type=jnp.float32) + linb_ref[...]  # (B,T*C)

    eye = (lax.broadcasted_iota(jnp.int32, (batch, batch), 0)
           == lax.broadcasted_iota(jnp.int32, (batch, batch), 1))

    def _l2norm(v):                 # F.normalize(dim=-1); exact rsqrt (EUP)
        ss = jnp.sum(v * v, axis=-1, keepdims=True)
        return v * lax.rsqrt(jnp.maximum(ss, jnp.float32(1e-24)))

    acc = jnp.zeros((batch, 1), jnp.float32)
    for t in range(num_timesteps):  # static unroll over tiny (B,C)/(B,B) tiles
        xs = _l2norm(proj[:, t * c_dim:(t + 1) * c_dim])    # true futures
        ys = _l2norm(preds[:, t * c_dim:(t + 1) * c_dim])   # predictions
        tot = lax.dot_general(xs, ys, (((1,), (1,)), ((), ())),
                              preferred_element_type=jnp.float32)   # (B, B)
        mx = jnp.max(tot, axis=-1, keepdims=True)
        lse = mx + jnp.log(jnp.sum(jnp.exp(tot - mx), axis=-1, keepdims=True))
        acc = acc + jnp.sum(jnp.where(eye, tot - lse, 0.0),
                            axis=-1, keepdims=True)         # diag(log_softmax)
    total = jnp.sum(acc, axis=0, keepdims=True)              # (1, 1)
    loss_ref[...] = -total * (1.0 / (batch * num_timesteps))


# ------------------------------ glue / model ---------------------------------

def build_static_inputs(num_agents, max_agents, seq_len):
    """Static graph structure (dense stand-in for dgl.batch of fully-connected
    graphs) plus the edge-expand / aggregate matrices for the GAT layers."""
    batch = len(num_agents)
    n_total = int(sum(num_agents))
    n_pad = ((n_total + 7) // 8) * 8        # sublane-aligned node count

    # Node selection + time-major permutation: row t*n_pad + node picks
    # agent_obs[b, t, a, :] (folds dgl.batch + permute(1,0,2) into one matmul).
    sel = np.zeros((seq_len * n_pad, batch * seq_len * max_agents), np.float32)
    node = 0
    for b, n in enumerate(num_agents):
        for a in range(n):
            for t in range(seq_len):
                sel[t * n_pad + node, (b * seq_len + t) * max_agents + a] = 1.0
            node += 1

    # Edge-major (row = src*n_pad + dst) adjacency mask: fully connected per
    # graph, no self loops, padded nodes isolated.  Avg-pool matrix per graph.
    mask_e = np.zeros((n_pad * n_pad, 1), np.float32)
    pool = np.zeros((batch, n_pad), np.float32)
    off = 0
    for b, n in enumerate(num_agents):
        for i in range(n):          # destination
            for j in range(n):      # source
                if i != j:
                    mask_e[(off + j) * n_pad + (off + i), 0] = 1.0
        pool[b, off:off + n] = 1.0 / n
        off += n

    # Edge expansion / aggregation matrices shared by both GAT layers.
    rep_src = np.zeros((n_pad * n_pad, n_pad), np.float32)
    rep_dst = np.zeros((n_pad * n_pad, n_pad), np.float32)
    for j in range(n_pad):
        for i in range(n_pad):
            rep_src[j * n_pad + i, j] = 1.0
            rep_dst[j * n_pad + i, i] = 1.0
    agg_dst = np.ascontiguousarray(rep_dst.T)

    return dict(sel=jnp.asarray(sel), mask_e=jnp.asarray(mask_e),
                pool=jnp.asarray(pool), rep_src=jnp.asarray(rep_src),
                rep_dst=jnp.asarray(rep_dst), agg_dst=jnp.asarray(agg_dst))


def init_params(key, input_dim, hidden_dim, gnn_hidden, num_timesteps,
                contrastive_latent_dim):
    ks = jax.random.split(key, 20)
    s = 0.1
    h1_heads = 8
    p = {}
    # EncoderRNN (single-layer LSTM)
    p["w_ih"] = s * jax.random.normal(ks[0], (4 * hidden_dim, input_dim))
    p["w_hh"] = s * jax.random.normal(ks[1], (4 * hidden_dim, hidden_dim))
    p["b_ih"] = s * jax.random.normal(ks[2], (4 * hidden_dim,))
    p["b_hh"] = s * jax.random.normal(ks[3], (4 * hidden_dim,))
    # conv1: GATv2Conv(hidden_dim -> hidden_dim, 8 heads)
    p["c1_src_w"] = s * jax.random.normal(ks[4], (h1_heads * hidden_dim,
                                                  hidden_dim))
    p["c1_src_b"] = s * jax.random.normal(ks[5], (h1_heads * hidden_dim,))
    p["c1_dst_w"] = s * jax.random.normal(ks[6], (h1_heads * hidden_dim,
                                                  hidden_dim))
    p["c1_dst_b"] = s * jax.random.normal(ks[7], (h1_heads * hidden_dim,))
    p["c1_attn"] = s * jax.random.normal(ks[8], (h1_heads, hidden_dim))
    p["c1_bias"] = s * jax.random.normal(ks[9], (h1_heads * hidden_dim,))
    # conv2: GATv2Conv(hidden_dim -> gnn_hidden, 1 head)
    p["c2_src_w"] = s * jax.random.normal(ks[10], (gnn_hidden, hidden_dim))
    p["c2_src_b"] = s * jax.random.normal(ks[11], (gnn_hidden,))
    p["c2_dst_w"] = s * jax.random.normal(ks[12], (gnn_hidden, hidden_dim))
    p["c2_dst_b"] = s * jax.random.normal(ks[13], (gnn_hidden,))
    p["c2_attn"] = s * jax.random.normal(ks[14], (1, gnn_hidden))
    p["c2_bias"] = s * jax.random.normal(ks[15], (gnn_hidden,))
    # Wk: num_timesteps x Linear(gnn_hidden -> contrastive_latent_dim)
    p["wk_w"] = s * jax.random.normal(
        ks[16], (num_timesteps, contrastive_latent_dim, gnn_hidden))
    p["wk_b"] = s * jax.random.normal(
        ks[17], (num_timesteps, contrastive_latent_dim))
    # linear: Linear(2 -> contrastive_latent_dim)
    p["lin_w"] = s * jax.random.normal(ks[18], (contrastive_latent_dim, 2))
    p["lin_b"] = s * jax.random.normal(ks[19], (contrastive_latent_dim,))
    return jax.tree_util.tree_map(lambda a: a.astype(jnp.float32), p)


def preprocess_params(p):
    """Hoist all transposes / concats / block-diagonal builds out of the
    per-call path (done once)."""
    q = {}
    q["wih_t"] = p["w_ih"].T                              # (Din, 4H)
    q["whh_t"] = p["w_hh"].T                              # (H, 4H)
    q["lstm_b"] = (p["b_ih"] + p["b_hh"]).reshape(1, -1)  # (1, 4H)
    for tag in ("c1", "c2"):
        attn = np.asarray(p[f"{tag}_attn"])               # (H, D)
        nh, d = attn.shape
        q[f"{tag}_w"] = jnp.concatenate(
            [p[f"{tag}_src_w"].T, p[f"{tag}_dst_w"].T], axis=1)       # (Fin,2HD)
        q[f"{tag}_b"] = jnp.concatenate(
            [p[f"{tag}_src_b"], p[f"{tag}_dst_b"]]).reshape(1, -1)    # (1, 2HD)
        attn_blk = np.zeros((nh * d, nh), np.float32)     # block-diag attn
        expd = np.zeros((nh, nh * d), np.float32)         # per-head expander
        meanh = np.zeros((nh * d, d), np.float32)         # mean-over-heads
        for h in range(nh):
            attn_blk[h * d:(h + 1) * d, h] = attn[h]
            expd[h, h * d:(h + 1) * d] = 1.0
            meanh[h * d:(h + 1) * d, :] = np.eye(d, dtype=np.float32) / nh
        q[f"{tag}_attn"] = jnp.asarray(attn_blk)          # (H*D, H)
        q[f"{tag}_expd"] = jnp.asarray(expd)              # (H, H*D)
        q[f"{tag}_meanh"] = jnp.asarray(meanh)            # (H*D, D)
        q[f"{tag}_bias"] = p[f"{tag}_bias"].reshape(nh, d).mean(
            axis=0, keepdims=True)                        # (1, D)
    t_steps, c_dim, g_dim = p["wk_w"].shape
    q["wk_w"] = jnp.transpose(p["wk_w"], (2, 0, 1)).reshape(
        g_dim, t_steps * c_dim)                           # (G, T*C)
    q["wk_b"] = p["wk_b"].reshape(1, t_steps * c_dim)     # (1, T*C)
    lin_wt = np.asarray(p["lin_w"]).T                     # (2, C)
    lin_blk = np.zeros((t_steps * 2, t_steps * c_dim), np.float32)
    for t in range(t_steps):
        lin_blk[t * 2:(t + 1) * 2, t * c_dim:(t + 1) * c_dim] = lin_wt
    q["lin_blk"] = jnp.asarray(lin_blk)                   # (T*2, T*C)
    q["lin_b"] = jnp.tile(p["lin_b"].reshape(1, -1), (1, t_steps))  # (1, T*C)
    return q


def cpc_gnn_forward(q, statics, agent_obs, future_obs, hideout_obs,
                    timestep_obs):
    batch, seq_len = agent_obs.shape[0], agent_obs.shape[1]
    num_timesteps = future_obs.shape[1]
    hidden = q["whh_t"].shape[0]
    gnn_hidden = q["c2_bias"].shape[1]
    n_pad = statics["pool"].shape[1]
    ctx_dim = gnn_hidden + hideout_obs.shape[-1] + timestep_obs.shape[-1]

    # Only free row-major reshapes in the wrapper; no concat / transpose ops.
    x2d = agent_obs.reshape(batch * seq_len * agent_obs.shape[2],
                            agent_obs.shape[3])
    fut_wide = future_obs.reshape(batch, num_timesteps * future_obs.shape[2])

    kernel = functools.partial(_cpc_gnn_kernel, seq_len=seq_len,
                               num_timesteps=num_timesteps)
    agent_context, loss = pl.pallas_call(
        kernel,
        out_shape=(jax.ShapeDtypeStruct((batch, ctx_dim), jnp.float32),
                   jax.ShapeDtypeStruct((1, 1), jnp.float32)),
        scratch_shapes=[pltpu.VMEM((seq_len * n_pad, 4 * hidden),
                                   jnp.float32)],
    )(x2d, fut_wide, hideout_obs, timestep_obs,
      statics["sel"], statics["mask_e"], statics["pool"],
      statics["rep_src"], statics["rep_dst"], statics["agg_dst"],
      q["wih_t"], q["whh_t"], q["lstm_b"],
      q["c1_w"], q["c1_b"], q["c1_attn"], q["c1_expd"], q["c1_meanh"],
      q["c1_bias"],
      q["c2_w"], q["c2_b"], q["c2_attn"], q["c2_expd"], q["c2_meanh"],
      q["c2_bias"],
      q["wk_w"], q["wk_b"], q["lin_blk"], q["lin_b"])
    return agent_context, loss[0, 0]


if __name__ == "__main__":
    key = jax.random.PRNGKey(0)
    k_param, k_a, k_f, k_h, k_t = jax.random.split(key, 5)

    B, seq_len, max_agents, input_dim = 2, 8, 4, 4
    hidden_dim, gnn_hidden = 32, 32
    num_timesteps, contrastive_latent_dim = 12, 16
    num_agents = (3, 4)             # per-batch agent counts (static)

    params = init_params(k_param, input_dim, hidden_dim, gnn_hidden,
                         num_timesteps, contrastive_latent_dim)
    q = preprocess_params(params)
    statics = build_static_inputs(num_agents, max_agents, seq_len)

    agent_obs = jax.random.normal(
        k_a, (B, seq_len, max_agents, input_dim), jnp.float32)
    future_obs = jax.random.normal(k_f, (B, num_timesteps, 2), jnp.float32)
    hideout_obs = jax.random.normal(k_h, (B, 2), jnp.float32)
    timestep_obs = jax.random.normal(k_t, (B, 1), jnp.float32)

    forward = jax.jit(cpc_gnn_forward)
    agent_context, cpc_loss = forward(q, statics, agent_obs, future_obs,
                                      hideout_obs, timestep_obs)
    jax.block_until_ready((agent_context, cpc_loss))

    assert agent_context.shape == (B, gnn_hidden + 2 + 1)
    assert bool(jnp.all(jnp.isfinite(agent_context)))
    assert bool(jnp.isfinite(cpc_loss))
    print("KERNEL_OK")
</pallas_src>

<mosaic_0001>
module attributes {stable_mosaic.version = 11 : i64} {
  func.func @_cpc_gnn_kernel(%arg0: memref<64x4xf32, #tpu.memory_space<vmem>>, %arg1: memref<2x24xf32, #tpu.memory_space<vmem>>, %arg2: memref<2x2xf32, #tpu.memory_space<vmem>>, %arg3: memref<2x1xf32, #tpu.memory_space<vmem>>, %arg4: memref<64x64xf32, #tpu.memory_space<vmem>>, %arg5: memref<64x1xf32, #tpu.memory_space<vmem>>, %arg6: memref<2x8xf32, #tpu.memory_space<vmem>>, %arg7: memref<64x8xf32, #tpu.memory_space<vmem>>, %arg8: memref<64x8xf32, #tpu.memory_space<vmem>>, %arg9: memref<8x64xf32, #tpu.memory_space<vmem>>, %arg10: memref<4x128xf32, #tpu.memory_space<vmem>>, %arg11: memref<32x128xf32, #tpu.memory_space<vmem>>, %arg12: memref<1x128xf32, #tpu.memory_space<vmem>>, %arg13: memref<32x512xf32, #tpu.memory_space<vmem>>, %arg14: memref<1x512xf32, #tpu.memory_space<vmem>>, %arg15: memref<256x8xf32, #tpu.memory_space<vmem>>, %arg16: memref<8x256xf32, #tpu.memory_space<vmem>>, %arg17: memref<256x32xf32, #tpu.memory_space<vmem>>, %arg18: memref<1x32xf32, #tpu.memory_space<vmem>>, %arg19: memref<32x64xf32, #tpu.memory_space<vmem>>, %arg20: memref<1x64xf32, #tpu.memory_space<vmem>>, %arg21: memref<32x1xf32, #tpu.memory_space<vmem>>, %arg22: memref<1x32xf32, #tpu.memory_space<vmem>>, %arg23: memref<32x32xf32, #tpu.memory_space<vmem>>, %arg24: memref<1x32xf32, #tpu.memory_space<vmem>>, %arg25: memref<32x192xf32, #tpu.memory_space<vmem>>, %arg26: memref<1x192xf32, #tpu.memory_space<vmem>>, %arg27: memref<24x192xf32, #tpu.memory_space<vmem>>, %arg28: memref<1x192xf32, #tpu.memory_space<vmem>>, %arg29: memref<2x35xf32, #tpu.memory_space<vmem>>, %arg30: memref<1x1xf32, #tpu.memory_space<vmem>>, %arg31: memref<64x128xf32, #tpu.memory_space<vmem>>) attributes {dimension_semantics = [], scalar_prefetch = 0 : i64, scratch_operands = 1 : i64, tpu.core_type = #tpu.core_type<tc>} {
    %c0 = arith.constant 0 : index
    %c0_0 = arith.constant 0 : index
    %0 = vector.load %arg0[%c0, %c0_0] : memref<64x4xf32, #tpu.memory_space<vmem>>, vector<64x4xf32>
    %c0_1 = arith.constant 0 : index
    %c0_2 = arith.constant 0 : index
    %1 = vector.load %arg10[%c0_1, %c0_2] : memref<4x128xf32, #tpu.memory_space<vmem>>, vector<4x128xf32>
    %cst = arith.constant dense<0.000000e+00> : vector<64x128xf32>
    %2 = tpu.matmul %0, %1, %cst {dimension_numbers = #tpu.dot_dimension_numbers<[1], [0], [0], [1], [0, 0, 1, 1], [], []>} : vector<64x4xf32>, vector<4x128xf32>, vector<64x128xf32> -> vector<64x128xf32>
    %c0_3 = arith.constant 0 : index
    %c0_4 = arith.constant 0 : index
    %3 = vector.load %arg4[%c0_3, %c0_4] : memref<64x64xf32, #tpu.memory_space<vmem>>, vector<64x64xf32>
    %cst_5 = arith.constant dense<0.000000e+00> : vector<64x128xf32>
    %4 = tpu.matmul %3, %2, %cst_5 {dimension_numbers = #tpu.dot_dimension_numbers<[1], [0], [0], [1], [0, 0, 1, 1], [], []>} : vector<64x64xf32>, vector<64x128xf32>, vector<64x128xf32> -> vector<64x128xf32>
    %c0_6 = arith.constant 0 : index
    %c0_7 = arith.constant 0 : index
    %5 = vector.load %arg12[%c0_6, %c0_7] : memref<1x128xf32, #tpu.memory_space<vmem>>, vector<1x128xf32>
    %6 = vector.broadcast %5 : vector<1x128xf32> to vector<64x128xf32>
    %7 = arith.addf %4, %6 : vector<64x128xf32>
    %c0_8 = arith.constant 0 : index
    %c0_9 = arith.constant 0 : index
    %8 = vector.load %arg31[%c0_8, %c0_9] : memref<64x128xf32, #tpu.memory_space<vmem>>, vector<64x128xf32>
    tpu.vector_store %arg31[%c0_8, %c0_9], %7 {strides = array<i32>} : memref<64x128xf32, #tpu.memory_space<vmem>>, vector<64x128xf32>,
    %c0_10 = arith.constant 0 : index
    %c0_11 = arith.constant 0 : index
    %9 = vector.load %arg11[%c0_10, %c0_11] : memref<32x128xf32, #tpu.memory_space<vmem>>, vector<32x128xf32>
    %cst_12 = arith.constant 0.000000e+00 : f32
    %10 = vector.broadcast %cst_12 : f32 to vector<8x32xf32>
    %cst_13 = arith.constant 0.000000e+00 : f32
    %11 = vector.broadcast %cst_13 : f32 to vector<8x32xf32>
    %c0_14 = arith.constant 0 : index
    %c0_15 = arith.constant 0 : index
    %12 = vector.load %arg31[%c0_14, %c0_15] : memref<64x128xf32, #tpu.memory_space<vmem>>, vector<8x128xf32>
    %cst_16 = arith.constant dense<0.000000e+00> : vector<8x128xf32>
    %13 = tpu.matmul %10, %9, %cst_16 {dimension_numbers = #tpu.dot_dimension_numbers<[1], [0], [0], [1], [0, 0, 1, 1], [], []>} : vector<8x32xf32>, vector<32x128xf32>, vector<8x128xf32> -> vector<8x128xf32>
    %14 = arith.addf %12, %13 : vector<8x128xf32>
    %15 = arith.negf %14 : vector<8x128xf32>
    %16 = math.exp %15 : vector<8x128xf32>
    %cst_17 = arith.constant 1.000000e+00 : f32
    %17 = vector.broadcast %cst_17 : f32 to vector<8x128xf32>
    %18 = arith.addf %17, %16 : vector<8x128xf32>
    %19 = arith.divf %17, %18 : vector<8x128xf32>
    %20 = math.tanh %14 : vector<8x128xf32>
    %21 = vector.extract_strided_slice %19 {offsets = [0, 0], sizes = [8, 32], strides = [1, 1]} : vector<8x128xf32> to vector<8x32xf32>
    %22 = vector.extract_strided_slice %19 {offsets = [0, 32], sizes = [8, 32], strides = [1, 1]} : vector<8x128xf32> to vector<8x32xf32>
    %23 = vector.extract_strided_slice %20 {offsets = [0, 64], sizes = [8, 32], strides = [1, 1]} : vector<8x128xf32> to vector<8x32xf32>
    %24 = vector.extract_strided_slice %19 {offsets = [0, 96], sizes = [8, 32], strides = [1, 1]} : vector<8x128xf32> to vector<8x32xf32>
    %25 = arith.mulf %22, %11 : vector<8x32xf32>
    %26 = arith.mulf %21, %23 : vector<8x32xf32>
    %27 = arith.addf %25, %26 : vector<8x32xf32>
    %28 = math.tanh %27 : vector<8x32xf32>
    %29 = arith.mulf %24, %28 : vector<8x32xf32>
    %c8 = arith.constant 8 : index
    %c0_18 = arith.constant 0 : index
    %30 = vector.load %arg31[%c8, %c0_18] : memref<64x128xf32, #tpu.memory_space<vmem>>, vector<8x128xf32>
    %cst_19 = arith.constant dense<0.000000e+00> : vector<8x128xf32>
    %31 = tpu.matmul %29, %9, %cst_19 {dimension_numbers = #tpu.dot_dimension_numbers<[1], [0], [0], [1], [0, 0, 1, 1], [], []>} : vector<8x32xf32>, vector<32x128xf32>, vector<8x128xf32> -> vector<8x128xf32>
    %32 = arith.addf %30, %31 : vector<8x128xf32>
    %33 = arith.negf %32 : vector<8x128xf32>
    %34 = math.exp %33 : vector<8x128xf32>
    %cst_20 = arith.constant 1.000000e+00 : f32
    %35 = vector.broadcast %cst_20 : f32 to vector<8x128xf32>
    %36 = arith.addf %35, %34 : vector<8x128xf32>
    %37 = arith.divf %35, %36 : vector<8x128xf32>
    %38 = math.tanh %32 : vector<8x128xf32>
    %39 = vector.extract_strided_slice %37 {offsets = [0, 0], sizes = [8, 32], strides = [1, 1]} : vector<8x128xf32> to vector<8x32xf32>
    %40 = vector.extract_strided_slice %37 {offsets = [0, 32], sizes = [8, 32], strides = [1, 1]} : vector<8x128xf32> to vector<8x32xf32>
    %41 = vector.extract_strided_slice %38 {offsets = [0, 64], sizes = [8, 32], strides = [1, 1]} : vector<8x128xf32> to vector<8x32xf32>
    %42 = vector.extract_strided_slice %37 {offsets = [0, 96], sizes = [8, 32], strides = [1, 1]} : vector<8x128xf32> to vector<8x32xf32>
    %43 = arith.mulf %40, %27 : vector<8x32xf32>
    %44 = arith.mulf %39, %41 : vector<8x32xf32>
    %45 = arith.addf %43, %44 : vector<8x32xf32>
    %46 = math.tanh %45 : vector<8x32xf32>
    %47 = arith.mulf %42, %46 : vector<8x32xf32>
    %c16 = arith.constant 16 : index
    %c0_21 = arith.constant 0 : index
    %48 = vector.load %arg31[%c16, %c0_21] : memref<64x128xf32, #tpu.memory_space<vmem>>, vector<8x128xf32>
    %cst_22 = arith.constant dense<0.000000e+00> : vector<8x128xf32>
    %49 = tpu.matmul %47, %9, %cst_22 {dimension_numbers = #tpu.dot_dimension_numbers<[1], [0], [0], [1], [0, 0, 1, 1], [], []>} : vector<8x32xf32>, vector<32x128xf32>, vector<8x128xf32> -> vector<8x128xf32>
    %50 = arith.addf %48, %49 : vector<8x128xf32>
    %51 = arith.negf %50 : vector<8x128xf32>
    %52 = math.exp %51 : vector<8x128xf32>
    %cst_23 = arith.constant 1.000000e+00 : f32
    %53 = vector.broadcast %cst_23 : f32 to vector<8x128xf32>
    %54 = arith.addf %53, %52 : vector<8x128xf32>
    %55 = arith.divf %53, %54 : vector<8x128xf32>
    %56 = math.tanh %50 : vector<8x128xf32>
    %57 = vector.extract_strided_slice %55 {offsets = [0, 0], sizes = [8, 32], strides = [1, 1]} : vector<8x128xf32> to vector<8x32xf32>
    %58 = vector.extract_strided_slice %55 {offsets = [0, 32], sizes = [8, 32], strides = [1, 1]} : vector<8x128xf32> to vector<8x32xf32>
    %59 = vector.extract_strided_slice %56 {offsets = [0, 64], sizes = [8, 32], strides = [1, 1]} : vector<8x128xf32> to vector<8x32xf32>
    %60 = vector.extract_strided_slice %55 {offsets = [0, 96], sizes = [8, 32], strides = [1, 1]} : vector<8x128xf32> to vector<8x32xf32>
    %61 = arith.mulf %58, %45 : vector<8x32xf32>
    %62 = arith.mulf %57, %59 : vector<8x32xf32>
    %63 = arith.addf %61, %62 : vector<8x32xf32>
    %64 = math.tanh %63 : vector<8x32xf32>
    %65 = arith.mulf %60, %64 : vector<8x32xf32>
    %c24 = arith.constant 24 : index
    %c0_24 = arith.constant 0 : index
    %66 = vector.load %arg31[%c24, %c0_24] : memref<64x128xf32, #tpu.memory_space<vmem>>, vector<8x128xf32>
    %cst_25 = arith.constant dense<0.000000e+00> : vector<8x128xf32>
    %67 = tpu.matmul %65, %9, %cst_25 {dimension_numbers = #tpu.dot_dimension_numbers<[1], [0], [0], [1], [0, 0, 1, 1], [], []>} : vector<8x32xf32>, vector<32x128xf32>, vector<8x128xf32> -> vector<8x128xf32>
    %68 = arith.addf %66, %67 : vector<8x128xf32>
    %69 = arith.negf %68 : vector<8x128xf32>
    %70 = math.exp %69 : vector<8x128xf32>
    %cst_26 = arith.constant 1.000000e+00 : f32
    %71 = vector.broadcast %cst_26 : f32 to vector<8x128xf32>
    %72 = arith.addf %71, %70 : vector<8x128xf32>
    %73 = arith.divf %71, %72 : vector<8x128xf32>
    %74 = math.tanh %68 : vector<8x128xf32>
    %75 = vector.extract_strided_slice %73 {offsets = [0, 0], sizes = [8, 32], strides = [1, 1]} : vector<8x128xf32> to vector<8x32xf32>
    %76 = vector.extract_strided_slice %73 {offsets = [0, 32], sizes = [8, 32], strides = [1, 1]} : vector<8x128xf32> to vector<8x32xf32>
    %77 = vector.extract_strided_slice %74 {offsets = [0, 64], sizes = [8, 32], strides = [1, 1]} : vector<8x128xf32> to vector<8x32xf32>
    %78 = vector.extract_strided_slice %73 {offsets = [0, 96], sizes = [8, 32], strides = [1, 1]} : vector<8x128xf32> to vector<8x32xf32>
    %79 = arith.mulf %76, %63 : vector<8x32xf32>
    %80 = arith.mulf %75, %77 : vector<8x32xf32>
    %81 = arith.addf %79, %80 : vector<8x32xf32>
    %82 = math.tanh %81 : vector<8x32xf32>
    %83 = arith.mulf %78, %82 : vector<8x32xf32>
    %c32 = arith.constant 32 : index
    %c0_27 = arith.constant 0 : index
    %84 = vector.load %arg31[%c32, %c0_27] : memref<64x128xf32, #tpu.memory_space<vmem>>, vector<8x128xf32>
    %cst_28 = arith.constant dense<0.000000e+00> : vector<8x128xf32>
    %85 = tpu.matmul %83, %9, %cst_28 {dimension_numbers = #tpu.dot_dimension_numbers<[1], [0], [0], [1], [0, 0, 1, 1], [], []>} : vector<8x32xf32>, vector<32x128xf32>, vector<8x128xf32> -> vector<8x128xf32>
    %86 = arith.addf %84, %85 : vector<8x128xf32>
    %87 = arith.negf %86 : vector<8x128xf32>
    %88 = math.exp %87 : vector<8x128xf32>
    %cst_29 = arith.constant 1.000000e+00 : f32
    %89 = vector.broadcast %cst_29 : f32 to vector<8x128xf32>
    %90 = arith.addf %89, %88 : vector<8x128xf32>
    %91 = arith.divf %89, %90 : vector<8x128xf32>
    %92 = math.tanh %86 : vector<8x128xf32>
    %93 = vector.extract_strided_slice %91 {offsets = [0, 0], sizes = [8, 32], strides = [1, 1]} : vector<8x128xf32> to vector<8x32xf32>
    %94 = vector.extract_strided_slice %91 {offsets = [0, 32], sizes = [8, 32], strides = [1, 1]} : vector<8x128xf32> to vector<8x32xf32>
    %95 = vector.extract_strided_slice %92 {offsets = [0, 64], sizes = [8, 32], strides = [1, 1]} : vector<8x128xf32> to vector<8x32xf32>
    %96 = vector.extract_strided_slice %91 {offsets = [0, 96], sizes = [8, 32], strides = [1, 1]} : vector<8x128xf32> to vector<8x32xf32>
    %97 = arith.mulf %94, %81 : vector<8x32xf32>
    %98 = arith.mulf %93, %95 : vector<8x32xf32>
    %99 = arith.addf %97, %98 : vector<8x32xf32>
    %100 = math.tanh %99 : vector<8x32xf32>
    %101 = arith.mulf %96, %100 : vector<8x32xf32>
    %c40 = arith.constant 40 : index
    %c0_30 = arith.constant 0 : index
    %102 = vector.load %arg31[%c40, %c0_30] : memref<64x128xf32, #tpu.memory_space<vmem>>, vector<8x128xf32>
    %cst_31 = arith.constant dense<0.000000e+00> : vector<8x128xf32>
    %103 = tpu.matmul %101, %9, %cst_31 {dimension_numbers = #tpu.dot_dimension_numbers<[1], [0], [0], [1], [0, 0, 1, 1], [], []>} : vector<8x32xf32>, vector<32x128xf32>, vector<8x128xf32> -> vector<8x128xf32>
    %104 = arith.addf %102, %103 : vector<8x128xf32>
    %105 = arith.negf %104 : vector<8x128xf32>
    %106 = math.exp %105 : vector<8x128xf32>
    %cst_32 = arith.constant 1.000000e+00 : f32
    %107 = vector.broadcast %cst_32 : f32 to vector<8x128xf32>
    %108 = arith.addf %107, %106 : vector<8x128xf32>
    %109 = arith.divf %107, %108 : vector<8x128xf32>
    %110 = math.tanh %104 : vector<8x128xf32>
    %111 = vector.extract_strided_slice %109 {offsets = [0, 0], sizes = [8, 32], strides = [1, 1]} : vector<8x128xf32> to vector<8x32xf32>
    %112 = vector.extract_strided_slice %109 {offsets = [0, 32], sizes = [8, 32], strides = [1, 1]} : vector<8x128xf32> to vector<8x32xf32>
    %113 = vector.extract_strided_slice %110 {offsets = [0, 64], sizes = [8, 32], strides = [1, 1]} : vector<8x128xf32> to vector<8x32xf32>
    %114 = vector.extract_strided_slice %109 {offsets = [0, 96], sizes = [8, 32], strides = [1, 1]} : vector<8x128xf32> to vector<8x32xf32>
    %115 = arith.mulf %112, %99 : vector<8x32xf32>
    %116 = arith.mulf %111, %113 : vector<8x32xf32>
    %117 = arith.addf %115, %116 : vector<8x32xf32>
    %118 = math.tanh %117 : vector<8x32xf32>
    %119 = arith.mulf %114, %118 : vector<8x32xf32>
    %c48 = arith.constant 48 : index
    %c0_33 = arith.constant 0 : index
    %120 = vector.load %arg31[%c48, %c0_33] : memref<64x128xf32, #tpu.memory_space<vmem>>, vector<8x128xf32>
    %cst_34 = arith.constant dense<0.000000e+00> : vector<8x128xf32>
    %121 = tpu.matmul %119, %9, %cst_34 {dimension_numbers = #tpu.dot_dimension_numbers<[1], [0], [0], [1], [0, 0, 1, 1], [], []>} : vector<8x32xf32>, vector<32x128xf32>, vector<8x128xf32> -> vector<8x128xf32>
    %122 = arith.addf %120, %121 : vector<8x128xf32>
    %123 = arith.negf %122 : vector<8x128xf32>
    %124 = math.exp %123 : vector<8x128xf32>
    %cst_35 = arith.constant 1.000000e+00 : f32
    %125 = vector.broadcast %cst_35 : f32 to vector<8x128xf32>
    %126 = arith.addf %125, %124 : vector<8x128xf32>
    %127 = arith.divf %125, %126 : vector<8x128xf32>
    %128 = math.tanh %122 : vector<8x128xf32>
    %129 = vector.extract_strided_slice %127 {offsets = [0, 0], sizes = [8, 32], strides = [1, 1]} : vector<8x128xf32> to vector<8x32xf32>
    %130 = vector.extract_strided_slice %127 {offsets = [0, 32], sizes = [8, 32], strides = [1, 1]} : vector<8x128xf32> to vector<8x32xf32>
    %131 = vector.extract_strided_slice %128 {offsets = [0, 64], sizes = [8, 32], strides = [1, 1]} : vector<8x128xf32> to vector<8x32xf32>
    %132 = vector.extract_strided_slice %127 {offsets = [0, 96], sizes = [8, 32], strides = [1, 1]} : vector<8x128xf32> to vector<8x32xf32>
    %133 = arith.mulf %130, %117 : vector<8x32xf32>
    %134 = arith.mulf %129, %131 : vector<8x32xf32>
    %135 = arith.addf %133, %134 : vector<8x32xf32>
    %136 = math.tanh %135 : vector<8x32xf32>
    %137 = arith.mulf %132, %136 : vector<8x32xf32>
    %c56 = arith.constant 56 : index
    %c0_36 = arith.constant 0 : index
    %138 = vector.load %arg31[%c56, %c0_36] : memref<64x128xf32, #tpu.memory_space<vmem>>, vector<8x128xf32>
    %cst_37 = arith.constant dense<0.000000e+00> : vector<8x128xf32>
    %139 = tpu.matmul %137, %9, %cst_37 {dimension_numbers = #tpu.dot_dimension_numbers<[1], [0], [0], [1], [0, 0, 1, 1], [], []>} : vector<8x32xf32>, vector<32x128xf32>, vector<8x128xf32> -> vector<8x128xf32>
    %140 = arith.addf %138, %139 : vector<8x128xf32>
    %141 = arith.negf %140 : vector<8x128xf32>
    %142 = math.exp %141 : vector<8x128xf32>
    %cst_38 = arith.constant 1.000000e+00 : f32
    %143 = vector.broadcast %cst_38 : f32 to vector<8x128xf32>
    %144 = arith.addf %143, %142 : vector<8x128xf32>
    %145 = arith.divf %143, %144 : vector<8x128xf32>
    %146 = math.tanh %140 : vector<8x128xf32>
    %147 = vector.extract_strided_slice %145 {offsets = [0, 0], sizes = [8, 32], strides = [1, 1]} : vector<8x128xf32> to vector<8x32xf32>
    %148 = vector.extract_strided_slice %145 {offsets = [0, 32], sizes = [8, 32], strides = [1, 1]} : vector<8x128xf32> to vector<8x32xf32>
    %149 = vector.extract_strided_slice %146 {offsets = [0, 64], sizes = [8, 32], strides = [1, 1]} : vector<8x128xf32> to vector<8x32xf32>
    %150 = vector.extract_strided_slice %145 {offsets = [0, 96], sizes = [8, 32], strides = [1, 1]} : vector<8x128xf32> to vector<8x32xf32>
    %151 = arith.mulf %148, %135 : vector<8x32xf32>
    %152 = arith.mulf %147, %149 : vector<8x32xf32>
    %153 = arith.addf %151, %152 : vector<8x32xf32>
    %154 = math.tanh %153 : vector<8x32xf32>
    %155 = arith.mulf %150, %154 : vector<8x32xf32>
    %c0_39 = arith.constant 0 : index
    %c0_40 = arith.constant 0 : index
    %156 = vector.load %arg5[%c0_39, %c0_40] : memref<64x1xf32, #tpu.memory_space<vmem>>, vector<64x1xf32>
    %c0_41 = arith.constant 0 : index
    %c0_42 = arith.constant 0 : index
    %157 = vector.load %arg7[%c0_41, %c0_42] : memref<64x8xf32, #tpu.memory_space<vmem>>, vector<64x8xf32>
    %c0_43 = arith.constant 0 : index
    %c0_44 = arith.constant 0 : index
    %158 = vector.load %arg8[%c0_43, %c0_44] : memref<64x8xf32, #tpu.memory_space<vmem>>, vector<64x8xf32>
    %c0_45 = arith.constant 0 : index
    %c0_46 = arith.constant 0 : index
    %159 = vector.load %arg9[%c0_45, %c0_46] : memref<8x64xf32, #tpu.memory_space<vmem>>, vector<8x64xf32>
    %c0_47 = arith.constant 0 : index
    %c0_48 = arith.constant 0 : index
    %160 = vector.load %arg13[%c0_47, %c0_48] : memref<32x512xf32, #tpu.memory_space<vmem>>, vector<32x512xf32>
    %c0_49 = arith.constant 0 : index
    %c0_50 = arith.constant 0 : index
    %161 = vector.load %arg14[%c0_49, %c0_50] : memref<1x512xf32, #tpu.memory_space<vmem>>, vector<1x512xf32>
    %c0_51 = arith.constant 0 : index
    %c0_52 = arith.constant 0 : index
    %162 = vector.load %arg15[%c0_51, %c0_52] : memref<256x8xf32, #tpu.memory_space<vmem>>, vector<256x8xf32>
    %c0_53 = arith.constant 0 : index
    %c0_54 = arith.constant 0 : index
    %163 = vector.load %arg16[%c0_53, %c0_54] : memref<8x256xf32, #tpu.memory_space<vmem>>, vector<8x256xf32>
    %c0_55 = arith.constant 0 : index
    %c0_56 = arith.constant 0 : index
    %164 = vector.load %arg17[%c0_55, %c0_56] : memref<256x32xf32, #tpu.memory_space<vmem>>, vector<256x32xf32>
    %c0_57 = arith.constant 0 : index
    %c0_58 = arith.constant 0 : index
    %165 = vector.load %arg18[%c0_57, %c0_58] : memref<1x32xf32, #tpu.memory_space<vmem>>, vector<1x32xf32>
    %cst_59 = arith.constant dense<0.000000e+00> : vector<8x512xf32>
    %166 = tpu.matmul %155, %160, %cst_59 {dimension_numbers = #tpu.dot_dimension_numbers<[1], [0], [0], [1], [0, 0, 1, 1], [], []>} : vector<8x32xf32>, vector<32x512xf32>, vector<8x512xf32> -> vector<8x512xf32>
    %167 = vector.broadcast %161 : vector<1x512xf32> to vector<8x512xf32>
    %168 = arith.addf %166, %167 : vector<8x512xf32>
    %169 = vector.extract_strided_slice %168 {offsets = [0, 0], sizes = [8, 256], strides = [1, 1]} : vector<8x512xf32> to vector<8x256xf32>
    %170 = vector.extract_strided_slice %168 {offsets = [0, 256], sizes = [8, 256], strides = [1, 1]} : vector<8x512xf32> to vector<8x256xf32>
    %cst_60 = arith.constant dense<0.000000e+00> : vector<64x256xf32>
    %171 = tpu.matmul %157, %169, %cst_60 {dimension_numbers = #tpu.dot_dimension_numbers<[1], [0], [0], [1], [0, 0, 1, 1], [], []>} : vector<64x8xf32>, vector<8x256xf32>, vector<64x256xf32> -> vector<64x256xf32>
    %cst_61 = arith.constant dense<0.000000e+00> : vector<64x256xf32>
    %172 = tpu.matmul %158, %170, %cst_61 {dimension_numbers = #tpu.dot_dimension_numbers<[1], [0], [0], [1], [0, 0, 1, 1], [], []>} : vector<64x8xf32>, vector<8x256xf32>, vector<64x256xf32> -> vector<64x256xf32>
    %173 = arith.addf %171, %172 : vector<64x256xf32>
    %cst_62 = arith.constant 0.000000e+00 : f32
    %174 = vector.broadcast %cst_62 : f32 to vector<64x256xf32>
    %175 = arith.cmpf ogt, %173, %174 : vector<64x256xf32>
    %cst_63 = arith.constant 2.000000e-01 : f32
    %176 = vector.broadcast %cst_63 : f32 to vector<64x256xf32>
    %177 = arith.mulf %176, %173 : vector<64x256xf32>
    %178 = arith.select %175, %173, %177 : vector<64x256xi1>, vector<64x256xf32>
    %cst_64 = arith.constant dense<0.000000e+00> : vector<64x8xf32>
    %179 = tpu.matmul %178, %162, %cst_64 {dimension_numbers = #tpu.dot_dimension_numbers<[1], [0], [0], [1], [0, 0, 1, 1], [], []>} : vector<64x256xf32>, vector<256x8xf32>, vector<64x8xf32> -> vector<64x8xf32>
    %cst_65 = arith.constant 5.000000e-01 : f32
    %180 = vector.broadcast %cst_65 : f32 to vector<64x1xf32>
    %181 = arith.cmpf ogt, %156, %180 : vector<64x1xf32>
    %cst_66 = arith.constant -1.000000e+30 : f32
    %182 = vector.shape_cast %181 : vector<64x1xi1> to vector<64x1xi1>
    %183 = vector.broadcast %182 : vector<64x1xi1> to vector<64x8xi1>
    %184 = vector.broadcast %cst_66 : f32 to vector<64x8xf32>
    %185 = arith.select %183, %179, %184 : vector<64x8xi1>, vector<64x8xf32>
    %186 = vector.shape_cast %185 : vector<64x8xf32> to vector<8x8x8xf32>
    %cst_67 = arith.constant dense<0xFF800000> : vector<8x8xf32>
    %187 = vector.multi_reduction <maximumf>, %186, %cst_67 [0] : vector<8x8x8xf32> to vector<8x8xf32>
    %cst_68 = arith.constant dense<0.000000e+00> : vector<64x8xf32>
    %188 = tpu.matmul %158, %187, %cst_68 {dimension_numbers = #tpu.dot_dimension_numbers<[1], [0], [0], [1], [0, 0, 1, 1], [], []>} : vector<64x8xf32>, vector<8x8xf32>, vector<64x8xf32> -> vector<64x8xf32>
    %189 = arith.subf %185, %188 : vector<64x8xf32>
    %190 = math.exp %189 : vector<64x8xf32>
    %191 = vector.broadcast %156 : vector<64x1xf32> to vector<64x8xf32>
    %192 = arith.mulf %190, %191 : vector<64x8xf32>
    %cst_69 = arith.constant dense<0.000000e+00> : vector<8x8xf32>
    %193 = tpu.matmul %159, %192, %cst_69 {dimension_numbers = #tpu.dot_dimension_numbers<[1], [0], [0], [1], [0, 0, 1, 1], [], []>} : vector<8x64xf32>, vector<64x8xf32>, vector<8x8xf32> -> vector<8x8xf32>
    %cst_70 = arith.constant 9.99999968E-21 : f32
    %194 = vector.broadcast %cst_70 : f32 to vector<8x8xf32>
    %195 = arith.maximumf %193, %194 : vector<8x8xf32>
    %196 = tpu.reciprocal %195 {approx = true} : vector<8x8xf32> -> vector<8x8xf32>
    %cst_71 = arith.constant dense<0.000000e+00> : vector<64x8xf32>
    %197 = tpu.matmul %158, %196, %cst_71 {dimension_numbers = #tpu.dot_dimension_numbers<[1], [0], [0], [1], [0, 0, 1, 1], [], []>} : vector<64x8xf32>, vector<8x8xf32>, vector<64x8xf32> -> vector<64x8xf32>
    %198 = arith.mulf %192, %197 : vector<64x8xf32>
    %cst_72 = arith.constant dense<0.000000e+00> : vector<64x256xf32>
    %199 = tpu.matmul %198, %163, %cst_72 {dimension_numbers = #tpu.dot_dimension_numbers<[1], [0], [0], [1], [0, 0, 1, 1], [], []>} : vector<64x8xf32>, vector<8x256xf32>, vector<64x256xf32> -> vector<64x256xf32>
    %200 = arith.mulf %199, %171 : vector<64x256xf32>
    %cst_73 = arith.constant dense<0.000000e+00> : vector<8x256xf32>
    %201 = tpu.matmul %159, %200, %cst_73 {dimension_numbers = #tpu.dot_dimension_numbers<[1], [0], [0], [1], [0, 0, 1, 1], [], []>} : vector<8x64xf32>, vector<64x256xf32>, vector<8x256xf32> -> vector<8x256xf32>
    %cst_74 = arith.constant dense<0.000000e+00> : vector<8x32xf32>
    %202 = tpu.matmul %201, %164, %cst_74 {dimension_numbers = #tpu.dot_dimension_numbers<[1], [0], [0], [1], [0, 0, 1, 1], [], []>} : vector<8x256xf32>, vector<256x32xf32>, vector<8x32xf32> -> vector<8x32xf32>
    %203 = vector.broadcast %165 : vector<1x32xf32> to vector<8x32xf32>
    %204 = arith.addf %202, %203 : vector<8x32xf32>
    %c0_75 = arith.constant 0 : index
    %c0_76 = arith.constant 0 : index
    %205 = vector.load %arg19[%c0_75, %c0_76] : memref<32x64xf32, #tpu.memory_space<vmem>>, vector<32x64xf32>
    %c0_77 = arith.constant 0 : index
    %c0_78 = arith.constant 0 : index
    %206 = vector.load %arg20[%c0_77, %c0_78] : memref<1x64xf32, #tpu.memory_space<vmem>>, vector<1x64xf32>
    %c0_79 = arith.constant 0 : index
    %c0_80 = arith.constant 0 : index
    %207 = vector.load %arg21[%c0_79, %c0_80] : memref<32x1xf32, #tpu.memory_space<vmem>>, vector<32x1xf32>
    %c0_81 = arith.constant 0 : index
    %c0_82 = arith.constant 0 : index
    %208 = vector.load %arg22[%c0_81, %c0_82] : memref<1x32xf32, #tpu.memory_space<vmem>>, vector<1x32xf32>
    %c0_83 = arith.constant 0 : index
    %c0_84 = arith.constant 0 : index
    %209 = vector.load %arg23[%c0_83, %c0_84] : memref<32x32xf32, #tpu.memory_space<vmem>>, vector<32x32xf32>
    %c0_85 = arith.constant 0 : index
    %c0_86 = arith.constant 0 : index
    %210 = vector.load %arg24[%c0_85, %c0_86] : memref<1x32xf32, #tpu.memory_space<vmem>>, vector<1x32xf32>
    %cst_87 = arith.constant dense<0.000000e+00> : vector<8x64xf32>
    %211 = tpu.matmul %204, %205, %cst_87 {dimension_numbers = #tpu.dot_dimension_numbers<[1], [0], [0], [1], [0, 0, 1, 1], [], []>} : vector<8x32xf32>, vector<32x64xf32>, vector<8x64xf32> -> vector<8x64xf32>
    %212 = vector.broadcast %206 : vector<1x64xf32> to vector<8x64xf32>
    %213 = arith.addf %211, %212 : vector<8x64xf32>
    %214 = vector.extract_strided_slice %213 {offsets = [0, 0], sizes = [8, 32], strides = [1, 1]} : vector<8x64xf32> to vector<8x32xf32>
    %215 = vector.extract_strided_slice %213 {offsets = [0, 32], sizes = [8, 32], strides = [1, 1]} : vector<8x64xf32> to vector<8x32xf32>
    %cst_88 = arith.constant dense<0.000000e+00> : vector<64x32xf32>
    %216 = tpu.matmul %157, %214, %cst_88 {dimension_numbers = #tpu.dot_dimension_numbers<[1], [0], [0], [1], [0, 0, 1, 1], [], []>} : vector<64x8xf32>, vector<8x32xf32>, vector<64x32xf32> -> vector<64x32xf32>
    %cst_89 = arith.constant dense<0.000000e+00> : vector<64x32xf32>
    %217 = tpu.matmul %158, %215, %cst_89 {dimension_numbers = #tpu.dot_dimension_numbers<[1], [0], [0], [1], [0, 0, 1, 1], [], []>} : vector<64x8xf32>, vector<8x32xf32>, vector<64x32xf32> -> vector<64x32xf32>
    %218 = arith.addf %216, %217 : vector<64x32xf32>
    %cst_90 = arith.constant 0.000000e+00 : f32
    %219 = vector.broadcast %cst_90 : f32 to vector<64x32xf32>
    %220 = arith.cmpf ogt, %218, %219 : vector<64x32xf32>
    %cst_91 = arith.constant 2.000000e-01 : f32
    %221 = vector.broadcast %cst_91 : f32 to vector<64x32xf32>
    %222 = arith.mulf %221, %218 : vector<64x32xf32>
    %223 = arith.select %220, %218, %222 : vector<64x32xi1>, vector<64x32xf32>
    %cst_92 = arith.constant dense<0.000000e+00> : vector<64x1xf32>
    %224 = tpu.matmul %223, %207, %cst_92 {dimension_numbers = #tpu.dot_dimension_numbers<[1], [0], [0], [1], [0, 0, 1, 1], [], []>} : vector<64x32xf32>, vector<32x1xf32>, vector<64x1xf32> -> vector<64x1xf32>
    %cst_93 = arith.constant 5.000000e-01 : f32
    %225 = vector.broadcast %cst_93 : f32 to vector<64x1xf32>
    %226 = arith.cmpf ogt, %156, %225 : vector<64x1xf32>
    %cst_94 = arith.constant -1.000000e+30 : f32
    %227 = vector.broadcast %cst_94 : f32 to vector<64x1xf32>
    %228 = arith.select %226, %224, %227 : vector<64x1xi1>, vector<64x1xf32>
    %229 = vector.shape_cast %228 : vector<64x1xf32> to vector<8x8x1xf32>
    %cst_95 = arith.constant dense<0xFF800000> : vector<8x1xf32>
    %230 = vector.multi_reduction <maximumf>, %229, %cst_95 [0] : vector<8x8x1xf32> to vector<8x1xf32>
    %cst_96 = arith.constant dense<0.000000e+00> : vector<64x1xf32>
    %231 = tpu.matmul %158, %230, %cst_96 {dimension_numbers = #tpu.dot_dimension_numbers<[1], [0], [0], [1], [0, 0, 1, 1], [], []>} : vector<64x8xf32>, vector<8x1xf32>, vector<64x1xf32> -> vector<64x1xf32>
    %232 = arith.subf %228, %231 : vector<64x1xf32>
    %233 = math.exp %232 : vector<64x1xf32>
    %234 = arith.mulf %233, %156 : vector<64x1xf32>
    %cst_97 = arith.constant dense<0.000000e+00> : vector<8x1xf32>
    %235 = tpu.matmul %159, %234, %cst_97 {dimension_numbers = #tpu.dot_dimension_numbers<[1], [0], [0], [1], [0, 0, 1, 1], [], []>} : vector<8x64xf32>, vector<64x1xf32>, vector<8x1xf32> -> vector<8x1xf32>
    %cst_98 = arith.constant 9.99999968E-21 : f32
    %236 = vector.broadcast %cst_98 : f32 to vector<8x1xf32>
    %237 = arith.maximumf %235, %236 : vector<8x1xf32>
    %238 = tpu.reciprocal %237 {approx = true} : vector<8x1xf32> -> vector<8x1xf32>
    %cst_99 = arith.constant dense<0.000000e+00> : vector<64x1xf32>
    %239 = tpu.matmul %158, %238, %cst_99 {dimension_numbers = #tpu.dot_dimension_numbers<[1], [0], [0], [1], [0, 0, 1, 1], [], []>} : vector<64x8xf32>, vector<8x1xf32>, vector<64x1xf32> -> vector<64x1xf32>
    %240 = arith.mulf %234, %239 : vector<64x1xf32>
    %cst_100 = arith.constant dense<0.000000e+00> : vector<64x32xf32>
    %241 = tpu.matmul %240, %208, %cst_100 {dimension_numbers = #tpu.dot_dimension_numbers<[1], [0], [0], [1], [0, 0, 1, 1], [], []>} : vector<64x1xf32>, vector<1x32xf32>, vector<64x32xf32> -> vector<64x32xf32>
    %242 = arith.mulf %241, %216 : vector<64x32xf32>
    %cst_101 = arith.constant dense<0.000000e+00> : vector<8x32xf32>
    %243 = tpu.matmul %159, %242, %cst_101 {dimension_numbers = #tpu.dot_dimension_numbers<[1], [0], [0], [1], [0, 0, 1, 1], [], []>} : vector<8x64xf32>, vector<64x32xf32>, vector<8x32xf32> -> vector<8x32xf32>
    %cst_102 = arith.constant dense<0.000000e+00> : vector<8x32xf32>
    %244 = tpu.matmul %243, %209, %cst_102 {dimension_numbers = #tpu.dot_dimension_numbers<[1], [0], [0], [1], [0, 0, 1, 1], [], []>} : vector<8x32xf32>, vector<32x32xf32>, vector<8x32xf32> -> vector<8x32xf32>
    %245 = vector.broadcast %210 : vector<1x32xf32> to vector<8x32xf32>
    %246 = arith.addf %244, %245 : vector<8x32xf32>
    %c0_103 = arith.constant 0 : index
    %c0_104 = arith.constant 0 : index
    %247 = vector.load %arg6[%c0_103, %c0_104] : memref<2x8xf32, #tpu.memory_space<vmem>>, vector<2x8xf32>
    %cst_105 = arith.constant dense<0.000000e+00> : vector<2x32xf32>
    %248 = tpu.matmul %247, %246, %cst_105 {dimension_numbers = #tpu.dot_dimension_numbers<[1], [0], [0], [1], [0, 0, 1, 1], [], []>} : vector<2x8xf32>, vector<8x32xf32>, vector<2x32xf32> -> vector<2x32xf32>
    %c0_106 = arith.constant 0 : index
    %c0_107 = arith.constant 0 : index
    %249 = vector.load %arg29[%c0_106, %c0_107] : memref<2x35xf32, #tpu.memory_space<vmem>>, vector<2x32xf32>
    tpu.vector_store %arg29[%c0_106, %c0_107], %248 {strides = array<i32>} : memref<2x35xf32, #tpu.memory_space<vmem>>, vector<2x32xf32>,
    %c0_108 = arith.constant 0 : index
    %c0_109 = arith.constant 0 : index
    %250 = vector.load %arg2[%c0_108, %c0_109] : memref<2x2xf32, #tpu.memory_space<vmem>>, vector<2x2xf32>
    %c0_110 = arith.constant 0 : index
    %c32_111 = arith.constant 32 : index
    %251 = vector.load %arg29[%c0_110, %c32_111] : memref<2x35xf32, #tpu.memory_space<vmem>>, vector<2x2xf32>
    tpu.vector_store %arg29[%c0_110, %c32_111], %250 {strides = array<i32>} : memref<2x35xf32, #tpu.memory_space<vmem>>, vector<2x2xf32>,
    %c0_112 = arith.constant 0 : index
    %c0_113 = arith.constant 0 : index
    %252 = vector.load %arg3[%c0_112, %c0_113] : memref<2x1xf32, #tpu.memory_space<vmem>>, vector<2x1xf32>
    %c0_114 = arith.constant 0 : index
    %c34 = arith.constant 34 : index
    %253 = vector.load %arg29[%c0_114, %c34] : memref<2x35xf32, #tpu.memory_space<vmem>>, vector<2x1xf32>
    tpu.vector_store %arg29[%c0_114, %c34], %252 {strides = array<i32>} : memref<2x35xf32, #tpu.memory_space<vmem>>, vector<2x1xf32>,
    %c0_115 = arith.constant 0 : index
    %c0_116 = arith.constant 0 : index
    %254 = vector.load %arg25[%c0_115, %c0_116] : memref<32x192xf32, #tpu.memory_space<vmem>>, vector<32x192xf32>
    %cst_117 = arith.constant dense<0.000000e+00> : vector<2x192xf32>
    %255 = tpu.matmul %248, %254, %cst_117 {dimension_numbers = #tpu.dot_dimension_numbers<[1], [0], [0], [1], [0, 0, 1, 1], [], []>} : vector<2x32xf32>, vector<32x192xf32>, vector<2x192xf32> -> vector<2x192xf32>
    %c0_118 = arith.constant 0 : index
    %c0_119 = arith.constant 0 : index
    %256 = vector.load %arg26[%c0_118, %c0_119] : memref<1x192xf32, #tpu.memory_space<vmem>>, vector<1x192xf32>
    %257 = vector.broadcast %256 : vector<1x192xf32> to vector<2x192xf32>
    %258 = arith.addf %255, %257 : vector<2x192xf32>
    %c0_120 = arith.constant 0 : index
    %c0_121 = arith.constant 0 : index
    %259 = vector.load %arg1[%c0_120, %c0_121] : memref<2x24xf32, #tpu.memory_space<vmem>>, vector<2x24xf32>
    %c0_122 = arith.constant 0 : index
    %c0_123 = arith.constant 0 : index
    %260 = vector.load %arg27[%c0_122, %c0_123] : memref<24x192xf32, #tpu.memory_space<vmem>>, vector<24x192xf32>
    %cst_124 = arith.constant dense<0.000000e+00> : vector<2x192xf32>
    %261 = tpu.matmul %259, %260, %cst_124 {dimension_numbers = #tpu.dot_dimension_numbers<[1], [0], [0], [1], [0, 0, 1, 1], [], []>} : vector<2x24xf32>, vector<24x192xf32>, vector<2x192xf32> -> vector<2x192xf32>
    %c0_125 = arith.constant 0 : index
    %c0_126 = arith.constant 0 : index
    %262 = vector.load %arg28[%c0_125, %c0_126] : memref<1x192xf32, #tpu.memory_space<vmem>>, vector<1x192xf32>
    %263 = vector.broadcast %262 : vector<1x192xf32> to vector<2x192xf32>
    %264 = arith.addf %261, %263 : vector<2x192xf32>
    %265 = tpu.iota {dimensions = array<i32: 0>} : vector<2x2xi32>
    %266 = tpu.iota {dimensions = array<i32: 1>} : vector<2x2xi32>
    %267 = arith.cmpi eq, %265, %266 : vector<2x2xi32>
    %cst_127 = arith.constant 0.000000e+00 : f32
    %268 = vector.broadcast %cst_127 : f32 to vector<2x1xf32>
    %269 = vector.extract_strided_slice %264 {offsets = [0, 0], sizes = [2, 16], strides = [1, 1]} : vector<2x192xf32> to vector<2x16xf32>
    %270 = arith.mulf %269, %269 : vector<2x16xf32>
    %cst_128 = arith.constant dense<0.000000e+00> : vector<2xf32>
    %271 = vector.multi_reduction <add>, %270, %cst_128 [1] : vector<2x16xf32> to vector<2xf32>
    %272 = vector.shape_cast %271 : vector<2xf32> to vector<2x1xf32>
    %cst_129 = arith.constant 1.000000e-24 : f32
    %273 = vector.broadcast %cst_129 : f32 to vector<2x1xf32>
    %274 = arith.maximumf %272, %273 : vector<2x1xf32>
    %275 = math.rsqrt %274 : vector<2x1xf32>
    %276 = vector.broadcast %275 : vector<2x1xf32> to vector<2x16xf32>
    %277 = arith.mulf %269, %276 : vector<2x16xf32>
    %278 = vector.extract_strided_slice %258 {offsets = [0, 0], sizes = [2, 16], strides = [1, 1]} : vector<2x192xf32> to vector<2x16xf32>
    %279 = arith.mulf %278, %278 : vector<2x16xf32>
    %cst_130 = arith.constant dense<0.000000e+00> : vector<2xf32>
    %280 = vector.multi_reduction <add>, %279, %cst_130 [1] : vector<2x16xf32> to vector<2xf32>
    %281 = vector.shape_cast %280 : vector<2xf32> to vector<2x1xf32>
    %cst_131 = arith.constant 1.000000e-24 : f32
    %282 = vector.broadcast %cst_131 : f32 to vector<2x1xf32>
    %283 = arith.maximumf %281, %282 : vector<2x1xf32>
    %284 = math.rsqrt %283 : vector<2x1xf32>
    %285 = vector.broadcast %284 : vector<2x1xf32> to vector<2x16xf32>
    %286 = arith.mulf %278, %285 : vector<2x16xf32>
    %cst_132 = arith.constant dense<0.000000e+00> : vector<2x2xf32>
    %287 = tpu.matmul %277, %286, %cst_132 {dimension_numbers = #tpu.dot_dimension_numbers<[1], [1], [0], [0], [0, 0, 1, 0], [], []>} : vector<2x16xf32>, vector<2x16xf32>, vector<2x2xf32> -> vector<2x2xf32>
    %cst_133 = arith.constant dense<0xFF800000> : vector<2xf32>
    %288 = vector.multi_reduction <maximumf>, %287, %cst_133 [1] : vector<2x2xf32> to vector<2xf32>
    %289 = vector.shape_cast %288 : vector<2xf32> to vector<2x1xf32>
    %290 = vector.broadcast %289 : vector<2x1xf32> to vector<2x2xf32>
    %291 = arith.subf %287, %290 : vector<2x2xf32>
    %292 = math.exp %291 : vector<2x2xf32>
    %cst_134 = arith.constant dense<0.000000e+00> : vector<2xf32>
    %293 = vector.multi_reduction <add>, %292, %cst_134 [1] : vector<2x2xf32> to vector<2xf32>
    %294 = vector.shape_cast %293 : vector<2xf32> to vector<2x1xf32>
    %295 = math.log %294 : vector<2x1xf32>
    %296 = arith.addf %289, %295 : vector<2x1xf32>
    %297 = vector.broadcast %296 : vector<2x1xf32> to vector<2x2xf32>
    %298 = arith.subf %287, %297 : vector<2x2xf32>
    %cst_135 = arith.constant 0.000000e+00 : f32
    %299 = vector.broadcast %cst_135 : f32 to vector<2x2xf32>
    %300 = arith.select %267, %298, %299 : vector<2x2xi1>, vector<2x2xf32>
    %cst_136 = arith.constant dense<0.000000e+00> : vector<2xf32>
    %301 = vector.multi_reduction <add>, %300, %cst_136 [1] : vector<2x2xf32> to vector<2xf32>
    %302 = vector.shape_cast %301 : vector<2xf32> to vector<2x1xf32>
    %303 = arith.addf %268, %302 : vector<2x1xf32>
    %304 = vector.extract_strided_slice %264 {offsets = [0, 16], sizes = [2, 16], strides = [1, 1]} : vector<2x192xf32> to vector<2x16xf32>
    %305 = arith.mulf %304, %304 : vector<2x16xf32>
    %cst_137 = arith.constant dense<0.000000e+00> : vector<2xf32>
    %306 = vector.multi_reduction <add>, %305, %cst_137 [1] : vector<2x16xf32> to vector<2xf32>
    %307 = vector.shape_cast %306 : vector<2xf32> to vector<2x1xf32>
    %cst_138 = arith.constant 1.000000e-24 : f32
    %308 = vector.broadcast %cst_138 : f32 to vector<2x1xf32>
    %309 = arith.maximumf %307, %308 : vector<2x1xf32>
    %310 = math.rsqrt %309 : vector<2x1xf32>
    %311 = vector.broadcast %310 : vector<2x1xf32> to vector<2x16xf32>
    %312 = arith.mulf %304, %311 : vector<2x16xf32>
    %313 = vector.extract_strided_slice %258 {offsets = [0, 16], sizes = [2, 16], strides = [1, 1]} : vector<2x192xf32> to vector<2x16xf32>
    %314 = arith.mulf %313, %313 : vector<2x16xf32>
    %cst_139 = arith.constant dense<0.000000e+00> : vector<2xf32>
    %315 = vector.multi_reduction <add>, %314, %cst_139 [1] : vector<2x16xf32> to vector<2xf32>
    %316 = vector.shape_cast %315 : vector<2xf32> to vector<2x1xf32>
    %cst_140 = arith.constant 1.000000e-24 : f32
    %317 = vector.broadcast %cst_140 : f32 to vector<2x1xf32>
    %318 = arith.maximumf %316, %317 : vector<2x1xf32>
    %319 = math.rsqrt %318 : vector<2x1xf32>
    %320 = vector.broadcast %319 : vector<2x1xf32> to vector<2x16xf32>
    %321 = arith.mulf %313, %320 : vector<2x16xf32>
    %cst_141 = arith.constant dense<0.000000e+00> : vector<2x2xf32>
    %322 = tpu.matmul %312, %321, %cst_141 {dimension_numbers = #tpu.dot_dimension_numbers<[1], [1], [0], [0], [0, 0, 1, 0], [], []>} : vector<2x16xf32>, vector<2x16xf32>, vector<2x2xf32> -> vector<2x2xf32>
    %cst_142 = arith.constant dense<0xFF800000> : vector<2xf32>
    %323 = vector.multi_reduction <maximumf>, %322, %cst_142 [1] : vector<2x2xf32> to vector<2xf32>
    %324 = vector.shape_cast %323 : vector<2xf32> to vector<2x1xf32>
    %325 = vector.broadcast %324 : vector<2x1xf32> to vector<2x2xf32>
    %326 = arith.subf %322, %325 : vector<2x2xf32>
    %327 = math.exp %326 : vector<2x2xf32>
    %cst_143 = arith.constant dense<0.000000e+00> : vector<2xf32>
    %328 = vector.multi_reduction <add>, %327, %cst_143 [1] : vector<2x2xf32> to vector<2xf32>
    %329 = vector.shape_cast %328 : vector<2xf32> to vector<2x1xf32>
    %330 = math.log %329 : vector<2x1xf32>
    %331 = arith.addf %324, %330 : vector<2x1xf32>
    %332 = vector.broadcast %331 : vector<2x1xf32> to vector<2x2xf32>
    %333 = arith.subf %322, %332 : vector<2x2xf32>
    %cst_144 = arith.constant 0.000000e+00 : f32
    %334 = vector.broadcast %cst_144 : f32 to vector<2x2xf32>
    %335 = arith.select %267, %333, %334 : vector<2x2xi1>, vector<2x2xf32>
    %cst_145 = arith.constant dense<0.000000e+00> : vector<2xf32>
    %336 = vector.multi_reduction <add>, %335, %cst_145 [1] : vector<2x2xf32> to vector<2xf32>
    %337 = vector.shape_cast %336 : vector<2xf32> to vector<2x1xf32>
    %338 = arith.addf %303, %337 : vector<2x1xf32>
    %339 = vector.extract_strided_slice %264 {offsets = [0, 32], sizes = [2, 16], strides = [1, 1]} : vector<2x192xf32> to vector<2x16xf32>
    %340 = arith.mulf %339, %339 : vector<2x16xf32>
    %cst_146 = arith.constant dense<0.000000e+00> : vector<2xf32>
    %341 = vector.multi_reduction <add>, %340, %cst_146 [1] : vector<2x16xf32> to vector<2xf32>
    %342 = vector.shape_cast %341 : vector<2xf32> to vector<2x1xf32>
    %cst_147 = arith.constant 1.000000e-24 : f32
    %343 = vector.broadcast %cst_147 : f32 to vector<2x1xf32>
    %344 = arith.maximumf %342, %343 : vector<2x1xf32>
    %345 = math.rsqrt %344 : vector<2x1xf32>
    %346 = vector.broadcast %345 : vector<2x1xf32> to vector<2x16xf32>
    %347 = arith.mulf %339, %346 : vector<2x16xf32>
    %348 = vector.extract_strided_slice %258 {offsets = [0, 32], sizes = [2, 16], strides = [1, 1]} : vector<2x192xf32> to vector<2x16xf32>
    %349 = arith.mulf %348, %348 : vector<2x16xf32>
    %cst_148 = arith.constant dense<0.000000e+00> : vector<2xf32>
    %350 = vector.multi_reduction <add>, %349, %cst_148 [1] : vector<2x16xf32> to vector<2xf32>
    %351 = vector.shape_cast %350 : vector<2xf32> to vector<2x1xf32>
    %cst_149 = arith.constant 1.000000e-24 : f32
    %352 = vector.broadcast %cst_149 : f32 to vector<2x1xf32>
    %353 = arith.maximumf %351, %352 : vector<2x1xf32>
    %354 = math.rsqrt %353 : vector<2x1xf32>
    %355 = vector.broadcast %354 : vector<2x1xf32> to vector<2x16xf32>
    %356 = arith.mulf %348, %355 : vector<2x16xf32>
    %cst_150 = arith.constant dense<0.000000e+00> : vector<2x2xf32>
    %357 = tpu.matmul %347, %356, %cst_150 {dimension_numbers = #tpu.dot_dimension_numbers<[1], [1], [0], [0], [0, 0, 1, 0], [], []>} : vector<2x16xf32>, vector<2x16xf32>, vector<2x2xf32> -> vector<2x2xf32>
    %cst_151 = arith.constant dense<0xFF800000> : vector<2xf32>
    %358 = vector.multi_reduction <maximumf>, %357, %cst_151 [1] : vector<2x2xf32> to vector<2xf32>
    %359 = vector.shape_cast %358 : vector<2xf32> to vector<2x1xf32>
    %360 = vector.broadcast %359 : vector<2x1xf32> to vector<2x2xf32>
    %361 = arith.subf %357, %360 : vector<2x2xf32>
    %362 = math.exp %361 : vector<2x2xf32>
    %cst_152 = arith.constant dense<0.000000e+00> : vector<2xf32>
    %363 = vector.multi_reduction <add>, %362, %cst_152 [1] : vector<2x2xf32> to vector<2xf32>
    %364 = vector.shape_cast %363 : vector<2xf32> to vector<2x1xf32>
    %365 = math.log %364 : vector<2x1xf32>
    %366 = arith.addf %359, %365 : vector<2x1xf32>
    %367 = vector.broadcast %366 : vector<2x1xf32> to vector<2x2xf32>
    %368 = arith.subf %357, %367 : vector<2x2xf32>
    %cst_153 = arith.constant 0.000000e+00 : f32
    %369 = vector.broadcast %cst_153 : f32 to vector<2x2xf32>
    %370 = arith.select %267, %368, %369 : vector<2x2xi1>, vector<2x2xf32>
    %cst_154 = arith.constant dense<0.000000e+00> : vector<2xf32>
    %371 = vector.multi_reduction <add>, %370, %cst_154 [1] : vector<2x2xf32> to vector<2xf32>
    %372 = vector.shape_cast %371 : vector<2xf32> to vector<2x1xf32>
    %373 = arith.addf %338, %372 : vector<2x1xf32>
    %374 = vector.extract_strided_slice %264 {offsets = [0, 48], sizes = [2, 16], strides = [1, 1]} : vector<2x192xf32> to vector<2x16xf32>
    %375 = arith.mulf %374, %374 : vector<2x16xf32>
    %cst_155 = arith.constant dense<0.000000e+00> : vector<2xf32>
    %376 = vector.multi_reduction <add>, %375, %cst_155 [1] : vector<2x16xf32> to vector<2xf32>
    %377 = vector.shape_cast %376 : vector<2xf32> to vector<2x1xf32>
    %cst_156 = arith.constant 1.000000e-24 : f32
    %378 = vector.broadcast %cst_156 : f32 to vector<2x1xf32>
    %379 = arith.maximumf %377, %378 : vector<2x1xf32>
    %380 = math.rsqrt %379 : vector<2x1xf32>
    %381 = vector.broadcast %380 : vector<2x1xf32> to vector<2x16xf32>
    %382 = arith.mulf %374, %381 : vector<2x16xf32>
    %383 = vector.extract_strided_slice %258 {offsets = [0, 48], sizes = [2, 16], strides = [1, 1]} : vector<2x192xf32> to vector<2x16xf32>
    %384 = arith.mulf %383, %383 : vector<2x16xf32>
    %cst_157 = arith.constant dense<0.000000e+00> : vector<2xf32>
    %385 = vector.multi_reduction <add>, %384, %cst_157 [1] : vector<2x16xf32> to vector<2xf32>
    %386 = vector.shape_cast %385 : vector<2xf32> to vector<2x1xf32>
    %cst_158 = arith.constant 1.000000e-24 : f32
    %387 = vector.broadcast %cst_158 : f32 to vector<2x1xf32>
    %388 = arith.maximumf %386, %387 : vector<2x1xf32>
    %389 = math.rsqrt %388 : vector<2x1xf32>
    %390 = vector.broadcast %389 : vector<2x1xf32> to vector<2x16xf32>
    %391 = arith.mulf %383, %390 : vector<2x16xf32>
    %cst_159 = arith.constant dense<0.000000e+00> : vector<2x2xf32>
    %392 = tpu.matmul %382, %391, %cst_159 {dimension_numbers = #tpu.dot_dimension_numbers<[1], [1], [0], [0], [0, 0, 1, 0], [], []>} : vector<2x16xf32>, vector<2x16xf32>, vector<2x2xf32> -> vector<2x2xf32>
    %cst_160 = arith.constant dense<0xFF800000> : vector<2xf32>
    %393 = vector.multi_reduction <maximumf>, %392, %cst_160 [1] : vector<2x2xf32> to vector<2xf32>
    %394 = vector.shape_cast %393 : vector<2xf32> to vector<2x1xf32>
    %395 = vector.broadcast %394 : vector<2x1xf32> to vector<2x2xf32>
    %396 = arith.subf %392, %395 : vector<2x2xf32>
    %397 = math.exp %396 : vector<2x2xf32>
    %cst_161 = arith.constant dense<0.000000e+00> : vector<2xf32>
    %398 = vector.multi_reduction <add>, %397, %cst_161 [1] : vector<2x2xf32> to vector<2xf32>
    %399 = vector.shape_cast %398 : vector<2xf32> to vector<2x1xf32>
    %400 = math.log %399 : vector<2x1xf32>
    %401 = arith.addf %394, %400 : vector<2x1xf32>
    %402 = vector.broadcast %401 : vector<2x1xf32> to vector<2x2xf32>
    %403 = arith.subf %392, %402 : vector<2x2xf32>
    %cst_162 = arith.constant 0.000000e+00 : f32
    %404 = vector.broadcast %cst_162 : f32 to vector<2x2xf32>
    %405 = arith.select %267, %403, %404 : vector<2x2xi1>, vector<2x2xf32>
    %cst_163 = arith.constant dense<0.000000e+00> : vector<2xf32>
    %406 = vector.multi_reduction <add>, %405, %cst_163 [1] : vector<2x2xf32> to vector<2xf32>
    %407 = vector.shape_cast %406 : vector<2xf32> to vector<2x1xf32>
    %408 = arith.addf %373, %407 : vector<2x1xf32>
    %409 = vector.extract_strided_slice %264 {offsets = [0, 64], sizes = [2, 16], strides = [1, 1]} : vector<2x192xf32> to vector<2x16xf32>
    %410 = arith.mulf %409, %409 : vector<2x16xf32>
    %cst_164 = arith.constant dense<0.000000e+00> : vector<2xf32>
    %411 = vector.multi_reduction <add>, %410, %cst_164 [1] : vector<2x16xf32> to vector<2xf32>
    %412 = vector.shape_cast %411 : vector<2xf32> to vector<2x1xf32>
    %cst_165 = arith.constant 1.000000e-24 : f32
    %413 = vector.broadcast %cst_165 : f32 to vector<2x1xf32>
    %414 = arith.maximumf %412, %413 : vector<2x1xf32>
    %415 = math.rsqrt %414 : vector<2x1xf32>
    %416 = vector.broadcast %415 : vector<2x1xf32> to vector<2x16xf32>
    %417 = arith.mulf %409, %416 : vector<2x16xf32>
    %418 = vector.extract_strided_slice %258 {offsets = [0, 64], sizes = [2, 16], strides = [1, 1]} : vector<2x192xf32> to vector<2x16xf32>
    %419 = arith.mulf %418, %418 : vector<2x16xf32>
    %cst_166 = arith.constant dense<0.000000e+00> : vector<2xf32>
    %420 = vector.multi_reduction <add>, %419, %cst_166 [1] : vector<2x16xf32> to vector<2xf32>
    %421 = vector.shape_cast %420 : vector<2xf32> to vector<2x1xf32>
    %cst_167 = arith.constant 1.000000e-24 : f32
    %422 = vector.broadcast %cst_167 : f32 to vector<2x1xf32>
    %423 = arith.maximumf %421, %422 : vector<2x1xf32>
    %424 = math.rsqrt %423 : vector<2x1xf32>
    %425 = vector.broadcast %424 : vector<2x1xf32> to vector<2x16xf32>
    %426 = arith.mulf %418, %425 : vector<2x16xf32>
    %cst_168 = arith.constant dense<0.000000e+00> : vector<2x2xf32>
    %427 = tpu.matmul %417, %426, %cst_168 {dimension_numbers = #tpu.dot_dimension_numbers<[1], [1], [0], [0], [0, 0, 1, 0], [], []>} : vector<2x16xf32>, vector<2x16xf32>, vector<2x2xf32> -> vector<2x2xf32>
    %cst_169 = arith.constant dense<0xFF800000> : vector<2xf32>
    %428 = vector.multi_reduction <maximumf>, %427, %cst_169 [1] : vector<2x2xf32> to vector<2xf32>
    %429 = vector.shape_cast %428 : vector<2xf32> to vector<2x1xf32>
    %430 = vector.broadcast %429 : vector<2x1xf32> to vector<2x2xf32>
    %431 = arith.subf %427, %430 : vector<2x2xf32>
    %432 = math.exp %431 : vector<2x2xf32>
    %cst_170 = arith.constant dense<0.000000e+00> : vector<2xf32>
    %433 = vector.multi_reduction <add>, %432, %cst_170 [1] : vector<2x2xf32> to vector<2xf32>
    %434 = vector.shape_cast %433 : vector<2xf32> to vector<2x1xf32>
    %435 = math.log %434 : vector<2x1xf32>
    %436 = arith.addf %429, %435 : vector<2x1xf32>
    %437 = vector.broadcast %436 : vector<2x1xf32> to vector<2x2xf32>
    %438 = arith.subf %427, %437 : vector<2x2xf32>
    %cst_171 = arith.constant 0.000000e+00 : f32
    %439 = vector.broadcast %cst_171 : f32 to vector<2x2xf32>
    %440 = arith.select %267, %438, %439 : vector<2x2xi1>, vector<2x2xf32>
    %cst_172 = arith.constant dense<0.000000e+00> : vector<2xf32>
    %441 = vector.multi_reduction <add>, %440, %cst_172 [1] : vector<2x2xf32> to vector<2xf32>
    %442 = vector.shape_cast %441 : vector<2xf32> to vector<2x1xf32>
    %443 = arith.addf %408, %442 : vector<2x1xf32>
    %444 = vector.extract_strided_slice %264 {offsets = [0, 80], sizes = [2, 16], strides = [1, 1]} : vector<2x192xf32> to vector<2x16xf32>
    %445 = arith.mulf %444, %444 : vector<2x16xf32>
    %cst_173 = arith.constant dense<0.000000e+00> : vector<2xf32>
    %446 = vector.multi_reduction <add>, %445, %cst_173 [1] : vector<2x16xf32> to vector<2xf32>
    %447 = vector.shape_cast %446 : vector<2xf32> to vector<2x1xf32>
    %cst_174 = arith.constant 1.000000e-24 : f32
    %448 = vector.broadcast %cst_174 : f32 to vector<2x1xf32>
    %449 = arith.maximumf %447, %448 : vector<2x1xf32>
    %450 = math.rsqrt %449 : vector<2x1xf32>
    %451 = vector.broadcast %450 : vector<2x1xf32> to vector<2x16xf32>
    %452 = arith.mulf %444, %451 : vector<2x16xf32>
    %453 = vector.extract_strided_slice %258 {offsets = [0, 80], sizes = [2, 16], strides = [1, 1]} : vector<2x192xf32> to vector<2x16xf32>
    %454 = arith.mulf %453, %453 : vector<2x16xf32>
    %cst_175 = arith.constant dense<0.000000e+00> : vector<2xf32>
    %455 = vector.multi_reduction <add>, %454, %cst_175 [1] : vector<2x16xf32> to vector<2xf32>
    %456 = vector.shape_cast %455 : vector<2xf32> to vector<2x1xf32>
    %cst_176 = arith.constant 1.000000e-24 : f32
    %457 = vector.broadcast %cst_176 : f32 to vector<2x1xf32>
    %458 = arith.maximumf %456, %457 : vector<2x1xf32>
    %459 = math.rsqrt %458 : vector<2x1xf32>
    %460 = vector.broadcast %459 : vector<2x1xf32> to vector<2x16xf32>
    %461 = arith.mulf %453, %460 : vector<2x16xf32>
    %cst_177 = arith.constant dense<0.000000e+00> : vector<2x2xf32>
    %462 = tpu.matmul %452, %461, %cst_177 {dimension_numbers = #tpu.dot_dimension_numbers<[1], [1], [0], [0], [0, 0, 1, 0], [], []>} : vector<2x16xf32>, vector<2x16xf32>, vector<2x2xf32> -> vector<2x2xf32>
    %cst_178 = arith.constant dense<0xFF800000> : vector<2xf32>
    %463 = vector.multi_reduction <maximumf>, %462, %cst_178 [1] : vector<2x2xf32> to vector<2xf32>
    %464 = vector.shape_cast %463 : vector<2xf32> to vector<2x1xf32>
    %465 = vector.broadcast %464 : vector<2x1xf32> to vector<2x2xf32>
    %466 = arith.subf %462, %465 : vector<2x2xf32>
    %467 = math.exp %466 : vector<2x2xf32>
    %cst_179 = arith.constant dense<0.000000e+00> : vector<2xf32>
    %468 = vector.multi_reduction <add>, %467, %cst_179 [1] : vector<2x2xf32> to vector<2xf32>
    %469 = vector.shape_cast %468 : vector<2xf32> to vector<2x1xf32>
    %470 = math.log %469 : vector<2x1xf32>
    %471 = arith.addf %464, %470 : vector<2x1xf32>
    %472 = vector.broadcast %471 : vector<2x1xf32> to vector<2x2xf32>
    %473 = arith.subf %462, %472 : vector<2x2xf32>
    %cst_180 = arith.constant 0.000000e+00 : f32
    %474 = vector.broadcast %cst_180 : f32 to vector<2x2xf32>
    %475 = arith.select %267, %473, %474 : vector<2x2xi1>, vector<2x2xf32>
    %cst_181 = arith.constant dense<0.000000e+00> : vector<2xf32>
    %476 = vector.multi_reduction <add>, %475, %cst_181 [1] : vector<2x2xf32> to vector<2xf32>
    %477 = vector.shape_cast %476 : vector<2xf32> to vector<2x1xf32>
    %478 = arith.addf %443, %477 : vector<2x1xf32>
    %479 = vector.extract_strided_slice %264 {offsets = [0, 96], sizes = [2, 16], strides = [1, 1]} : vector<2x192xf32> to vector<2x16xf32>
    %480 = arith.mulf %479, %479 : vector<2x16xf32>
    %cst_182 = arith.constant dense<0.000000e+00> : vector<2xf32>
    %481 = vector.multi_reduction <add>, %480, %cst_182 [1] : vector<2x16xf32> to vector<2xf32>
    %482 = vector.shape_cast %481 : vector<2xf32> to vector<2x1xf32>
    %cst_183 = arith.constant 1.000000e-24 : f32
    %483 = vector.broadcast %cst_183 : f32 to vector<2x1xf32>
    %484 = arith.maximumf %482, %483 : vector<2x1xf32>
    %485 = math.rsqrt %484 : vector<2x1xf32>
    %486 = vector.broadcast %485 : vector<2x1xf32> to vector<2x16xf32>
    %487 = arith.mulf %479, %486 : vector<2x16xf32>
    %488 = vector.extract_strided_slice %258 {offsets = [0, 96], sizes = [2, 16], strides = [1, 1]} : vector<2x192xf32> to vector<2x16xf32>
    %489 = arith.mulf %488, %488 : vector<2x16xf32>
    %cst_184 = arith.constant dense<0.000000e+00> : vector<2xf32>
    %490 = vector.multi_reduction <add>, %489, %cst_184 [1] : vector<2x16xf32> to vector<2xf32>
    %491 = vector.shape_cast %490 : vector<2xf32> to vector<2x1xf32>
    %cst_185 = arith.constant 1.000000e-24 : f32
    %492 = vector.broadcast %cst_185 : f32 to vector<2x1xf32>
    %493 = arith.maximumf %491, %492 : vector<2x1xf32>
    %494 = math.rsqrt %493 : vector<2x1xf32>
    %495 = vector.broadcast %494 : vector<2x1xf32> to vector<2x16xf32>
    %496 = arith.mulf %488, %495 : vector<2x16xf32>
    %cst_186 = arith.constant dense<0.000000e+00> : vector<2x2xf32>
    %497 = tpu.matmul %487, %496, %cst_186 {dimension_numbers = #tpu.dot_dimension_numbers<[1], [1], [0], [0], [0, 0, 1, 0], [], []>} : vector<2x16xf32>, vector<2x16xf32>, vector<2x2xf32> -> vector<2x2xf32>
    %cst_187 = arith.constant dense<0xFF800000> : vector<2xf32>
    %498 = vector.multi_reduction <maximumf>, %497, %cst_187 [1] : vector<2x2xf32> to vector<2xf32>
    %499 = vector.shape_cast %498 : vector<2xf32> to vector<2x1xf32>
    %500 = vector.broadcast %499 : vector<2x1xf32> to vector<2x2xf32>
    %501 = arith.subf %497, %500 : vector<2x2xf32>
    %502 = math.exp %501 : vector<2x2xf32>
    %cst_188 = arith.constant dense<0.000000e+00> : vector<2xf32>
    %503 = vector.multi_reduction <add>, %502, %cst_188 [1] : vector<2x2xf32> to vector<2xf32>
    %504 = vector.shape_cast %503 : vector<2xf32> to vector<2x1xf32>
    %505 = math.log %504 : vector<2x1xf32>
    %506 = arith.addf %499, %505 : vector<2x1xf32>
    %507 = vector.broadcast %506 : vector<2x1xf32> to vector<2x2xf32>
    %508 = arith.subf %497, %507 : vector<2x2xf32>
    %cst_189 = arith.constant 0.000000e+00 : f32
    %509 = vector.broadcast %cst_189 : f32 to vector<2x2xf32>
    %510 = arith.select %267, %508, %509 : vector<2x2xi1>, vector<2x2xf32>
    %cst_190 = arith.constant dense<0.000000e+00> : vector<2xf32>
    %511 = vector.multi_reduction <add>, %510, %cst_190 [1] : vector<2x2xf32> to vector<2xf32>
    %512 = vector.shape_cast %511 : vector<2xf32> to vector<2x1xf32>
    %513 = arith.addf %478, %512 : vector<2x1xf32>
    %514 = vector.extract_strided_slice %264 {offsets = [0, 112], sizes = [2, 16], strides = [1, 1]} : vector<2x192xf32> to vector<2x16xf32>
    %515 = arith.mulf %514, %514 : vector<2x16xf32>
    %cst_191 = arith.constant dense<0.000000e+00> : vector<2xf32>
    %516 = vector.multi_reduction <add>, %515, %cst_191 [1] : vector<2x16xf32> to vector<2xf32>
    %517 = vector.shape_cast %516 : vector<2xf32> to vector<2x1xf32>
    %cst_192 = arith.constant 1.000000e-24 : f32
    %518 = vector.broadcast %cst_192 : f32 to vector<2x1xf32>
    %519 = arith.maximumf %517, %518 : vector<2x1xf32>
    %520 = math.rsqrt %519 : vector<2x1xf32>
    %521 = vector.broadcast %520 : vector<2x1xf32> to vector<2x16xf32>
    %522 = arith.mulf %514, %521 : vector<2x16xf32>
    %523 = vector.extract_strided_slice %258 {offsets = [0, 112], sizes = [2, 16], strides = [1, 1]} : vector<2x192xf32> to vector<2x16xf32>
    %524 = arith.mulf %523, %523 : vector<2x16xf32>
    %cst_193 = arith.constant dense<0.000000e+00> : vector<2xf32>
    %525 = vector.multi_reduction <add>, %524, %cst_193 [1] : vector<2x16xf32> to vector<2xf32>
    %526 = vector.shape_cast %525 : vector<2xf32> to vector<2x1xf32>
    %cst_194 = arith.constant 1.000000e-24 : f32
    %527 = vector.broadcast %cst_194 : f32 to vector<2x1xf32>
    %528 = arith.maximumf %526, %527 : vector<2x1xf32>
    %529 = math.rsqrt %528 : vector<2x1xf32>
    %530 = vector.broadcast %529 : vector<2x1xf32> to vector<2x16xf32>
    %531 = arith.mulf %523, %530 : vector<2x16xf32>
    %cst_195 = arith.constant dense<0.000000e+00> : vector<2x2xf32>
    %532 = tpu.matmul %522, %531, %cst_195 {dimension_numbers = #tpu.dot_dimension_numbers<[1], [1], [0], [0], [0, 0, 1, 0], [], []>} : vector<2x16xf32>, vector<2x16xf32>, vector<2x2xf32> -> vector<2x2xf32>
    %cst_196 = arith.constant dense<0xFF800000> : vector<2xf32>
    %533 = vector.multi_reduction <maximumf>, %532, %cst_196 [1] : vector<2x2xf32> to vector<2xf32>
    %534 = vector.shape_cast %533 : vector<2xf32> to vector<2x1xf32>
    %535 = vector.broadcast %534 : vector<2x1xf32> to vector<2x2xf32>
    %536 = arith.subf %532, %535 : vector<2x2xf32>
    %537 = math.exp %536 : vector<2x2xf32>
    %cst_197 = arith.constant dense<0.000000e+00> : vector<2xf32>
    %538 = vector.multi_reduction <add>, %537, %cst_197 [1] : vector<2x2xf32> to vector<2xf32>
    %539 = vector.shape_cast %538 : vector<2xf32> to vector<2x1xf32>
    %540 = math.log %539 : vector<2x1xf32>
    %541 = arith.addf %534, %540 : vector<2x1xf32>
    %542 = vector.broadcast %541 : vector<2x1xf32> to vector<2x2xf32>
    %543 = arith.subf %532, %542 : vector<2x2xf32>
    %cst_198 = arith.constant 0.000000e+00 : f32
    %544 = vector.broadcast %cst_198 : f32 to vector<2x2xf32>
    %545 = arith.select %267, %543, %544 : vector<2x2xi1>, vector<2x2xf32>
    %cst_199 = arith.constant dense<0.000000e+00> : vector<2xf32>
    %546 = vector.multi_reduction <add>, %545, %cst_199 [1] : vector<2x2xf32> to vector<2xf32>
    %547 = vector.shape_cast %546 : vector<2xf32> to vector<2x1xf32>
    %548 = arith.addf %513, %547 : vector<2x1xf32>
    %549 = vector.extract_strided_slice %264 {offsets = [0, 128], sizes = [2, 16], strides = [1, 1]} : vector<2x192xf32> to vector<2x16xf32>
    %550 = arith.mulf %549, %549 : vector<2x16xf32>
    %cst_200 = arith.constant dense<0.000000e+00> : vector<2xf32>
    %551 = vector.multi_reduction <add>, %550, %cst_200 [1] : vector<2x16xf32> to vector<2xf32>
    %552 = vector.shape_cast %551 : vector<2xf32> to vector<2x1xf32>
    %cst_201 = arith.constant 1.000000e-24 : f32
    %553 = vector.broadcast %cst_201 : f32 to vector<2x1xf32>
    %554 = arith.maximumf %552, %553 : vector<2x1xf32>
    %555 = math.rsqrt %554 : vector<2x1xf32>
    %556 = vector.broadcast %555 : vector<2x1xf32> to vector<2x16xf32>
    %557 = arith.mulf %549, %556 : vector<2x16xf32>
    %558 = vector.extract_strided_slice %258 {offsets = [0, 128], sizes = [2, 16], strides = [1, 1]} : vector<2x192xf32> to vector<2x16xf32>
    %559 = arith.mulf %558, %558 : vector<2x16xf32>
    %cst_202 = arith.constant dense<0.000000e+00> : vector<2xf32>
    %560 = vector.multi_reduction <add>, %559, %cst_202 [1] : vector<2x16xf32> to vector<2xf32>
    %561 = vector.shape_cast %560 : vector<2xf32> to vector<2x1xf32>
    %cst_203 = arith.constant 1.000000e-24 : f32
    %562 = vector.broadcast %cst_203 : f32 to vector<2x1xf32>
    %563 = arith.maximumf %561, %562 : vector<2x1xf32>
    %564 = math.rsqrt %563 : vector<2x1xf32>
    %565 = vector.broadcast %564 : vector<2x1xf32> to vector<2x16xf32>
    %566 = arith.mulf %558, %565 : vector<2x16xf32>
    %cst_204 = arith.constant dense<0.000000e+00> : vector<2x2xf32>
    %567 = tpu.matmul %557, %566, %cst_204 {dimension_numbers = #tpu.dot_dimension_numbers<[1], [1], [0], [0], [0, 0, 1, 0], [], []>} : vector<2x16xf32>, vector<2x16xf32>, vector<2x2xf32> -> vector<2x2xf32>
    %cst_205 = arith.constant dense<0xFF800000> : vector<2xf32>
    %568 = vector.multi_reduction <maximumf>, %567, %cst_205 [1] : vector<2x2xf32> to vector<2xf32>
    %569 = vector.shape_cast %568 : vector<2xf32> to vector<2x1xf32>
    %570 = vector.broadcast %569 : vector<2x1xf32> to vector<2x2xf32>
    %571 = arith.subf %567, %570 : vector<2x2xf32>
    %572 = math.exp %571 : vector<2x2xf32>
    %cst_206 = arith.constant dense<0.000000e+00> : vector<2xf32>
    %573 = vector.multi_reduction <add>, %572, %cst_206 [1] : vector<2x2xf32> to vector<2xf32>
    %574 = vector.shape_cast %573 : vector<2xf32> to vector<2x1xf32>
    %575 = math.log %574 : vector<2x1xf32>
    %576 = arith.addf %569, %575 : vector<2x1xf32>
    %577 = vector.broadcast %576 : vector<2x1xf32> to vector<2x2xf32>
    %578 = arith.subf %567, %577 : vector<2x2xf32>
    %cst_207 = arith.constant 0.000000e+00 : f32
    %579 = vector.broadcast %cst_207 : f32 to vector<2x2xf32>
    %580 = arith.select %267, %578, %579 : vector<2x2xi1>, vector<2x2xf32>
    %cst_208 = arith.constant dense<0.000000e+00> : vector<2xf32>
    %581 = vector.multi_reduction <add>, %580, %cst_208 [1] : vector<2x2xf32> to vector<2xf32>
    %582 = vector.shape_cast %581 : vector<2xf32> to vector<2x1xf32>
    %583 = arith.addf %548, %582 : vector<2x1xf32>
    %584 = vector.extract_strided_slice %264 {offsets = [0, 144], sizes = [2, 16], strides = [1, 1]} : vector<2x192xf32> to vector<2x16xf32>
    %585 = arith.mulf %584, %584 : vector<2x16xf32>
    %cst_209 = arith.constant dense<0.000000e+00> : vector<2xf32>
    %586 = vector.multi_reduction <add>, %585, %cst_209 [1] : vector<2x16xf32> to vector<2xf32>
    %587 = vector.shape_cast %586 : vector<2xf32> to vector<2x1xf32>
    %cst_210 = arith.constant 1.000000e-24 : f32
    %588 = vector.broadcast %cst_210 : f32 to vector<2x1xf32>
    %589 = arith.maximumf %587, %588 : vector<2x1xf32>
    %590 = math.rsqrt %589 : vector<2x1xf32>
    %591 = vector.broadcast %590 : vector<2x1xf32> to vector<2x16xf32>
    %592 = arith.mulf %584, %591 : vector<2x16xf32>
    %593 = vector.extract_strided_slice %258 {offsets = [0, 144], sizes = [2, 16], strides = [1, 1]} : vector<2x192xf32> to vector<2x16xf32>
    %594 = arith.mulf %593, %593 : vector<2x16xf32>
    %cst_211 = arith.constant dense<0.000000e+00> : vector<2xf32>
    %595 = vector.multi_reduction <add>, %594, %cst_211 [1] : vector<2x16xf32> to vector<2xf32>
    %596 = vector.shape_cast %595 : vector<2xf32> to vector<2x1xf32>
    %cst_212 = arith.constant 1.000000e-24 : f32
    %597 = vector.broadcast %cst_212 : f32 to vector<2x1xf32>
    %598 = arith.maximumf %596, %597 : vector<2x1xf32>
    %599 = math.rsqrt %598 : vector<2x1xf32>
    %600 = vector.broadcast %599 : vector<2x1xf32> to vector<2x16xf32>
    %601 = arith.mulf %593, %600 : vector<2x16xf32>
    %cst_213 = arith.constant dense<0.000000e+00> : vector<2x2xf32>
    %602 = tpu.matmul %592, %601, %cst_213 {dimension_numbers = #tpu.dot_dimension_numbers<[1], [1], [0], [0], [0, 0, 1, 0], [], []>} : vector<2x16xf32>, vector<2x16xf32>, vector<2x2xf32> -> vector<2x2xf32>
    %cst_214 = arith.constant dense<0xFF800000> : vector<2xf32>
    %603 = vector.multi_reduction <maximumf>, %602, %cst_214 [1] : vector<2x2xf32> to vector<2xf32>
    %604 = vector.shape_cast %603 : vector<2xf32> to vector<2x1xf32>
    %605 = vector.broadcast %604 : vector<2x1xf32> to vector<2x2xf32>
    %606 = arith.subf %602, %605 : vector<2x2xf32>
    %607 = math.exp %606 : vector<2x2xf32>
    %cst_215 = arith.constant dense<0.000000e+00> : vector<2xf32>
    %608 = vector.multi_reduction <add>, %607, %cst_215 [1] : vector<2x2xf32> to vector<2xf32>
    %609 = vector.shape_cast %608 : vector<2xf32> to vector<2x1xf32>
    %610 = math.log %609 : vector<2x1xf32>
    %611 = arith.addf %604, %610 : vector<2x1xf32>
    %612 = vector.broadcast %611 : vector<2x1xf32> to vector<2x2xf32>
    %613 = arith.subf %602, %612 : vector<2x2xf32>
    %cst_216 = arith.constant 0.000000e+00 : f32
    %614 = vector.broadcast %cst_216 : f32 to vector<2x2xf32>
    %615 = arith.select %267, %613, %614 : vector<2x2xi1>, vector<2x2xf32>
    %cst_217 = arith.constant dense<0.000000e+00> : vector<2xf32>
    %616 = vector.multi_reduction <add>, %615, %cst_217 [1] : vector<2x2xf32> to vector<2xf32>
    %617 = vector.shape_cast %616 : vector<2xf32> to vector<2x1xf32>
    %618 = arith.addf %583, %617 : vector<2x1xf32>
    %619 = vector.extract_strided_slice %264 {offsets = [0, 160], sizes = [2, 16], strides = [1, 1]} : vector<2x192xf32> to vector<2x16xf32>
    %620 = arith.mulf %619, %619 : vector<2x16xf32>
    %cst_218 = arith.constant dense<0.000000e+00> : vector<2xf32>
    %621 = vector.multi_reduction <add>, %620, %cst_218 [1] : vector<2x16xf32> to vector<2xf32>
    %622 = vector.shape_cast %621 : vector<2xf32> to vector<2x1xf32>
    %cst_219 = arith.constant 1.000000e-24 : f32
    %623 = vector.broadcast %cst_219 : f32 to vector<2x1xf32>
    %624 = arith.maximumf %622, %623 : vector<2x1xf32>
    %625 = math.rsqrt %624 : vector<2x1xf32>
    %626 = vector.broadcast %625 : vector<2x1xf32> to vector<2x16xf32>
    %627 = arith.mulf %619, %626 : vector<2x16xf32>
    %628 = vector.extract_strided_slice %258 {offsets = [0, 160], sizes = [2, 16], strides = [1, 1]} : vector<2x192xf32> to vector<2x16xf32>
    %629 = arith.mulf %628, %628 : vector<2x16xf32>
    %cst_220 = arith.constant dense<0.000000e+00> : vector<2xf32>
    %630 = vector.multi_reduction <add>, %629, %cst_220 [1] : vector<2x16xf32> to vector<2xf32>
    %631 = vector.shape_cast %630 : vector<2xf32> to vector<2x1xf32>
    %cst_221 = arith.constant 1.000000e-24 : f32
    %632 = vector.broadcast %cst_221 : f32 to vector<2x1xf32>
    %633 = arith.maximumf %631, %632 : vector<2x1xf32>
    %634 = math.rsqrt %633 : vector<2x1xf32>
    %635 = vector.broadcast %634 : vector<2x1xf32> to vector<2x16xf32>
    %636 = arith.mulf %628, %635 : vector<2x16xf32>
    %cst_222 = arith.constant dense<0.000000e+00> : vector<2x2xf32>
    %637 = tpu.matmul %627, %636, %cst_222 {dimension_numbers = #tpu.dot_dimension_numbers<[1], [1], [0], [0], [0, 0, 1, 0], [], []>} : vector<2x16xf32>, vector<2x16xf32>, vector<2x2xf32> -> vector<2x2xf32>
    %cst_223 = arith.constant dense<0xFF800000> : vector<2xf32>
    %638 = vector.multi_reduction <maximumf>, %637, %cst_223 [1] : vector<2x2xf32> to vector<2xf32>
    %639 = vector.shape_cast %638 : vector<2xf32> to vector<2x1xf32>
    %640 = vector.broadcast %639 : vector<2x1xf32> to vector<2x2xf32>
    %641 = arith.subf %637, %640 : vector<2x2xf32>
    %642 = math.exp %641 : vector<2x2xf32>
    %cst_224 = arith.constant dense<0.000000e+00> : vector<2xf32>
    %643 = vector.multi_reduction <add>, %642, %cst_224 [1] : vector<2x2xf32> to vector<2xf32>
    %644 = vector.shape_cast %643 : vector<2xf32> to vector<2x1xf32>
    %645 = math.log %644 : vector<2x1xf32>
    %646 = arith.addf %639, %645 : vector<2x1xf32>
    %647 = vector.broadcast %646 : vector<2x1xf32> to vector<2x2xf32>
    %648 = arith.subf %637, %647 : vector<2x2xf32>
    %cst_225 = arith.constant 0.000000e+00 : f32
    %649 = vector.broadcast %cst_225 : f32 to vector<2x2xf32>
    %650 = arith.select %267, %648, %649 : vector<2x2xi1>, vector<2x2xf32>
    %cst_226 = arith.constant dense<0.000000e+00> : vector<2xf32>
    %651 = vector.multi_reduction <add>, %650, %cst_226 [1] : vector<2x2xf32> to vector<2xf32>
    %652 = vector.shape_cast %651 : vector<2xf32> to vector<2x1xf32>
    %653 = arith.addf %618, %652 : vector<2x1xf32>
    %654 = vector.extract_strided_slice %264 {offsets = [0, 176], sizes = [2, 16], strides = [1, 1]} : vector<2x192xf32> to vector<2x16xf32>
    %655 = arith.mulf %654, %654 : vector<2x16xf32>
    %cst_227 = arith.constant dense<0.000000e+00> : vector<2xf32>
    %656 = vector.multi_reduction <add>, %655, %cst_227 [1] : vector<2x16xf32> to vector<2xf32>
    %657 = vector.shape_cast %656 : vector<2xf32> to vector<2x1xf32>
    %cst_228 = arith.constant 1.000000e-24 : f32
    %658 = vector.broadcast %cst_228 : f32 to vector<2x1xf32>
    %659 = arith.maximumf %657, %658 : vector<2x1xf32>
    %660 = math.rsqrt %659 : vector<2x1xf32>
    %661 = vector.broadcast %660 : vector<2x1xf32> to vector<2x16xf32>
    %662 = arith.mulf %654, %661 : vector<2x16xf32>
    %663 = vector.extract_strided_slice %258 {offsets = [0, 176], sizes = [2, 16], strides = [1, 1]} : vector<2x192xf32> to vector<2x16xf32>
    %664 = arith.mulf %663, %663 : vector<2x16xf32>
    %cst_229 = arith.constant dense<0.000000e+00> : vector<2xf32>
    %665 = vector.multi_reduction <add>, %664, %cst_229 [1] : vector<2x16xf32> to vector<2xf32>
    %666 = vector.shape_cast %665 : vector<2xf32> to vector<2x1xf32>
    %cst_230 = arith.constant 1.000000e-24 : f32
    %667 = vector.broadcast %cst_230 : f32 to vector<2x1xf32>
    %668 = arith.maximumf %666, %667 : vector<2x1xf32>
    %669 = math.rsqrt %668 : vector<2x1xf32>
    %670 = vector.broadcast %669 : vector<2x1xf32> to vector<2x16xf32>
    %671 = arith.mulf %663, %670 : vector<2x16xf32>
    %cst_231 = arith.constant dense<0.000000e+00> : vector<2x2xf32>
    %672 = tpu.matmul %662, %671, %cst_231 {dimension_numbers = #tpu.dot_dimension_numbers<[1], [1], [0], [0], [0, 0, 1, 0], [], []>} : vector<2x16xf32>, vector<2x16xf32>, vector<2x2xf32> -> vector<2x2xf32>
    %cst_232 = arith.constant dense<0xFF800000> : vector<2xf32>
    %673 = vector.multi_reduction <maximumf>, %672, %cst_232 [1] : vector<2x2xf32> to vector<2xf32>
    %674 = vector.shape_cast %673 : vector<2xf32> to vector<2x1xf32>
    %675 = vector.broadcast %674 : vector<2x1xf32> to vector<2x2xf32>
    %676 = arith.subf %672, %675 : vector<2x2xf32>
    %677 = math.exp %676 : vector<2x2xf32>
    %cst_233 = arith.constant dense<0.000000e+00> : vector<2xf32>
    %678 = vector.multi_reduction <add>, %677, %cst_233 [1] : vector<2x2xf32> to vector<2xf32>
    %679 = vector.shape_cast %678 : vector<2xf32> to vector<2x1xf32>
    %680 = math.log %679 : vector<2x1xf32>
    %681 = arith.addf %674, %680 : vector<2x1xf32>
    %682 = vector.broadcast %681 : vector<2x1xf32> to vector<2x2xf32>
    %683 = arith.subf %672, %682 : vector<2x2xf32>
    %cst_234 = arith.constant 0.000000e+00 : f32
    %684 = vector.broadcast %cst_234 : f32 to vector<2x2xf32>
    %685 = arith.select %267, %683, %684 : vector<2x2xi1>, vector<2x2xf32>
    %cst_235 = arith.constant dense<0.000000e+00> : vector<2xf32>
    %686 = vector.multi_reduction <add>, %685, %cst_235 [1] : vector<2x2xf32> to vector<2xf32>
    %687 = vector.shape_cast %686 : vector<2xf32> to vector<2x1xf32>
    %688 = arith.addf %653, %687 : vector<2x1xf32>
    %cst_236 = arith.constant dense<0.000000e+00> : vector<1xf32>
    %689 = vector.multi_reduction <add>, %688, %cst_236 [0] : vector<2x1xf32> to vector<1xf32>
    %690 = vector.shape_cast %689 : vector<1xf32> to vector<1x1xf32>
    %cst_237 = arith.constant 0.000000e+00 : f32
    %691 = vector.broadcast %cst_237 : f32 to vector<1x1xf32>
    %692 = arith.subf %691, %690 : vector<1x1xf32>
    %cst_238 = arith.constant 0.0416666679 : f32
    %693 = vector.broadcast %cst_238 : f32 to vector<1x1xf32>
    %694 = arith.mulf %692, %693 : vector<1x1xf32>
    %c0_239 = arith.constant 0 : index
    %c0_240 = arith.constant 0 : index
    %695 = vector.load %arg30[%c0_239, %c0_240] : memref<1x1xf32, #tpu.memory_space<vmem>>, vector<1x1xf32>
    tpu.vector_store %arg30[%c0_239, %c0_240], %694 {strides = array<i32>} : memref<1x1xf32, #tpu.memory_space<vmem>>, vector<1x1xf32>,
    return
  }
}

</mosaic_0001>

<bundles_post_ra>
// kernel: cpc_gnn_forward.1
= control target key start
LH: loop header
LB: loop body
LE: loop exit
PB: predicated region body
PF: predicated region fallthrough
CT: control target
= control target key end

     0   :  { %s6687_s6 = smov 1   ;;  %s6688_s10 = smov 2   ;;  %s8083_s0 = inlined_call_operand.smem [shape: u32[31], index: -1, kind: input, shape index: {}] }
   0x1   :  { %s6738_s5 = sld [smem:[%s8083_s0]]   ;;  %s6689_s14 = smov 3  }
   0x2   :  { %s6743_s9 = sld [smem:[%s8083_s0 + %s6687_s6]]   ;;  %s6690_s18 = smov 4  }
   0x3   :  { %s6748_s13 = sld [smem:[%s8083_s0 + %s6688_s10]]   ;;  %s6691_s22 = smov 5  }
   0x4   :  { %s6753_s17 = sld [smem:[%s8083_s0 + %s6689_s14]]   ;;  %s6692_s26 = smov 6  }
   0x5   :  { %s6758_s21 = sld [smem:[%s8083_s0 + %s6690_s18]]   ;;  %s6693_s30 = smov 7  }
   0x6   :  { %s6763_s25 = sld [smem:[%s8083_s0 + %s6691_s22]]   ;;  %s6694_s4 = smov 8  }
   0x7   :  { %s6768_s29 = sld [smem:[%s8083_s0 + %s6692_s26]]   ;;  %s6695_s10 = smov 9  }
   0x8   :  { %8096 = sst [smem:[#allocation9_spill]] %s6743_s9  ;;  %s6696_s15 = smov 10  }
   0x9   :  { %8097 = sst [smem:[#allocation10_spill]] %s6748_s13  ;;  %s6697_s20 = smov 11  }
   0xa   :  { %8098 = sst [smem:[#allocation11_spill]] %s6753_s17  ;;  %s6698_s26 = smov 12  }
   0xb   :  { %s6773_s3 = sld [smem:[%s8083_s0 + %s6693_s30]]   ;;  %s6699_s1 = smov 13  }
   0xc   :  { %s6778_s8 = sld [smem:[%s8083_s0 + %s6694_s4]]   ;;  %s6700_s7 = smov 14  }
   0xd   :  { %8099 = sst [smem:[#allocation12_spill]] %s6768_s29  ;;  %s6702_s22 = smov 16  }
   0xe   :  { %s6783_s14 = sld [smem:[%s8083_s0 + %s6695_s10]]   ;;  %s6703_s28 = smov 17  }
   0xf   :  { %s6788_s19 = sld [smem:[%s8083_s0 + %s6696_s15]]   ;;  %s6701_s15 = smov 15  }
  0x10   :  { %s6793_s24 = sld [smem:[%s8083_s0 + %s6697_s20]]  }
  0x11   :  { %s6798_s30 = sld [smem:[%s8083_s0 + %s6698_s26]]  }
  0x12   :  { %s6803_s6 = sld [smem:[%s8083_s0 + %s6699_s1]]  }
  0x13   :  { %s6808_s12 = sld [smem:[%s8083_s0 + %s6700_s7]]   ;;  %s6704_s7 = smov 18  }
  0x14   :  { %s6813_s20 = sld [smem:[%s8083_s0 + %s6701_s15]]   ;;  %s6705_s15 = smov 19  }
  0x15   :  { %s6818_s27 = sld [smem:[%s8083_s0 + %s6702_s22]]   ;;  %s6706_s22 = smov 20  }
  0x16   :  { %s6823_s4 = sld [smem:[%s8083_s0 + %s6703_s28]]   ;;  %s6707_s28 = smov 21  }
  0x17   :  { %s6828_s29 = sld [smem:[%s8083_s0 + %s6704_s7]]   ;;  %s6708_s7 = smov 22  }
  0x18   :  { %s6833_s17 = sld [smem:[%s8083_s0 + %s6705_s15]]   ;;  %s6709_s15 = smov 23  }
  0x19   :  { %s6838_s13 = sld [smem:[%s8083_s0 + %s6706_s22]]   ;;  %s6710_s22 = smov 24  }
  0x1a   :  { %s6843_s9 = sld [smem:[%s8083_s0 + %s6707_s28]]   ;;  %s6711_s28 = smov 25  }
  0x1d   :  { %8100 = sst [smem:[#allocation13_spill]] %s6828_s29 }
  0x1e   :  { %8101 = sst [smem:[#allocation14_spill]] %s6833_s17 }
  0x1f   :  { %8102 = sst [smem:[#allocation15_spill]] %s6838_s13 }
  0x20   :  { %8103 = sst [smem:[#allocation16_spill]] %s6843_s9 }
  0x21   :  { %s6848_s29 = sld [smem:[%s8083_s0 + %s6708_s7]]   ;;  %s6712_s7 = smov 26  }
  0x22   :  { %s6853_s17 = sld [smem:[%s8083_s0 + %s6709_s15]]   ;;  %s6713_s15 = smov 27  }
  0x23   :  { %s6858_s13 = sld [smem:[%s8083_s0 + %s6710_s22]]   ;;  %s6714_s22 = smov 28  }
  0x24   :  { %s6863_s9 = sld [smem:[%s8083_s0 + %s6711_s28]]   ;;  %s6715_s28 = smov 29  }
  0x27   :  { %8104 = sst [smem:[#allocation17_spill]] %s6848_s29 }
  0x28   :  { %8105 = sst [smem:[#allocation18_spill]] %s6853_s17 }
  0x29   :  { %8106 = sst [smem:[#allocation19_spill]] %s6858_s13 }
  0x2a   :  { %8107 = sst [smem:[#allocation20_spill]] %s6863_s9 }
  0x2b   :  { %s6868_s29 = sld [smem:[%s8083_s0 + %s6712_s7]]   ;;  %s6716_s7 = smov 30  }
  0x2c   :  { %s6873_s17 = sld [smem:[%s8083_s0 + %s6713_s15]]  }
  0x2d   :  { %s6878_s13 = sld [smem:[%s8083_s0 + %s6714_s22]]  }
  0x2e   :  { %s6883_s9 = sld [smem:[%s8083_s0 + %s6715_s28]]  }
  0x31   :  { %8108 = sst [smem:[#allocation21_spill]] %s6868_s29 }
  0x32   :  { %s6888_s29 = sld [smem:[%s8083_s0 + %s6716_s7]]  }
  0x33   :  { %67 = vsyncpa [#allocation4], 0  ;;  %v135_v0 = vld [vmem:[%s6788_s19] sm:$0xf]  ;;  %vm161_vm0 = vcmask 1043456   ;;  %vm136_vm1 = vcmask 31744  }
  0x34   :  { %v127_v1 = vld [vmem:[%s6738_s5] sm:$0xff]  ;;  %v128_v2 = vld [vmem:[%s6738_s5 + $0x8] sm:$0xff]  ;;  %5986 = vmatprep.subr.msk.mxu0 %vm161_vm0, %v135_v0  ;;  %v129_v3 = vld [vmem:[%s6738_s5 + $0x10] sm:$0xff] }
  0x35   :  { %5988 = vmatprep.mubr.msk.f32.mxu0 %vm136_vm1, %v127_v1  ;;  %5987 = vmatpush3.msk.msra.mxu0 %vm161_vm0, %v135_v0 }
  0x36   :  { %5989 = vmatmul.mubr.msk.f32.vlgmr.msra.gmra.mxu0 %vm136_vm1, %v128_v2 }
  0x37   :  { %68 = vsyncpa [#allocation6], 0  ;;  %5991 = vmatprep.mubr.msk.f32.mxu0 %vm136_vm1, %v129_v3  ;;  %v130_v4 = vld [vmem:[%s6738_s5 + $0x18] sm:$0xff]  ;;  %v131_v5 = vld [vmem:[%s6738_s5 + $0x20] sm:$0xff]  ;;  %v8090_v9 = vmov 0.0   ;;  %vm285_vm2 = vcmask 523264  }
  0x38   :  { %v132_v6 = vld [vmem:[%s6738_s5 + $0x28] sm:$0xff]  ;;  %v133_v7 = vld [vmem:[%s6738_s5 + $0x30] sm:$0xff]  ;;  %v134_v8 = vld [vmem:[%s6738_s5 + $0x38] sm:$0xff]  ;;  %6028 = vmatprep.subr.mxu0 %v8090_v9  ;;  %vm6718_vm3 = vmmov 0   ;;  %s6719_s0 = smov 64   ;;  %s6720_s5 = smov 32  }
  0x39   :  { %v6909_v10 = vld [vmem:[%s6793_s24 + $0x18] sm:$0xff]  ;;  %v6914_v11 = vld [vmem:[%s6793_s24 + $0x10] sm:$0xff]  ;;  %v270_v12 = vld [vmem:[%s6758_s21] sm:$0xff]  ;;  %vm428_vm4 = vcmask 261120   ;;  %vm1511_vm5 = vcmask 64512   ;;  %s8113_s19 = sld [smem:[#allocation15_spill]] }
  0x3a   :  { %5992 = vmatmul.mubr.msk.f32.gmra.mxu0 %vm136_vm1, %v130_v4  ;;  %v6920_v13 = vld [vmem:[%s6793_s24 + $0x8] sm:$0xff]  ;;  %6016 = vmatprep.mubr.msk.f32.mxu1 %vm285_vm2, %v270_v12  ;;  %v6926_v14 = vld [vmem:[%s6793_s24] sm:$0xff]  ;;  %v272_v59 = vld [vmem:[%s6758_s21 + $0x10] sm:$0xff]  ;;  %s6722_s24 = smov 96   ;;  %s6725_s15 = smov 16  }
  0x3b   :  { %5994 = vmatprep.mubr.msk.f32.mxu0 %vm136_vm1, %v131_v5  ;;  %6029 = vmatpush3.msra.mxu0 %v6909_v10  ;;  %v271_v23 = vld [vmem:[%s6758_s21 + $0x8] sm:$0xff]  ;;  %v6955_v27 = vld [vmem:[%s6798_s30] ss:$0 sm:$0xff]  ;;  %v273_v60 = vld [vmem:[%s6758_s21 + $0x18] sm:$0xff]  ;;  %s8114_s30 = sld [smem:[#allocation16_spill]]  ;;  %s6726_s16 = smov 80  }
  0x3c   :  { %6030 = vmatprep.subr.mxu0 %v8090_v9  ;;  %v274_v61 = vld [vmem:[%s6758_s21 + $0x20] sm:$0xff]  ;;  %v275_v62 = vld [vmem:[%s6758_s21 + $0x28] sm:$0xff]  ;;  %v276_v63 = vld [vmem:[%s6758_s21 + $0x30] sm:$0xff]  ;;  %s6727_s18 = smov 48   ;;  %s8127_s22 = sld [smem:[#allocation21_spill]] }
  0x3d   :  { %6031 = vmatpush3.msra.mxu0 %v6914_v11  ;;  %v277_v0 = vld [vmem:[%s6758_s21 + $0x38] sm:$0xff]  ;;  %s8111_s21 = sld [smem:[#allocation14_spill]]  ;;  %s6728_s23 = smov [#allocation3]  }
  0x3e   :  { %5995 = vmatmul.mubr.msk.f32.gmra.mxu0 %vm136_vm1, %v132_v6  ;;  %6032 = vmatprep.subr.mxu0 %v8090_v9  ;;  %s5480_s26 = sshll.u32 %s6728_s23, 4  ;;  %s5481_s26 = int_to_ptr.vmem [resolvable:$true] %s5480_s26 }
  0x3f   :  { %5997 = vmatprep.mubr.msk.f32.mxu0 %vm136_vm1, %v133_v7  ;;  %6033 = vmatpush3.msra.mxu0 %v6920_v13  ;;  %s6643_s28 = scalar_lea.vmem %s5481_s26, 32  ;;  %p6648_p1 = scmp.lt.s32.totalorder %s5481_s26, %s5481_s26 }
  0x40   :  { %6034 = vmatprep.subr.mxu0 %v8090_v9  ;;  %p6644_p0 = scmp.ne.s32.totalorder %s5481_s26, %s6643_s28  ;;  %p6649_p2 = scmp.lt.s32.totalorder %s6643_s28, %s6643_s28 }
  0x41   :  { %6035 = vmatpush3.msra.mxu0 %v6926_v14 }
  0x42   :  { %5998 = vmatmul.mubr.msk.f32.gmra.mxu0 %vm136_vm1, %v134_v8  ;;  %6039 = vmatprep.subr.mxu0 %v8090_v9  ;;  %p6650_p3 = por %p6649_p2, %p6648_p1 }
  0x43   :  { %6036 = vmatprep.mubr.msk.f32.mxu0 %vm6718_vm3, %v8090_v9 }
  0x44   :  { %p6651_p4 = pnand %p6650_p3, %p6644_p0 }
  0x46   :  { %6037 = vmatmul.mubr.f32.vlgmr.msra.gmra.mxu0 %v8090_v9 }
  0x47   :  { %6040 = vmatpush3.msra.mxu0 %v6909_v10  ;;  %6047 = vmatprep.mubr.msk.f32.mxu0 %vm6718_vm3, %v8090_v9 }
  0x48   :  { %6041 = vmatprep.subr.mxu0 %v8090_v9 }
  0x49   :  { %6042 = vmatpush3.msra.mxu0 %v6914_v11 }
  0x4a   :  { %6043 = vmatprep.subr.mxu0 %v8090_v9 }
  0x4b   :  { %6044 = vmatpush3.msra.mxu0 %v6920_v13 }
  0x4c   :  { %6045 = vmatprep.subr.mxu0 %v8090_v9 }
  0x4d   :  { %6046 = vmatpush3.msra.mxu0 %v6926_v14 }
  0x4e   :  { %6061 = vmatprep.subr.mxu0 %v8090_v9 }
  0xf6   :  { %v5990_v15 = vpop.f32.mrf.mxu0 }
  0xf8   :  { %v231_v16 = vpop.f32.mrf.mxu0 }
  0xfa   :  { %v5993_v17 = vpop.f32.mrf.mxu0 }
  0xfc   :  { %v241_v18 = vpop.f32.mrf.mxu0 }
  0xfe   :  { %v5996_v19 = vpop.f32.mrf.mxu0 }
 0x100   :  { %v251_v20 = vpop.f32.mrf.mxu0 }
 0x102   :  { %v5999_v21 = vpop.f32.mrf.mxu0 }
 0x103   :  { %6000 = vmatprep.subr.mxu1 %v5999_v21 }
 0x104   :  { %v261_v22 = vpop.f32.mrf.mxu0  ;;  %6001 = vmatpush3.msra.mxu1 %v5999_v21 }
 0x105   :  { %6002 = vmatprep.subr.mxu1 %v261_v22 }
 0x106   :  { %6003 = vmatpush3.msra.mxu1 %v261_v22  ;;  %v498_v24 = vpop.f32.mrf.mxu0 }
 0x107   :  { %6004 = vmatprep.subr.mxu1 %v5996_v19 }
 0x108   :  { %6005 = vmatpush3.msra.mxu1 %v5996_v19  ;;  %v6038_v25 = vpop.f32.mrf.mxu0 }
 0x109   :  { %6006 = vmatprep.subr.mxu1 %v251_v20 }
 0x10a   :  { %6007 = vmatpush3.msra.mxu1 %v251_v20 }
 0x10b   :  { %6008 = vmatprep.subr.mxu1 %v5993_v17 }
 0x10c   :  { %6009 = vmatpush3.msra.mxu1 %v5993_v17 }
 0x10d   :  { %6010 = vmatprep.subr.mxu1 %v241_v18 }
 0x10e   :  { %6011 = vmatpush3.msra.mxu1 %v241_v18 }
 0x10f   :  { %6012 = vmatprep.subr.mxu1 %v5990_v15 }
 0x110   :  { %6013 = vmatpush3.msra.mxu1 %v5990_v15 }
 0x111   :  { %6014 = vmatprep.subr.mxu1 %v231_v16 }
 0x112   :  { %6015 = vmatpush3.msra.mxu1 %v231_v16 }
 0x113   :  { %6017 = vmatmul.mubr.msk.f32.vlgmr.msra.gmra.mxu1 %vm285_vm2, %v271_v23  ;;  %6050 = vmatprep.subr.mxu1 %v8090_v9 }
 0x114   :  { %6051 = vmatpush3.msra.mxu1 %v6909_v10  ;;  %6019 = vmatprep.mubr.msk.f32.mxu1 %vm285_vm2, %v272_v59 }
 0x115   :  { %6052 = vmatprep.subr.mxu1 %v8090_v9 }
 0x116   :  { %6053 = vmatpush3.msra.mxu1 %v6914_v11 }
 0x117   :  { %6054 = vmatprep.subr.mxu1 %v8090_v9  ;;  %6020 = vmatmul.mubr.msk.f32.gmra.mxu1 %vm285_vm2, %v273_v60 }
 0x118   :  { %6055 = vmatpush3.msra.mxu1 %v6920_v13  ;;  %6022 = vmatprep.mubr.msk.f32.mxu1 %vm285_vm2, %v274_v61 }
 0x119   :  { %6056 = vmatprep.subr.mxu1 %v8090_v9 }
 0x11a   :  { %6057 = vmatpush3.msra.mxu1 %v6926_v14 }
 0x11b   :  { %6072 = vmatprep.subr.mxu1 %v8090_v9  ;;  %6023 = vmatmul.mubr.msk.f32.gmra.mxu1 %vm285_vm2, %v275_v62 }
 0x11c   :  { %6025 = vmatprep.mubr.msk.f32.mxu1 %vm285_vm2, %v276_v63 }
 0x11f   :  { %6026 = vmatmul.mubr.msk.f32.gmra.mxu1 %vm285_vm2, %v277_v0 }
 0x120   :  { %6058 = vmatprep.mubr.msk.f32.mxu1 %vm6718_vm3, %v8090_v9 }
 0x1d3   :  { %v6018_v26 = vpop.f32.mrf.mxu1 }
 0x1d4   :  { %v382_v45 = vadd.f32 %v6018_v26, %v6955_v27 }
 0x1d5   :  { %v376_v28 = vpop.f32.mrf.mxu1 }
 0x1d6   :  { %v377_v29 = vadd.f32 %v6955_v27, %v376_v28 }
 0x1d7   :  { %v6021_v5 = vpop.f32.mrf.mxu1 }
 0x1d8   :  { %v502_v30 = vadd.f32 %v498_v24, %v377_v29 }
 0x1d9   :  { %v386_v6 = vpop.f32.mrf.mxu1 }
 0x1da   :  { %6423 = vtanh.f32 %v502_v30  ;;  %v5550_v32 = vmul.f32 -1.442695, %v502_v30  ;;  %v387_v16 = vadd.f32 %v6955_v27, %v386_v6 }
 0x1db   :  { %v7003_v7 = vpop.f32.mrf.mxu1 }
 0x1dc   :  { %6425 = vpow2.f32 %v5550_v32 }
 0x1dd   :  { %v7005_v8 = vpop.f32.mrf.mxu1 }
 0x1df   :  { %v7007_v12 = vpop.f32.mrf.mxu1 }
 0x1e1   :  { %v7009_v15 = vpop.f32.mrf.mxu1 }
 0x1e7   :  { %v6424_v31 = vpop.eup %6423 }
 0x1e8   :  { %512 = vrot.lane.b32.xlu0 %v6424_v31, %s6719_s0 }
 0x1e9   :  { %v6426_v33 = vpop.eup %6425 }
 0x1ea   :  { %v506_v34 = vadd.f32 1.0, %v6426_v33 }
 0x1ec   :  { %6427 = vrcp.f32 %v506_v34 }
 0x1f9   :  { %v6428_v35 = vpop.eup %6427 }
 0x1fa   :  { %v510_v38 = vmul.f32 0.0, %v6428_v35 }
 0x25a   :  { %v513_v36 = vpop.permute.xlu0 %512 }
 0x25b   :  { %v515_v37 = vmul.f32 %v6428_v35, %v513_v36 }
 0x25d   :  { %517 = vrot.lane.b32.xlu0 %v515_v37, %s6720_s5 }
 0x2cf   :  { %v518_v39 = vpop.permute.xlu0 %517 }
 0x2d0   :  { %v520_v40 = vadd.f32 %v518_v39, %v510_v38 }
 0x2d2   :  { %6429 = vtanh.f32 %v520_v40 }
 0x2df   :  { %v6430_v41 = vpop.eup %6429 }
 0x2e0   :  { %523 = vrot.lane.b32.xlu1 %v6430_v41, %s6719_s0 }
 0x352   :  { %v524_v42 = vpop.permute.xlu1 %523 }
 0x353   :  { %v526_v43 = vmul.f32 %v6428_v35, %v524_v42  ;;  %v392_v35 = vadd.f32 %v6021_v5, %v6955_v27 }
 0x355   :  { %529 = vrot.lane.b32.xlu1 %v526_v43, %s6720_s5 }
 0x3c7   :  { %v530_v44 = vpop.permute.xlu1 %529 }
 0x3c8   :  { %6048 = vmatmul.mubr.msk.f32.vlgmr.msra.gmra.mxu0 %vm428_vm4, %v530_v44 }
 0x3c9   :  { %6062 = vmatpush3.msra.mxu0 %v6909_v10  ;;  %6069 = vmatprep.mubr.msk.f32.mxu0 %vm6718_vm3, %v8090_v9 }
 0x3ca   :  { %6063 = vmatprep.subr.mxu0 %v8090_v9 }
 0x3cb   :  { %6064 = vmatpush3.msra.mxu0 %v6914_v11 }
 0x3cc   :  { %6065 = vmatprep.subr.mxu0 %v8090_v9 }
 0x3cd   :  { %6066 = vmatpush3.msra.mxu0 %v6920_v13 }
 0x3ce   :  { %6067 = vmatprep.subr.mxu0 %v8090_v9 }
 0x3cf   :  { %6068 = vmatpush3.msra.mxu0 %v6926_v14 }
 0x3d0   :  { %6083 = vmatprep.subr.mxu0 %v8090_v9 }
 0x488   :  { %v599_v46 = vpop.f32.mrf.mxu0 }
 0x489   :  { %v603_v47 = vadd.f32 %v599_v46, %v382_v45 }
 0x48a   :  { %v6049_v48 = vpop.f32.mrf.mxu0 }
 0x48b   :  { %6431 = vtanh.f32 %v603_v47  ;;  %v5552_v50 = vmul.f32 -1.442695, %v603_v47 }
 0x48d   :  { %6433 = vpow2.f32 %v5552_v50 }
 0x498   :  { %v6432_v49 = vpop.eup %6431 }
 0x499   :  { %613 = vrot.lane.b32.xlu0 %v6432_v49, %s6719_s0 }
 0x49a   :  { %v6434_v51 = vpop.eup %6433 }
 0x49b   :  { %v607_v52 = vadd.f32 1.0, %v6434_v51 }
 0x49d   :  { %6435 = vrcp.f32 %v607_v52 }
 0x4aa   :  { %v6436_v53 = vpop.eup %6435 }
 0x4ab   :  { %v611_v56 = vmul.f32 %v6436_v53, %v520_v40 }
 0x50b   :  { %v614_v54 = vpop.permute.xlu0 %613 }
 0x50c   :  { %v616_v55 = vmul.f32 %v6436_v53, %v614_v54 }
 0x50e   :  { %618 = vrot.lane.b32.xlu1 %v616_v55, %s6720_s5 }
 0x580   :  { %v619_v57 = vpop.permute.xlu1 %618 }
 0x581   :  { %v621_v58 = vadd.f32 %v619_v57, %v611_v56 }
 0x583   :  { %6437 = vtanh.f32 %v621_v58 }
 0x590   :  { %v6438_v1 = vpop.eup %6437 }
 0x591   :  { %624 = vrot.lane.b32.xlu0 %v6438_v1, %s6719_s0 }
 0x603   :  { %v625_v2 = vpop.permute.xlu0 %624 }
 0x604   :  { %v627_v3 = vmul.f32 %v6436_v53, %v625_v2  ;;  %v397_v53 = vadd.f32 %v6955_v27, %v7005_v8  ;;  %v402_v8 = vadd.f32 %v7003_v7, %v6955_v27 }
 0x606   :  { %630 = vrot.lane.b32.xlu1 %v627_v3, %s6720_s5 }
 0x678   :  { %v631_v4 = vpop.permute.xlu1 %630 }
 0x679   :  { %6059 = vmatmul.mubr.msk.f32.vlgmr.msra.gmra.mxu1 %vm428_vm4, %v631_v4 }
 0x67a   :  { %6073 = vmatpush3.msra.mxu1 %v6909_v10  ;;  %6080 = vmatprep.mubr.msk.f32.mxu1 %vm6718_vm3, %v8090_v9 }
 0x67b   :  { %6074 = vmatprep.subr.mxu1 %v8090_v9 }
 0x67c   :  { %6075 = vmatpush3.msra.mxu1 %v6914_v11 }
 0x67d   :  { %6076 = vmatprep.subr.mxu1 %v8090_v9 }
 0x67e   :  { %6077 = vmatpush3.msra.mxu1 %v6920_v13 }
 0x67f   :  { %6078 = vmatprep.subr.mxu1 %v8090_v9 }
 0x680   :  { %6079 = vmatpush3.msra.mxu1 %v6926_v14 }
 0x681   :  { %6094 = vmatprep.subr.mxu1 %v8090_v9 }
 0x739   :  { %v700_v17 = vpop.f32.mrf.mxu1 }
 0x73a   :  { %v704_v18 = vadd.f32 %v700_v17, %v387_v16 }
 0x73b   :  { %v6060_v19 = vpop.f32.mrf.mxu1 }
 0x73c   :  { %6439 = vtanh.f32 %v704_v18  ;;  %v5554_v21 = vmul.f32 -1.442695, %v704_v18 }
 0x73e   :  { %6441 = vpow2.f32 %v5554_v21 }
 0x749   :  { %v6440_v20 = vpop.eup %6439 }
 0x74a   :  { %714 = vrot.lane.b32.xlu0 %v6440_v20, %s6719_s0 }
 0x74b   :  { %v6442_v22 = vpop.eup %6441 }
 0x74c   :  { %v708_v23 = vadd.f32 1.0, %v6442_v22 }
 0x74e   :  { %6443 = vrcp.f32 %v708_v23 }
 0x75b   :  { %v6444_v24 = vpop.eup %6443 }
 0x75c   :  { %v712_v28 = vmul.f32 %v6444_v24, %v621_v58 }
 0x7bc   :  { %v715_v25 = vpop.permute.xlu0 %714 }
 0x7bd   :  { %v717_v26 = vmul.f32 %v6444_v24, %v715_v25 }
 0x7bf   :  { %719 = vrot.lane.b32.xlu1 %v717_v26, %s6720_s5 }
 0x831   :  { %v720_v29 = vpop.permute.xlu1 %719 }
 0x832   :  { %v722_v30 = vadd.f32 %v720_v29, %v712_v28  ;;  %v407_v29 = vadd.f32 %v6955_v27, %v7009_v15 }
 0x834   :  { %6445 = vtanh.f32 %v722_v30 }
 0x841   :  { %v6446_v31 = vpop.eup %6445 }
 0x842   :  { %725 = vrot.lane.b32.xlu0 %v6446_v31, %s6719_s0 }
 0x8b4   :  { %v726_v32 = vpop.permute.xlu0 %725 }
 0x8b5   :  { %v728_v33 = vmul.f32 %v6444_v24, %v726_v32 }
 0x8b7   :  { %731 = vrot.lane.b32.xlu1 %v728_v33, %s6720_s5 }
 0x929   :  { %v732_v34 = vpop.permute.xlu1 %731 }
 0x92a   :  { %6070 = vmatmul.mubr.msk.f32.vlgmr.msra.gmra.mxu0 %vm428_vm4, %v732_v34 }
 0x92b   :  { %6084 = vmatpush3.msra.mxu0 %v6909_v10  ;;  %6091 = vmatprep.mubr.msk.f32.mxu0 %vm6718_vm3, %v8090_v9 }
 0x92c   :  { %6085 = vmatprep.subr.mxu0 %v8090_v9 }
 0x92d   :  { %6086 = vmatpush3.msra.mxu0 %v6914_v11 }
 0x92e   :  { %6087 = vmatprep.subr.mxu0 %v8090_v9 }
 0x92f   :  { %6088 = vmatpush3.msra.mxu0 %v6920_v13 }
 0x930   :  { %6089 = vmatprep.subr.mxu0 %v8090_v9 }
 0x931   :  { %6090 = vmatpush3.msra.mxu0 %v6926_v14 }
 0x932   :  { %6105 = vmatprep.subr.mxu0 %v8090_v9 }
 0x9ea   :  { %v801_v36 = vpop.f32.mrf.mxu0 }
 0x9eb   :  { %v805_v37 = vadd.f32 %v801_v36, %v392_v35 }
 0x9ec   :  { %v6071_v38 = vpop.f32.mrf.mxu0 }
 0x9ed   :  { %6447 = vtanh.f32 %v805_v37  ;;  %v5556_v40 = vmul.f32 -1.442695, %v805_v37 }
 0x9ef   :  { %6449 = vpow2.f32 %v5556_v40 }
 0x9fa   :  { %v6448_v39 = vpop.eup %6447 }
 0x9fb   :  { %815 = vrot.lane.b32.xlu0 %v6448_v39, %s6719_s0 }
 0x9fc   :  { %v6450_v41 = vpop.eup %6449 }
 0x9fd   :  { %v809_v42 = vadd.f32 1.0, %v6450_v41 }
 0x9ff   :  { %6451 = vrcp.f32 %v809_v42 }
 0xa0c   :  { %v6452_v43 = vpop.eup %6451 }
 0xa0d   :  { %v813_v46 = vmul.f32 %v6452_v43, %v722_v30 }
 0xa6d   :  { %v816_v44 = vpop.permute.xlu0 %815 }
 0xa6e   :  { %v818_v45 = vmul.f32 %v6452_v43, %v816_v44 }
 0xa70   :  { %820 = vrot.lane.b32.xlu1 %v818_v45, %s6720_s5 }
 0xae2   :  { %v821_v47 = vpop.permute.xlu1 %820 }
 0xae3   :  { %v823_v48 = vadd.f32 %v821_v47, %v813_v46  ;;  %v412_v46 = vadd.f32 %v7007_v12, %v6955_v27 }
 0xae5   :  { %6453 = vtanh.f32 %v823_v48 }
 0xaf2   :  { %v6454_v49 = vpop.eup %6453 }
 0xaf3   :  { %826 = vrot.lane.b32.xlu0 %v6454_v49, %s6719_s0 }
 0xb65   :  { %v827_v50 = vpop.permute.xlu0 %826 }
 0xb66   :  { %v829_v51 = vmul.f32 %v6452_v43, %v827_v50 }
 0xb68   :  { %832 = vrot.lane.b32.xlu1 %v829_v51, %s6720_s5 }
 0xbda   :  { %v833_v52 = vpop.permute.xlu1 %832 }
 0xbdb   :  { %6081 = vmatmul.mubr.msk.f32.vlgmr.msra.gmra.mxu1 %vm428_vm4, %v833_v52 }
 0xbdc   :  { %6095 = vmatpush3.msra.mxu1 %v6909_v10  ;;  %6102 = vmatprep.mubr.msk.f32.mxu1 %vm6718_vm3, %v8090_v9 }
 0xbdd   :  { %6096 = vmatprep.subr.mxu1 %v8090_v9 }
 0xbde   :  { %6097 = vmatpush3.msra.mxu1 %v6914_v11 }
 0xbdf   :  { %6098 = vmatprep.subr.mxu1 %v8090_v9 }
 0xbe0   :  { %6099 = vmatpush3.msra.mxu1 %v6920_v13 }
 0xbe1   :  { %6100 = vmatprep.subr.mxu1 %v8090_v9 }
 0xbe2   :  { %6101 = vmatpush3.msra.mxu1 %v6926_v14 }
 0xc9b   :  { %v902_v54 = vpop.f32.mrf.mxu1 }
 0xc9c   :  { %v906_v55 = vadd.f32 %v902_v54, %v397_v53 }
 0xc9d   :  { %v6082_v56 = vpop.f32.mrf.mxu1 }
 0xc9e   :  { %6455 = vtanh.f32 %v906_v55  ;;  %v5558_v58 = vmul.f32 -1.442695, %v906_v55 }
 0xca0   :  { %6457 = vpow2.f32 %v5558_v58  ;;  %v1272_v58 = vld [vmem:[%s6803_s6 + $0x68] sm:$0xff] }
 0xca1   :  { %1393 = vmatprep.subr.mxu1 %v1272_v58  ;;  %v1248_v58 = vld [vmem:[%s6773_s3 + $0x30] sm:$0xff] }
 0xcab   :  { %v6456_v57 = vpop.eup %6455 }
 0xcac   :  { %916 = vrot.lane.b32.xlu0 %v6456_v57, %s6719_s0 }
 0xcad   :  { %v6458_v59 = vpop.eup %6457 }
 0xcae   :  { %v910_v60 = vadd.f32 1.0, %v6458_v59  ;;  %v1274_v59 = vld [vmem:[%s6803_s6 + $0x78] sm:$0xff] }
 0xcb0   :  { %6459 = vrcp.f32 %v910_v60  ;;  %v1271_v60 = vld [vmem:[%s6803_s6 + $0x60] sm:$0xff] }
 0xcbd   :  { %v6460_v61 = vpop.eup %6459 }
 0xcbe   :  { %v914_v0 = vmul.f32 %v6460_v61, %v823_v48 }
 0xd1e   :  { %v917_v62 = vpop.permute.xlu0 %916 }
 0xd1f   :  { %v919_v63 = vmul.f32 %v6460_v61, %v917_v62  ;;  %v1268_v62 = vld [vmem:[%s6803_s6 + $0x48] sm:$0xff] }
 0xd21   :  { %921 = vrot.lane.b32.xlu1 %v919_v63, %s6720_s5  ;;  %v1270_v63 = vld [vmem:[%s6803_s6 + $0x58] sm:$0xff] }
 0xd93   :  { %v922_v1 = vpop.permute.xlu1 %921 }
 0xd94   :  { %v924_v2 = vadd.f32 %v922_v1, %v914_v0  ;;  %v1267_v0 = vld [vmem:[%s6803_s6 + $0x40] sm:$0xff]  ;;  %v1269_v1 = vld [vmem:[%s6803_s6 + $0x50] sm:$0xff] }
 0xd96   :  { %6461 = vtanh.f32 %v924_v2 }
 0xda3   :  { %v6462_v3 = vpop.eup %6461 }
 0xda4   :  { %927 = vrot.lane.b32.xlu0 %v6462_v3, %s6719_s0  ;;  %v1266_v3 = vld [vmem:[%s6803_s6 + $0x38] sm:$0xff] }
 0xe16   :  { %v928_v4 = vpop.permute.xlu0 %927 }
 0xe17   :  { %v930_v5 = vmul.f32 %v6460_v61, %v928_v4  ;;  %v1273_v61 = vld [vmem:[%s6803_s6 + $0x70] sm:$0xff]  ;;  %v1263_v4 = vld [vmem:[%s6803_s6 + $0x20] sm:$0xff] }
 0xe19   :  { %933 = vrot.lane.b32.xlu1 %v930_v5, %s6720_s5  ;;  %v1265_v5 = vld [vmem:[%s6803_s6 + $0x30] sm:$0xff] }
 0xe8b   :  { %v934_v6 = vpop.permute.xlu1 %933 }
 0xe8c   :  { %6092 = vmatmul.mubr.msk.f32.vlgmr.msra.gmra.mxu0 %vm428_vm4, %v934_v6  ;;  %v1260_v6 = vld [vmem:[%s6803_s6 + $0x8] sm:$0xff] }
 0xe8d   :  { %6106 = vmatpush3.msra.mxu0 %v6909_v10  ;;  %6113 = vmatprep.mubr.msk.f32.mxu0 %vm6718_vm3, %v8090_v9 }
 0xe8e   :  { %6107 = vmatprep.subr.mxu0 %v8090_v9 }
 0xe8f   :  { %6108 = vmatpush3.msra.mxu0 %v6914_v11 }
 0xe90   :  { %6109 = vmatprep.subr.mxu0 %v8090_v9 }
 0xe91   :  { %6110 = vmatpush3.msra.mxu0 %v6920_v13 }
 0xe92   :  { %6111 = vmatprep.subr.mxu0 %v8090_v9 }
 0xe93   :  { %6112 = vmatpush3.msra.mxu0 %v6926_v14 }
 0xe94   :  { %1464 = vmatprep.subr.mxu0 %v1274_v59  ;;  %v7182_v59 = vld [vmem:[%s6778_s8 + $0x30] sm:$0xff] }
 0xf4c   :  { %v1003_v16 = vpop.f32.mrf.mxu0 }
 0xf4d   :  { %v1007_v10 = vadd.f32 %v1003_v16, %v402_v8  ;;  %v1262_v8 = vld [vmem:[%s6803_s6 + $0x18] sm:$0xff]  ;;  %v1259_v16 = vld [vmem:[%s6803_s6] sm:$0xff] }
 0xf4e   :  { %v6093_v17 = vpop.f32.mrf.mxu0 }
 0xf4f   :  { %6463 = vtanh.f32 %v1007_v10  ;;  %v5560_v19 = vmul.f32 -1.442695, %v1007_v10  ;;  %v1261_v10 = vld [vmem:[%s6803_s6 + $0x10] sm:$0xff] }
 0xf51   :  { %6465 = vpow2.f32 %v5560_v19 }
 0xf5c   :  { %v6464_v18 = vpop.eup %6463 }
 0xf5d   :  { %1017 = vrot.lane.b32.xlu0 %v6464_v18, %s6719_s0 }
 0xf5e   :  { %v6466_v11 = vpop.eup %6465 }
 0xf5f   :  { %v1011_v20 = vadd.f32 1.0, %v6466_v11 }
 0xf61   :  { %6467 = vrcp.f32 %v1011_v20  ;;  %v8089_v20 = vlaneseq }
 0xf6e   :  { %v6468_v13 = vpop.eup %6467 }
 0xf6f   :  { %v1015_v14 = vmul.f32 %v6468_v13, %v924_v2  ;;  %v1264_v2 = vld [vmem:[%s6803_s6 + $0x28] sm:$0xff]  ;;  %s8122_s6 = sld [smem:[#allocation10_spill]] }
 0xfcf   :  { %v1018_v21 = vpop.permute.xlu0 %1017 }
 0xfd0   :  { %v1020_v22 = vmul.f32 %v6468_v13, %v1018_v21 }
 0xfd2   :  { %1022 = vrot.lane.b32.xlu1 %v1020_v22, %s6720_s5 }
0x1044   :  { %v1023_v23 = vpop.permute.xlu1 %1022 }
0x1045   :  { %v1025_v7 = vadd.f32 %v1023_v23, %v1015_v14 }
0x1047   :  { %6469 = vtanh.f32 %v1025_v7 }
0x1054   :  { %v6470_v24 = vpop.eup %6469 }
0x1055   :  { %1028 = vrot.lane.b32.xlu0 %v6470_v24, %s6719_s0 }
0x10c7   :  { %v1029_v25 = vpop.permute.xlu0 %1028 }
0x10c8   :  { %v1031_v26 = vmul.f32 %v6468_v13, %v1029_v25  ;;  %v7101_v13 = vshrl.u32 %v8089_v20, 7 }
0x10ca   :  { %1034 = vrot.lane.b32.xlu1 %v1031_v26, %s6720_s5  ;;  %8109 = vst [vmem:[#allocation22_spill] sm:$0xff] %v7101_v13  ;;  %v7104_v21 = vsub.s32 1, %v7101_v13  ;;  %v1358_v22 = vsub.s32 3, %v7101_v13  ;;  %v7108_v14 = vsub.s32 0, %v7101_v13  ;;  %v1354_v23 = vsub.s32 2, %v7101_v13 }
0x113c   :  { %v1035_v28 = vpop.permute.xlu1 %1034 }
0x113d   :  { %6103 = vmatmul.mubr.msk.f32.vlgmr.msra.gmra.mxu1 %vm428_vm4, %v1035_v28 }
0x113e   :  { %1433 = vmatprep.mubr.f32.mxu1 %v8090_v9  ;;  %1394 = vmatpush1.msra.mxu1 %v1271_v60  ;;  %v1301_v60 = vld [vmem:[%s6813_s20 + $0xc8] sm:$0xff] }
0x113f   :  { %1395 = vmatprep.subr.mxu1 %v1268_v62  ;;  %v1249_v62 = vld [vmem:[%s6773_s3 + $0x38] sm:$0xff] }
0x1140   :  { %1396 = vmatpush1.msra.mxu1 %v1267_v0  ;;  %v1300_v0 = vld [vmem:[%s6813_s20 + $0xc0] sm:$0xff] }
0x1141   :  { %1397 = vmatprep.subr.mxu1 %v1264_v2  ;;  %v1299_v2 = vld [vmem:[%s6813_s20 + $0xb8] sm:$0xff] }
0x1142   :  { %1398 = vmatpush1.msra.mxu1 %v1263_v4  ;;  %v1298_v4 = vld [vmem:[%s6813_s20 + $0xb0] sm:$0xff] }
0x1143   :  { %1399 = vmatprep.subr.mxu1 %v1260_v6  ;;  %v1297_v6 = vld [vmem:[%s6813_s20 + $0xa8] sm:$0xff] }
0x1144   :  { %1400 = vmatpush1.msra.mxu1 %v1259_v16  ;;  %v1296_v16 = vld [vmem:[%s6813_s20 + $0xa0] sm:$0xff] }
0x11fd   :  { %v1104_v30 = vpop.f32.mrf.mxu1 }
0x11fe   :  { %v1108_v31 = vadd.f32 %v1104_v30, %v407_v29 }
0x11ff   :  { %v6104_v32 = vpop.f32.mrf.mxu1 }
0x1200   :  { %6471 = vtanh.f32 %v1108_v31  ;;  %v5562_v34 = vmul.f32 -1.442695, %v1108_v31 }
0x1202   :  { %6473 = vpow2.f32 %v5562_v34 }
0x120d   :  { %v6472_v33 = vpop.eup %6471 }
0x120e   :  { %1118 = vrot.lane.b32.xlu0 %v6472_v33, %s6719_s0 }
0x120f   :  { %v6474_v35 = vpop.eup %6473 }
0x1210   :  { %v1112_v36 = vadd.f32 1.0, %v6474_v35 }
0x1212   :  { %6475 = vrcp.f32 %v1112_v36 }
0x121f   :  { %v6476_v37 = vpop.eup %6475 }
0x1220   :  { %v1116_v40 = vmul.f32 %v6476_v37, %v1025_v7  ;;  %v1275_v7 = vld [vmem:[%s6808_s12] sm:$0xf]  ;;  %s8123_s12 = sld [smem:[#allocation11_spill]] }
0x1221   :  { %v1351_v24 = vrot.slane %v1275_v7, %v7104_v21  ;;  %v1359_v25 = vrot.slane %v1275_v7, %v1358_v22  ;;  %v1347_v26 = vrot.slane %v1275_v7, %v7108_v14  ;;  %v1355_v29 = vrot.slane %v1275_v7, %v1354_v23  ;;  %v1293_v22 = vld [vmem:[%s6813_s20 + $0x88] sm:$0xff]  ;;  %v1292_v7 = vld [vmem:[%s6813_s20 + $0x80] sm:$0xff] }
0x1222   :  { %v1277_v23 = vld [vmem:[%s6813_s20 + $0x8] sm:$0xff] }
0x1280   :  { %v1119_v38 = vpop.permute.xlu0 %1118 }
0x1281   :  { %v1121_v39 = vmul.f32 %v6476_v37, %v1119_v38  ;;  %v7116_v38 = vld [vmem:[%s6778_s8] sm:$0xff] }
0x1283   :  { %1123 = vrot.lane.b32.xlu1 %v1121_v39, %s6720_s5  ;;  %v1307_v39 = vld [vmem:[%s6813_s20 + $0xf8] sm:$0xff] }
0x12f5   :  { %v1124_v41 = vpop.permute.xlu1 %1123 }
0x12f6   :  { %v1126_v15 = vadd.f32 %v1124_v41, %v1116_v40  ;;  %v1291_v40 = vld [vmem:[%s6813_s20 + $0x78] sm:$0xff]  ;;  %v1243_v41 = vld [vmem:[%s6773_s3 + $0x8] sm:$0xff] }
0x12f8   :  { %6477 = vtanh.f32 %v1126_v15 }
0x1305   :  { %v6478_v42 = vpop.eup %6477 }
0x1306   :  { %1129 = vrot.lane.b32.xlu0 %v6478_v42, %s6719_s0  ;;  %v1306_v42 = vld [vmem:[%s6813_s20 + $0xf0] sm:$0xff] }
0x1378   :  { %v1130_v43 = vpop.permute.xlu0 %1129 }
0x1379   :  { %v1132_v44 = vmul.f32 %v6476_v37, %v1130_v43  ;;  %v1242_v37 = vld [vmem:[%s6773_s3] sm:$0xff]  ;;  %v1290_v43 = vld [vmem:[%s6813_s20 + $0x70] sm:$0xff] }
0x137b   :  { %1135 = vrot.lane.b32.xlu1 %v1132_v44, %s6720_s5  ;;  %v1244_v44 = vld [vmem:[%s6773_s3 + $0x10] sm:$0xff] }
0x13ed   :  { %v1136_v45 = vpop.permute.xlu1 %1135 }
0x13ee   :  { %6114 = vmatmul.mubr.msk.f32.vlgmr.msra.gmra.mxu0 %vm428_vm4, %v1136_v45  ;;  %v7138_v45 = vld [vmem:[%s6778_s8 + $0x10] sm:$0xff] }
0x13ef   :  { %1504 = vmatprep.mubr.f32.mxu0 %v8090_v9  ;;  %1465 = vmatpush1.msra.mxu0 %v1273_v61  ;;  %v1285_v61 = vld [vmem:[%s6813_s20 + $0x48] sm:$0xff] }
0x13f0   :  { %1466 = vmatprep.subr.mxu0 %v1270_v63  ;;  %v7193_v63 = vld [vmem:[%s6778_s8 + $0x38] sm:$0xff] }
0x13f1   :  { %1467 = vmatpush1.msra.mxu0 %v1269_v1  ;;  %v1284_v1 = vld [vmem:[%s6813_s20 + $0x40] sm:$0xff] }
0x13f2   :  { %1468 = vmatprep.subr.mxu0 %v1266_v3  ;;  %v1283_v3 = vld [vmem:[%s6813_s20 + $0x38] sm:$0xff] }
0x13f3   :  { %1469 = vmatpush1.msra.mxu0 %v1265_v5  ;;  %v1282_v5 = vld [vmem:[%s6813_s20 + $0x30] sm:$0xff] }
0x13f4   :  { %1470 = vmatprep.subr.mxu0 %v1262_v8  ;;  %v1281_v8 = vld [vmem:[%s6813_s20 + $0x28] sm:$0xff] }
0x13f5   :  { %1471 = vmatpush1.msra.mxu0 %v1261_v10  ;;  %v1280_v10 = vld [vmem:[%s6813_s20 + $0x20] sm:$0xff] }
0x14ae   :  { %v1205_v47 = vpop.f32.mrf.mxu0 }
0x14af   :  { %v1209_v48 = vadd.f32 %v1205_v47, %v412_v46  ;;  %v1305_v46 = vld [vmem:[%s6813_s20 + $0xe8] sm:$0xff] }
0x14b0   :  { %v6115_v49 = vpop.f32.mrf.mxu0  ;;  %v1289_v47 = vld [vmem:[%s6813_s20 + $0x68] sm:$0xff] }
0x14b1   :  { %6479 = vtanh.f32 %v1209_v48  ;;  %v5564_v51 = vmul.f32 -1.442695, %v1209_v48  ;;  %v1245_v48 = vld [vmem:[%s6773_s3 + $0x18] sm:$0xff] }
0x14b2   :  { %v7149_v49 = vld [vmem:[%s6778_s8 + $0x18] sm:$0xff] }
0x14b3   :  { %6481 = vpow2.f32 %v5564_v51  ;;  %v1288_v51 = vld [vmem:[%s6813_s20 + $0x60] sm:$0xff] }
0x14be   :  { %v6480_v50 = vpop.eup %6479 }
0x14bf   :  { %1219 = vrot.lane.b32.xlu0 %v6480_v50, %s6719_s0  ;;  %v1304_v50 = vld [vmem:[%s6813_s20 + $0xe0] sm:$0xff] }
0x14c0   :  { %v6482_v52 = vpop.eup %6481 }
0x14c1   :  { %v1213_v53 = vadd.f32 1.0, %v6482_v52  ;;  %v1246_v52 = vld [vmem:[%s6773_s3 + $0x20] sm:$0xff] }
0x14c3   :  { %6483 = vrcp.f32 %v1213_v53  ;;  %v7160_v53 = vld [vmem:[%s6778_s8 + $0x20] sm:$0xff] }
0x14d0   :  { %v6484_v54 = vpop.eup %6483 }
0x14d1   :  { %v1217_v55 = vmul.f32 %v6484_v54, %v1126_v15  ;;  %v7127_v15 = vld [vmem:[%s6778_s8 + $0x8] sm:$0xff] }
0x1531   :  { %v1220_v27 = vpop.permute.xlu0 %1219 }
0x1532   :  { %v1222_v12 = vmul.f32 %v6484_v54, %v1220_v27  ;;  %v1287_v27 = vld [vmem:[%s6813_s20 + $0x58] sm:$0xff] }
0x1534   :  { %1224 = vrot.lane.b32.xlu1 %v1222_v12, %s6720_s5  ;;  %v1247_v12 = vld [vmem:[%s6773_s3 + $0x28] sm:$0xff] }
0x15a6   :  { %v1225_v56 = vpop.permute.xlu1 %1224 }
0x15a7   :  { %v1227_v57 = vadd.f32 %v1225_v56, %v1217_v55  ;;  %v7171_v55 = vld [vmem:[%s6778_s8 + $0x28] sm:$0xff]  ;;  %v1302_v56 = vld [vmem:[%s6813_s20 + $0xd0] sm:$0xff] }
0x15a9   :  { %6485 = vtanh.f32 %v1227_v57  ;;  %v1286_v57 = vld [vmem:[%s6813_s20 + $0x50] sm:$0xff] }
0x15b6   :  { %v6486_v17 = vpop.eup %6485 }
0x15b7   :  { %1230 = vrot.lane.b32.xlu0 %v6486_v17, %s6719_s0  ;;  %v1295_v17 = vld [vmem:[%s6813_s20 + $0x98] sm:$0xff] }
0x1629   :  { %v1231_v18 = vpop.permute.xlu0 %1230 }
0x162a   :  { %v1233_v19 = vmul.f32 %v6484_v54, %v1231_v18  ;;  %v1303_v54 = vld [vmem:[%s6813_s20 + $0xd8] sm:$0xff] }
0x162b   :  { %v1279_v18 = vld [vmem:[%s6813_s20 + $0x18] sm:$0xff] }
0x162c   :  { %1365 = vrot.lane.b32.xlu1 %v1233_v19, %s6720_s5  ;;  %v1294_v19 = vld [vmem:[%s6813_s20 + $0x90] sm:$0xff] }
0x169e   :  { %v1366_v11 = vpop.permute.xlu1 %1365 }
0x169f   :  { %5565 = vmatmul.mubr.msk.f32.vlgmr.msra.gmra.mxu1 %vm428_vm4, %v1366_v11  ;;  %5566 = vmatmul.mubr.msk.f32.vlgmr.msra.gmra.mxu0 %vm428_vm4, %v1366_v11  ;;  %v1278_v11 = vld [vmem:[%s6813_s20 + $0x10] sm:$0xff] }
0x16a0   :  { %1600 = vmatprep.mubr.f32.mxu1 %v8090_v9  ;;  %1737 = vmatprep.mubr.f32.mxu0 %v8090_v9 }
0x175f   :  { %v1435_v28 = vpop.f32.mrf.mxu1  ;;  %v1506_v30 = vpop.f32.mrf.mxu0 }
0x1760   :  { %v1436_v35 = vadd.f32 %v1435_v28, %v1347_v26  ;;  %v1507_v36 = vadd.f32 %v1506_v30, %v1355_v29  ;;  %v7222_v26 = vld [vmem:[%s6763_s25 + $0x8] sm:$0xff]  ;;  %v7225_v28 = vld [vmem:[%s6763_s25 + $0x18] sm:$0xff]  ;;  %v6721_v29 = vmov 0   ;;  %v7231_v30 = vld [vmem:[%s6763_s25 + $0x10] sm:$0xff] }
0x1761   :  { %v1437_v31 = vpop.f32.mrf.mxu1  ;;  %v1508_v32 = vpop.f32.mrf.mxu0  ;;  %6422 = vset.pattern.permute.xlu1 %v6721_v29  ;;  %6421 = vset.pattern.permute.xlu0 %v6721_v29  ;;  %vm1956_vm7 = vcmp.gt.f32.partialorder %v7222_v26, 0.5  ;;  %vm8095_vm8 = vcmp.gt.f32.partialorder %v7225_v28, 0.5  ;;  %vm8093_vm9 = vcmp.gt.f32.partialorder %v7231_v30, 0.5 }
0x1762   :  { %v1438_v33 = vadd.f32 %v1437_v31, %v1351_v24  ;;  %v1509_v34 = vadd.f32 %v1508_v32, %v1359_v25  ;;  %v1276_v24 = vld [vmem:[%s6813_s20] sm:$0xff]  ;;  %v1964_v32 = vsel %vm1956_vm7, 1, %v6721_v29  ;;  %s8124_s20 = sld [smem:[#allocation19_spill]] }
0x1763   :  { %v7219_v25 = vld [vmem:[%s6763_s25] sm:$0xff]  ;;  %1975 = vperm.xlu1 %6422, %v1964_v32  }
0x1764   :  { %1566 = vmatprep.subr.mxu1 %v1438_v33  ;;  %1703 = vmatprep.subr.mxu0 %v1509_v34  ;;  %vm1955_vm6 = vcmp.gt.f32.partialorder %v7219_v25, 0.5  ;;  %v7239_v33 = vld [vmem:[%s6763_s25 + $0x28] sm:$0xff]  ;;  %v7242_v34 = vld [vmem:[%s6763_s25 + $0x20] sm:$0xff] }
0x1765   :  { %1567 = vmatpush1.msra.mxu1 %v1436_v35  ;;  %1704 = vmatpush1.msra.mxu0 %v1507_v36  ;;  %v1963_v31 = vsel %vm1955_vm6, 1, %v6721_v29  ;;  %v1966_v35 = vsel %vm8095_vm8, 1, %v6721_v29  ;;  %v1965_v36 = vsel %vm8093_vm9, 1, %v6721_v29  ;;  %vm1960_vm10 = vcmp.gt.f32.partialorder %v7239_v33, 0.5 }
0x1766   :  { %5567 = vmatmul.mubr.msk.f32.vlgmr.msra.gmra.mxu1 %vm1511_vm5, %v1242_v37  ;;  %5575 = vmatmul.mubr.msk.f32.vlgmr.msra.gmra.mxu0 %vm1511_vm5, %v7116_v38  ;;  %vm1959_vm11 = vcmp.gt.f32.partialorder %v7242_v34, 0.5  ;;  %v7251_v37 = vld [vmem:[%s6763_s25 + $0x38] sm:$0xff] }
0x1767   :  { %1606 = vmatprep.mubr.f32.mxu1 %v8090_v9  ;;  %1743 = vmatprep.mubr.f32.mxu0 %v8090_v9  ;;  %vm8092_vm12 = vcmp.gt.f32.partialorder %v7251_v37, 0.5 }
0x1768   :  { %5757 = vmatprep.subr.mxu1 %v1307_v39  ;;  %1972 = vperm.xlu0 %6421, %v1963_v31   ;;  %v7254_v39 = vld [vmem:[%s6763_s25 + $0x30] sm:$0xff] }
0x1769   :  { %5758 = vmatpush3.msra.mxu1 %v1291_v40  ;;  %1978 = vperm.xlu1 %6422, %v1965_v36   ;;  %v1968_v40 = vsel %vm1960_vm10, 1, %v6721_v29  ;;  %vm8088_vm13 = vcmp.gt.f32.partialorder %v7254_v39, 0.5 }
0x176a   :  { %5568 = vmatmul.mubr.msk.f32.gmra.mxu1 %vm1511_vm5, %v1243_v41  ;;  %5576 = vmatmul.mubr.msk.f32.gmra.mxu0 %vm1511_vm5, %v7127_v15  ;;  %v1967_v41 = vsel %vm1959_vm11, 1, %v6721_v29 }
0x176b   :  { %1612 = vmatprep.mubr.f32.mxu1 %v8090_v9  ;;  %1749 = vmatprep.mubr.f32.mxu0 %v8090_v9 }
0x176c   :  { %5759 = vmatprep.subr.mxu1 %v1306_v42  ;;  %1981 = vperm.xlu0 %6421, %v1966_v35   ;;  %v1970_v42 = vsel %vm8092_vm12, 1, %v6721_v29 }
0x176d   :  { %5760 = vmatpush3.msra.mxu1 %v1290_v43  ;;  %1984 = vperm.xlu1 %6422, %v1967_v41   ;;  %v1969_v43 = vsel %vm8088_vm13, 1, %v6721_v29 }
0x176e   :  { %5569 = vmatmul.mubr.msk.f32.gmra.mxu1 %vm1511_vm5, %v1244_v44  ;;  %5577 = vmatmul.mubr.msk.f32.gmra.mxu0 %vm1511_vm5, %v7138_v45 }
0x176f   :  { %1618 = vmatprep.mubr.f32.mxu1 %v8090_v9  ;;  %1755 = vmatprep.mubr.f32.mxu0 %v8090_v9 }
0x1770   :  { %5761 = vmatprep.subr.mxu1 %v1305_v46  ;;  %1987 = vperm.xlu0 %6421, %v1968_v40  }
0x1771   :  { %5762 = vmatpush3.msra.mxu1 %v1289_v47  ;;  %1990 = vperm.xlu1 %6422, %v1969_v43  }
0x1772   :  { %5570 = vmatmul.mubr.msk.f32.gmra.mxu1 %vm1511_vm5, %v1245_v48  ;;  %5578 = vmatmul.mubr.msk.f32.gmra.mxu0 %vm1511_vm5, %v7149_v49 }
0x1773   :  { %1624 = vmatprep.mubr.f32.mxu1 %v8090_v9  ;;  %1761 = vmatprep.mubr.f32.mxu0 %v8090_v9 }
0x1774   :  { %5763 = vmatprep.subr.mxu1 %v1304_v50  ;;  %1993 = vperm.xlu0 %6421, %v1970_v42  }
0x1775   :  { %5764 = vmatpush3.msra.mxu1 %v1288_v51  ;;  %2192 = vperm.xlu1 %6422, %v7251_v37  }
0x1776   :  { %5571 = vmatmul.mubr.msk.f32.gmra.mxu1 %vm1511_vm5, %v1246_v52  ;;  %5579 = vmatmul.mubr.msk.f32.gmra.mxu0 %vm1511_vm5, %v7160_v53 }
0x1777   :  { %1630 = vmatprep.mubr.f32.mxu1 %v8090_v9  ;;  %1767 = vmatprep.mubr.f32.mxu0 %v8090_v9 }
0x1778   :  { %5765 = vmatprep.subr.mxu1 %v1303_v54  ;;  %2187 = vperm.xlu0 %6421, %v7254_v39  }
0x1779   :  { %5766 = vmatpush3.msra.mxu1 %v1287_v27  ;;  %2182 = vperm.xlu1 %6422, %v7239_v33  }
0x177a   :  { %5572 = vmatmul.mubr.msk.f32.gmra.mxu1 %vm1511_vm5, %v1247_v12  ;;  %5580 = vmatmul.mubr.msk.f32.gmra.mxu0 %vm1511_vm5, %v7171_v55 }
0x177b   :  { %1636 = vmatprep.mubr.f32.mxu1 %v8090_v9  ;;  %1773 = vmatprep.mubr.f32.mxu0 %v8090_v9 }
0x177c   :  { %5767 = vmatprep.subr.mxu1 %v1302_v56  ;;  %2177 = vperm.xlu0 %6421, %v7242_v34  }
0x177d   :  { %5768 = vmatpush3.msra.mxu1 %v1286_v57  ;;  %2172 = vperm.xlu1 %6422, %v7225_v28  }
0x177e   :  { %5573 = vmatmul.mubr.msk.f32.gmra.mxu1 %vm1511_vm5, %v1248_v58  ;;  %5581 = vmatmul.mubr.msk.f32.gmra.mxu0 %vm1511_vm5, %v7182_v59 }
0x177f   :  { %1642 = vmatprep.mubr.f32.mxu1 %v8090_v9  ;;  %1779 = vmatprep.mubr.f32.mxu0 %v8090_v9 }
0x1780   :  { %5769 = vmatprep.subr.mxu1 %v1301_v60  ;;  %2167 = vperm.xlu0 %6421, %v7231_v30  }
0x1781   :  { %5770 = vmatpush3.msra.mxu1 %v1285_v61  ;;  %2162 = vperm.xlu1 %6422, %v7222_v26  }
0x1782   :  { %5574 = vmatmul.mubr.msk.f32.gmra.mxu1 %vm1511_vm5, %v1249_v62  ;;  %5582 = vmatmul.mubr.msk.f32.gmra.mxu0 %vm1511_vm5, %v7193_v63 }
0x1783   :  { %5771 = vmatprep.subr.mxu1 %v1300_v0  ;;  %6118 = vmatprep.mubr.msk.f32.mxu0 %vm1511_vm5, %v7116_v38 }
0x1784   :  { %5772 = vmatpush3.msra.mxu1 %v1284_v1  ;;  %2157 = vperm.xlu0 %6421, %v7219_v25  }
0x1785   :  { %5773 = vmatprep.subr.mxu1 %v1299_v2 }
0x1786   :  { %5774 = vmatpush3.msra.mxu1 %v1283_v3 }
0x1787   :  { %5775 = vmatprep.subr.mxu1 %v1298_v4 }
0x1788   :  { %5776 = vmatpush3.msra.mxu1 %v1282_v5 }
0x1789   :  { %5777 = vmatprep.subr.mxu1 %v1297_v6 }
0x178a   :  { %5778 = vmatpush3.msra.mxu1 %v1281_v8 }
0x178b   :  { %5779 = vmatprep.subr.mxu1 %v1296_v16 }
0x178c   :  { %5780 = vmatpush3.msra.mxu1 %v1280_v10 }
0x178d   :  { %5781 = vmatprep.subr.mxu1 %v1295_v17 }
0x178e   :  { %5782 = vmatpush3.msra.mxu1 %v1279_v18 }
0x178f   :  { %5783 = vmatprep.subr.mxu1 %v1294_v19 }
0x1790   :  { %5784 = vmatpush3.msra.mxu1 %v1278_v11 }
0x1791   :  { %5785 = vmatprep.subr.mxu1 %v1293_v22 }
0x1792   :  { %5786 = vmatpush3.msra.mxu1 %v1277_v23 }
0x1793   :  { %5787 = vmatprep.subr.mxu1 %v1292_v7 }
0x1794   :  { %5788 = vmatpush3.msra.mxu1 %v1276_v24 }
0x1826   :  { %v7274_v44 = vpop.f32.mrf.mxu1  ;;  %v1739_v46 = vpop.f32.mrf.mxu0 }
0x1827   :  { %v1786_v47 = vadd.f32 %v1739_v46, %v7274_v44 }
0x1828   :  { %v7277_v48 = vpop.f32.mrf.mxu1  ;;  %v1741_v50 = vpop.f32.mrf.mxu0 }
0x1829   :  { %v1787_v51 = vadd.f32 %v1741_v50, %v7277_v48  ;;  %v1818_v52 = vmul.f32 0.2, %v1786_v47  ;;  %vm1802_vm14 = vcmp.gt.f32.partialorder %v1786_v47, 0.0 }
0x182a   :  { %v7280_v54 = vpop.f32.mrf.mxu1  ;;  %v1745_v27 = vpop.f32.mrf.mxu0 }
0x182b   :  { %v1819_v12 = vmul.f32 0.2, %v1787_v51  ;;  %v1788_v56 = vadd.f32 %v1745_v27, %v7280_v54  ;;  %vm1803_vm15 = vcmp.gt.f32.partialorder %v1787_v51, 0.0  ;;  %v1834_v62 = vsel %vm1802_vm14, %v1786_v47, %v1818_v52 }
0x182c   :  { %v7283_v57 = vpop.f32.mrf.mxu1  ;;  %v1747_v58 = vpop.f32.mrf.mxu0 }
0x182d   :  { %v1789_v60 = vadd.f32 %v1747_v58, %v7283_v57  ;;  %v1835_v61 = vsel %vm1803_vm15, %v1787_v51, %v1819_v12  ;;  %v1820_v0 = vmul.f32 0.2, %v1788_v56  ;;  %vm1804_vm1 = vcmp.gt.f32.partialorder %v1788_v56, 0.0 }
0x182e   :  { %v7286_v1 = vpop.f32.mrf.mxu1  ;;  %v1751_v2 = vpop.f32.mrf.mxu0  ;;  %1914 = vmatprep.mubr.f32.mxu1 %v1835_v61 }
0x182f   :  { %v1821_v3 = vmul.f32 0.2, %v1789_v60  ;;  %v1790_v4 = vadd.f32 %v1751_v2, %v7286_v1  ;;  %1915 = vmatmul.mubr.f32.vlgmr.msra.gmra.mxu1 %v1834_v62  ;;  %vm1805_vm0 = vcmp.gt.f32.partialorder %v1789_v60, 0.0  ;;  %v1836_v19 = vsel %vm1804_vm1, %v1788_v56, %v1820_v0 }
0x1830   :  { %v7289_v5 = vpop.f32.mrf.mxu1  ;;  %v1753_v6 = vpop.f32.mrf.mxu0 }
0x1831   :  { %v1791_v8 = vadd.f32 %v1753_v6, %v7289_v5  ;;  %v1837_v16 = vsel %vm1805_vm0, %v1789_v60, %v1821_v3  ;;  %v1822_v10 = vmul.f32 0.2, %v1790_v4  ;;  %vm1806_vm15 = vcmp.gt.f32.partialorder %v1790_v4, 0.0 }
0x1832   :  { %v7292_v17 = vpop.f32.mrf.mxu1  ;;  %v1757_v18 = vpop.f32.mrf.mxu0  ;;  %1919 = vmatprep.mubr.f32.mxu1 %v1837_v16 }
0x1833   :  { %v1823_v11 = vmul.f32 0.2, %v1791_v8  ;;  %v1792_v22 = vadd.f32 %v1757_v18, %v7292_v17  ;;  %1920 = vmatmul.mubr.f32.gmra.mxu1 %v1836_v19  ;;  %vm1807_vm14 = vcmp.gt.f32.partialorder %v1791_v8, 0.0  ;;  %v1838_v36 = vsel %vm1806_vm15, %v1790_v4, %v1822_v10 }
0x1834   :  { %v7295_v23 = vpop.f32.mrf.mxu1  ;;  %v1759_v7 = vpop.f32.mrf.mxu0 }
0x1835   :  { %v1793_v24 = vadd.f32 %v1759_v7, %v7295_v23  ;;  %v1839_v29 = vsel %vm1807_vm14, %v1791_v8, %v1823_v11  ;;  %v1824_v31 = vmul.f32 0.2, %v1792_v22  ;;  %vm1808_vm1 = vcmp.gt.f32.partialorder %v1792_v22, 0.0 }
0x1836   :  { %v7298_v32 = vpop.f32.mrf.mxu1  ;;  %v1763_v35 = vpop.f32.mrf.mxu0  ;;  %1924 = vmatprep.mubr.f32.mxu1 %v1839_v29 }
0x1837   :  { %v1825_v40 = vmul.f32 0.2, %v1793_v24  ;;  %v1794_v41 = vadd.f32 %v1763_v35, %v7298_v32  ;;  %1925 = vmatmul.mubr.f32.gmra.mxu1 %v1838_v36  ;;  %vm1809_vm0 = vcmp.gt.f32.partialorder %v1793_v24, 0.0  ;;  %v1840_v27 = vsel %vm1808_vm1, %v1792_v22, %v1824_v31 }
0x1838   :  { %v7301_v42 = vpop.f32.mrf.mxu1  ;;  %v1765_v43 = vpop.f32.mrf.mxu0 }
0x1839   :  { %v1795_v46 = vadd.f32 %v1765_v43, %v7301_v42  ;;  %v1841_v47 = vsel %vm1809_vm0, %v1793_v24, %v1825_v40  ;;  %v1826_v50 = vmul.f32 0.2, %v1794_v41  ;;  %vm1810_vm15 = vcmp.gt.f32.partialorder %v1794_v41, 0.0 }
0x183a   :  { %v7304_v51 = vpop.f32.mrf.mxu1  ;;  %v1769_v52 = vpop.f32.mrf.mxu0  ;;  %1929 = vmatprep.mubr.f32.mxu1 %v1841_v47 }
0x183b   :  { %v1827_v12 = vmul.f32 0.2, %v1795_v46  ;;  %v1796_v56 = vadd.f32 %v1769_v52, %v7304_v51  ;;  %1930 = vmatmul.mubr.f32.gmra.mxu1 %v1840_v27  ;;  %vm1811_vm14 = vcmp.gt.f32.partialorder %v1795_v46, 0.0  ;;  %v1842_v4 = vsel %vm1810_vm15, %v1794_v41, %v1826_v50 }
0x183c   :  { %v7307_v58 = vpop.f32.mrf.mxu1  ;;  %v1771_v60 = vpop.f32.mrf.mxu0 }
0x183d   :  { %v1797_v61 = vadd.f32 %v1771_v60, %v7307_v58  ;;  %v1843_v62 = vsel %vm1811_vm14, %v1795_v46, %v1827_v12  ;;  %v1828_v0 = vmul.f32 0.2, %v1796_v56  ;;  %vm1812_vm1 = vcmp.gt.f32.partialorder %v1796_v56, 0.0 }
0x183e   :  { %v7310_v2 = vpop.f32.mrf.mxu1  ;;  %v1775_v3 = vpop.f32.mrf.mxu0  ;;  %1934 = vmatprep.mubr.f32.mxu1 %v1843_v62 }
0x183f   :  { %v1829_v6 = vmul.f32 0.2, %v1797_v61  ;;  %v1798_v8 = vadd.f32 %v1775_v3, %v7310_v2  ;;  %1935 = vmatmul.mubr.f32.gmra.mxu1 %v1842_v4  ;;  %vm1813_vm0 = vcmp.gt.f32.partialorder %v1797_v61, 0.0  ;;  %v1844_v24 = vsel %vm1812_vm1, %v1796_v56, %v1828_v0  ;;  %v1976_v62 = vpop.permute.xlu1 %1975  ;;  %v1973_v4 = vpop.permute.xlu0 %1972 }
0x1840   :  { %v7313_v16 = vpop.f32.mrf.mxu1  ;;  %v1777_v10 = vpop.f32.mrf.mxu0 }
0x1841   :  { %v1799_v18 = vadd.f32 %v1777_v10, %v7313_v16  ;;  %v1845_v19 = vsel %vm1813_vm0, %v1797_v61, %v1829_v6  ;;  %v1830_v11 = vmul.f32 0.2, %v1798_v8  ;;  %vm1814_vm15 = vcmp.gt.f32.partialorder %v1798_v8, 0.0 }
0x1842   :  { %v7316_v22 = vpop.f32.mrf.mxu1  ;;  %v1781_v7 = vpop.f32.mrf.mxu0  ;;  %1939 = vmatprep.mubr.f32.mxu1 %v1845_v19 }
0x1843   :  { %v1831_v29 = vmul.f32 0.2, %v1799_v18  ;;  %v1800_v31 = vadd.f32 %v1781_v7, %v7316_v22  ;;  %1940 = vmatmul.mubr.f32.gmra.mxu1 %v1844_v24  ;;  %vm1815_vm14 = vcmp.gt.f32.partialorder %v1799_v18, 0.0  ;;  %v1846_v46 = vsel %vm1814_vm15, %v1798_v8, %v1830_v11  ;;  %v1979_v8 = vpop.permute.xlu1 %1978  ;;  %v1982_v19 = vpop.permute.xlu0 %1981 }
0x1844   :  { %v7319_v35 = vpop.f32.mrf.mxu1  ;;  %v1783_v36 = vpop.f32.mrf.mxu0  ;;  %vm1995_vm15 = vcmp.eq.s32.totalorder %v1973_v4, 1  ;;  %vm1998_vm12 = vcmp.eq.s32.totalorder %v1982_v19, 1 }
0x1845   :  { %v1801_v40 = vadd.f32 %v1783_v36, %v7319_v35  ;;  %v1847_v41 = vsel %vm1815_vm14, %v1799_v18, %v1831_v29  ;;  %v1832_v43 = vmul.f32 0.2, %v1800_v31  ;;  %vm1816_vm13 = vcmp.gt.f32.partialorder %v1800_v31, 0.0 }
0x1846   :  { %1944 = vmatprep.mubr.f32.mxu1 %v1847_v41 }
0x1847   :  { %v1833_v47 = vmul.f32 0.2, %v1801_v40  ;;  %1945 = vmatmul.mubr.f32.gmra.mxu1 %v1846_v46  ;;  %vm1817_vm0 = vcmp.gt.f32.partialorder %v1801_v40, 0.0  ;;  %v1848_v52 = vsel %vm1816_vm13, %v1800_v31, %v1832_v43  ;;  %v1985_v7 = vpop.permute.xlu1 %1984  ;;  %v1988_v36 = vpop.permute.xlu0 %1987  ;;  %vm1996_vm13 = vcmp.eq.s32.totalorder %v1976_v62, 1 }
0x1848   :  { %vm1999_vm1 = vcmp.eq.s32.totalorder %v1985_v7, 1  ;;  %vm2000_vm14 = vcmp.eq.s32.totalorder %v1988_v36, 1 }
0x1849   :  { %v1849_v50 = vsel %vm1817_vm0, %v1801_v40, %v1833_v47  ;;  %vm1997_vm0 = vcmp.eq.s32.totalorder %v1979_v8, 1 }
0x184a   :  { %1949 = vmatprep.mubr.f32.mxu1 %v1849_v50 }
0x184b   :  { %1950 = vmatmul.mubr.f32.gmra.mxu1 %v1848_v52  ;;  %v1991_v47 = vpop.permute.xlu1 %1990 }
0x184c   :  { %2479 = vmatprep.mubr.f32.mxu1 %v8090_v9  ;;  %vm2001_vm9 = vcmp.eq.s32.totalorder %v1991_v47, 1 }
0x18ef   :  { %v5789_v27 = vpop.f32.mrf.mxu1 }
0x18f1   :  { %v5790_v12 = vpop.f32.mrf.mxu1 }
0x18f2   :  { %v5791_v43 = vadd.f32 %v5790_v12, %v5789_v27  ;;  %v1994_v27 = vpop.permute.xlu0 %1993 }
0x18f3   :  { %v5792_v56 = vpop.f32.mrf.mxu1  ;;  %vm2002_vm8 = vcmp.eq.s32.totalorder %v1994_v27, 1 }
0x18f5   :  { %v5793_v60 = vpop.f32.mrf.mxu1 }
0x18f6   :  { %v5794_v40 = vadd.f32 %v5793_v60, %v5792_v56 }
0x18f7   :  { %v5795_v61 = vpop.f32.mrf.mxu1 }
0x18f9   :  { %v5796_v0 = vpop.f32.mrf.mxu1 }
0x18fa   :  { %v5797_v50 = vadd.f32 %v5796_v0, %v5795_v61 }
0x18fb   :  { %v5798_v3 = vpop.f32.mrf.mxu1 }
0x18fc   :  { %v2005_v12 = vsel %vm1997_vm0, %v5797_v50, -1e+30 }
0x18fd   :  { %v5799_v6 = vpop.f32.mrf.mxu1  ;;  %v2013_v19 = vsel %vm1511_vm5, %v2005_v12, -inf }
0x18fe   :  { %v5800_v52 = vadd.f32 %v5799_v6, %v5798_v3 }
0x18ff   :  { %v5801_v10 = vpop.f32.mrf.mxu1 }
0x1901   :  { %v5802_v18 = vpop.f32.mrf.mxu1 }
0x1902   :  { %v5803_v41 = vadd.f32 %v5802_v18, %v5801_v10  ;;  %v2003_v10 = vsel %vm1995_vm15, %v5791_v43, -1e+30  ;;  %v2006_v18 = vsel %vm1998_vm12, %v5800_v52, -1e+30 }
0x1903   :  { %v5804_v11 = vpop.f32.mrf.mxu1  ;;  %v2014_v7 = vsel %vm1511_vm5, %v2006_v18, -inf }
0x1905   :  { %v5805_v24 = vpop.f32.mrf.mxu1 }
0x1906   :  { %v5806_v29 = vadd.f32 %v5805_v24, %v5804_v11  ;;  %v7323_v11 = vsel %vm1996_vm13, %v5794_v40, -1e+30  ;;  %v2007_v24 = vsel %vm1999_vm1, %v5803_v41, -1e+30 }
0x1907   :  { %v5807_v31 = vpop.f32.mrf.mxu1  ;;  %v2012_v0 = vsel %vm1511_vm5, %v7323_v11, -inf  ;;  %v2015_v3 = vsel %vm1511_vm5, %v2007_v24, -inf }
0x1908   :  { %v2008_v20 = vsel %vm2000_vm14, %v5806_v29, -1e+30 }
0x1909   :  { %v5808_v46 = vpop.f32.mrf.mxu1  ;;  %v2017_v60 = vsel %vm1511_vm5, %v2008_v20, -inf }
0x190a   :  { %v5809_v9 = vadd.f32 %v5808_v46, %v5807_v31  ;;  %v2018_v6 = vmax.f32 %v2012_v0, %v2017_v60  ;;  %v8110_v46 = vmov 0.0  }
0x190b   :  { %v5810_v13 = vpop.f32.mrf.mxu1 }
0x190c   :  { %v2009_v56 = vsel %vm2001_vm9, %v5809_v9, -1e+30  ;;  %v2011_v9 = vsel %vm1511_vm5, %v2003_v10, -inf }
0x190d   :  { %v5811_v62 = vpop.f32.mrf.mxu1  ;;  %v2019_v4 = vsel %vm1511_vm5, %v2009_v56, -inf  ;;  %v2016_v31 = vmax.f32 %v2011_v9, %v2015_v3 }
0x190e   :  { %v5812_v61 = vadd.f32 %v5811_v62, %v5810_v13  ;;  %v2020_v13 = vmax.f32 %v2013_v19, %v2019_v4 }
0x190f   :  { %v2023_v40 = vmax.f32 %v2016_v31, %v2018_v6 }
0x1910   :  { %v2010_v8 = vsel %vm2002_vm8, %v5812_v61, -1e+30 }
0x1911   :  { %v2021_v29 = vsel %vm1511_vm5, %v2010_v8, -inf }
0x1912   :  { %v2022_v36 = vmax.f32 %v2014_v7, %v2021_v29 }
0x1914   :  { %v2024_v41 = vmax.f32 %v2020_v13, %v2022_v36 }
0x1916   :  { %v2025_v43 = vmax.f32 %v2023_v40, %v2024_v41 }
0x1918   :  { %6116 = vmatprep.subr.mxu0 %v2025_v43 }
0x1919   :  { %6117 = vmatpush3.msra.mxu0 %v2025_v43 }
0x191a   :  { %6119 = vmatmul.mubr.msk.f32.vlgmr.msra.gmra.mxu0 %vm1511_vm5, %v7127_v15  ;;  %6130 = vmatprep.subr.mxu0 %v8110_v46 }
0x191b   :  { %6121 = vmatprep.mubr.msk.f32.mxu0 %vm1511_vm5, %v7138_v45 }
0x191e   :  { %6122 = vmatmul.mubr.msk.f32.gmra.mxu0 %vm1511_vm5, %v7149_v49 }
0x191f   :  { %6124 = vmatprep.mubr.msk.f32.mxu0 %vm1511_vm5, %v7160_v53 }
0x1922   :  { %6125 = vmatmul.mubr.msk.f32.gmra.mxu0 %vm1511_vm5, %v7171_v55 }
0x1923   :  { %6127 = vmatprep.mubr.msk.f32.mxu0 %vm1511_vm5, %v7182_v59 }
0x1926   :  { %6128 = vmatmul.mubr.msk.f32.gmra.mxu0 %vm1511_vm5, %v7193_v63 }
0x1927   :  { %6146 = vmatprep.mubr.msk.f32.mxu0 %vm6718_vm3, %v8110_v46 }
0x19da   :  { %v6120_v47 = vpop.f32.mrf.mxu0 }
0x19db   :  { %v2132_v40 = vsub.f32 %v7323_v11, %v6120_v47 }
0x19dc   :  { %v2092_v50 = vpop.f32.mrf.mxu0 }
0x19dd   :  { %v2131_v43 = vsub.f32 %v2003_v10, %v2092_v50 }
0x19de   :  { %v6123_v52 = vpop.f32.mrf.mxu0 }
0x19df   :  { %v2134_v19 = vsub.f32 %v2006_v18, %v6123_v52  ;;  %v2188_v18 = vpop.permute.xlu0 %2187 }
0x19e0   :  { %v2102_v60 = vpop.f32.mrf.mxu0 }
0x19e1   :  { %v2133_v31 = vsub.f32 %v2005_v12, %v2102_v60  ;;  %v2145_v41 = vmul.f32 1.442695, %v2134_v19 }
0x19e2   :  { %v6126_v62 = vpop.f32.mrf.mxu0 }
0x19e3   :  { %v2136_v27 = vsub.f32 %v2008_v20, %v6126_v62  ;;  %v2143_v20 = vmul.f32 1.442695, %v2133_v31  ;;  %v2141_v62 = vmul.f32 1.442695, %v2132_v40  ;;  %v2178_v11 = vpop.permute.xlu0 %2177 }
0x19e4   :  { %v2112_v61 = vpop.f32.mrf.mxu0 }
0x19e5   :  { %v2135_v3 = vsub.f32 %v2007_v24, %v2112_v61  ;;  %v2149_v6 = vmul.f32 1.442695, %v2136_v27  ;;  %v2193_v24 = vpop.permute.xlu1 %2192 }
0x19e6   :  { %v6129_v0 = vpop.f32.mrf.mxu0 }
0x19e7   :  { %v2138_v4 = vsub.f32 %v2010_v8, %v6129_v0  ;;  %v2147_v13 = vmul.f32 1.442695, %v2135_v3  ;;  %v2139_v8 = vmul.f32 1.442695, %v2131_v43 }
0x19e8   :  { %v2122_v9 = vpop.f32.mrf.mxu0 }
0x19e9   :  { %v2153_v7 = vmul.f32 1.442695, %v2138_v4  ;;  %v2137_v29 = vsub.f32 %v2009_v56, %v2122_v9  ;;  %v2183_v12 = vpop.permute.xlu1 %2182 }
0x19eb   :  { %6487 = vpow2.f32 %v2153_v7  ;;  %v2151_v36 = vmul.f32 1.442695, %v2137_v29 }
0x19ec   :  { %6489 = vpow2.f32 %v2149_v6  ;;  %v2168_v6 = vpop.permute.xlu0 %2167 }
0x19ed   :  { %6491 = vpow2.f32 %v2151_v36  ;;  %v2173_v0 = vpop.permute.xlu1 %2172 }
0x19ee   :  { %6493 = vpow2.f32 %v2147_v13 }
0x19ef   :  { %6495 = vpow2.f32 %v2145_v41  ;;  %v7368_v41 = vld [vmem:[%s6783_s14] sm:$0xff]  ;;  %s8112_s14 = sld [smem:[#allocation13_spill]] }
0x19f0   :  { %6497 = vpow2.f32 %v2143_v20  ;;  %v2158_v36 = vpop.permute.xlu0 %2157 }
0x19f1   :  { %6499 = vpow2.f32 %v2141_v62  ;;  %v2163_v31 = vpop.permute.xlu1 %2162 }
0x19f2   :  { %6501 = vpow2.f32 %v2139_v8 }
0x19f8   :  { %v6488_v56 = vpop.eup %6487 }
0x19f9   :  { %v6490_v52 = vpop.eup %6489  ;;  %v7352_v60 = vmul.f32 %v6488_v56, %v2193_v24 }
0x19fa   :  { %v6492_v27 = vpop.eup %6491  ;;  %v7359_v50 = vmul.f32 %v6490_v52, %v2183_v12 }
0x19fb   :  { %6131 = vmatpush3.msra.mxu0 %v7352_v60  ;;  %v7355_v10 = vmul.f32 %v6492_v27, %v2188_v18  ;;  %v6494_v47 = vpop.eup %6493 }
0x19fc   :  { %6132 = vmatprep.subr.mxu0 %v8110_v46  ;;  %v6496_v61 = vpop.eup %6495  ;;  %v2199_v3 = vmul.f32 %v6494_v47, %v2178_v11 }
0x19fd   :  { %6133 = vmatpush3.msra.mxu0 %v7355_v10  ;;  %v6498_v4 = vpop.eup %6497  ;;  %v2198_v9 = vmul.f32 %v6496_v61, %v2173_v0 }
0x19fe   :  { %6134 = vmatprep.subr.mxu0 %v8110_v46  ;;  %v6500_v19 = vpop.eup %6499  ;;  %v2197_v7 = vmul.f32 %v6498_v4, %v2168_v6  ;;  %v1340_v4 = vld [vmem:[%s6823_s4 + $0xf0] sm:$0xff] }
0x19ff   :  { %6135 = vmatpush3.msra.mxu0 %v7359_v50  ;;  %v6502_v29 = vpop.eup %6501  ;;  %v2196_v13 = vmul.f32 %v6500_v19, %v2163_v31  ;;  %v1324_v6 = vld [vmem:[%s6823_s4 + $0x70] sm:$0xff]  ;;  %v1338_v19 = vld [vmem:[%s6823_s4 + $0xe0] sm:$0xff] }
0x1a00   :  { %6136 = vmatprep.subr.mxu0 %v8110_v46  ;;  %v2195_v40 = vmul.f32 %v6502_v29, %v2158_v36  ;;  %v1321_v29 = vld [vmem:[%s6823_s4 + $0x58] sm:$0xff]  ;;  %v1336_v31 = vld [vmem:[%s6823_s4 + $0xd0] sm:$0xff]  ;;  %v1335_v36 = vld [vmem:[%s6823_s4 + $0xc8] sm:$0xff] }
0x1a01   :  { %6137 = vmatpush3.msra.mxu0 %v2199_v3 }
0x1a02   :  { %6138 = vmatprep.subr.mxu0 %v8110_v46 }
0x1a03   :  { %6139 = vmatpush3.msra.mxu0 %v2198_v9 }
0x1a04   :  { %6140 = vmatprep.subr.mxu0 %v8110_v46 }
0x1a05   :  { %6141 = vmatpush3.msra.mxu0 %v2197_v7 }
0x1a06   :  { %6142 = vmatprep.subr.mxu0 %v8110_v46 }
0x1a07   :  { %6143 = vmatpush3.msra.mxu0 %v2196_v13 }
0x1a08   :  { %6144 = vmatprep.subr.mxu0 %v8110_v46 }
0x1a09   :  { %6145 = vmatpush3.msra.mxu0 %v2195_v40 }
0x1a0a   :  { %6147 = vmatmul.mubr.msk.f32.vlgmr.msra.gmra.mxu0 %vm285_vm2, %v7368_v41 }
0x1a0b   :  { %6151 = vmatprep.mubr.msk.f32.mxu0 %vm1511_vm5, %v7116_v38  ;;  %v1309_v38 = vld [vmem:[%s6818_s27 + $0x8] sm:$0xff] }
0x1a0c   :  { %2445 = vmatprep.subr.mxu1 %v1309_v38  ;;  %v1332_v38 = vld [vmem:[%s6823_s4 + $0xb0] sm:$0xff] }
0x1aca   :  { %v2272_v43 = vpop.f32.mrf.mxu0 }
0x1acb   :  { %v2276_v20 = vmax.f32 %v2272_v43, 1e-20  ;;  %v1334_v43 = vld [vmem:[%s6823_s4 + $0xc0] sm:$0xff] }
0x1acc   :  { %v6148_v62 = vpop.f32.mrf.mxu0 }
0x1acd   :  { %6503 = vrcp.f32 %v2276_v20  ;;  %v1318_v20 = vld [vmem:[%s6823_s4 + $0x40] sm:$0xff]  ;;  %v1333_v62 = vld [vmem:[%s6823_s4 + $0xb8] sm:$0xff] }
0x1ada   :  { %v6504_v24 = vpop.eup %6503 }
0x1adb   :  { %6149 = vmatprep.subr.mxu0 %v6504_v24 }
0x1adc   :  { %6150 = vmatpush3.msra.mxu0 %v6504_v24  ;;  %v1317_v24 = vld [vmem:[%s6823_s4 + $0x38] sm:$0xff] }
0x1add   :  { %6152 = vmatmul.mubr.msk.f32.vlgmr.msra.gmra.mxu0 %vm1511_vm5, %v7127_v15  ;;  %v1308_v15 = vld [vmem:[%s6818_s27] sm:$0xff]  ;;  %s8125_s27 = sld [smem:[#allocation12_spill]] }
0x1ade   :  { %6154 = vmatprep.mubr.msk.f32.mxu0 %vm1511_vm5, %v7138_v45  ;;  %2446 = vmatpush1.msra.mxu1 %v1308_v15  ;;  %v1316_v15 = vld [vmem:[%s6823_s4 + $0x30] sm:$0xff] }
0x1ae1   :  { %6155 = vmatmul.mubr.msk.f32.gmra.mxu0 %vm1511_vm5, %v7149_v49 }
0x1ae2   :  { %6157 = vmatprep.mubr.msk.f32.mxu0 %vm1511_vm5, %v7160_v53 }
0x1ae5   :  { %6158 = vmatmul.mubr.msk.f32.gmra.mxu0 %vm1511_vm5, %v7171_v55 }
0x1ae6   :  { %6160 = vmatprep.mubr.msk.f32.mxu0 %vm1511_vm5, %v7182_v59 }
0x1ae9   :  { %6161 = vmatmul.mubr.msk.f32.gmra.mxu0 %vm1511_vm5, %v7193_v63 }
0x1aea   :  { %2608 = vmatprep.mubr.f32.mxu0 %v8110_v46 }
0x1b9d   :  { %v6153_v45 = vpop.f32.mrf.mxu0 }
0x1b9e   :  { %v2384_v53 = vmul.f32 %v6153_v45, %v2196_v13  ;;  %v1320_v13 = vld [vmem:[%s6823_s4 + $0x50] sm:$0xff]  ;;  %v1331_v45 = vld [vmem:[%s6823_s4 + $0xa8] sm:$0xff] }
0x1b9f   :  { %v2344_v49 = vpop.f32.mrf.mxu0 }
0x1ba0   :  { %v2383_v8 = vmul.f32 %v2344_v49, %v2195_v40  ;;  %v1319_v40 = vld [vmem:[%s6823_s4 + $0x48] sm:$0xff] }
0x1ba1   :  { %v6156_v18 = vpop.f32.mrf.mxu0  ;;  %v1315_v49 = vld [vmem:[%s6823_s4 + $0x28] sm:$0xff] }
0x1ba2   :  { %5600 = vmatmul.mubr.msk.f32.vlgmr.msra.gmra.mxu1 %vm1511_vm5, %v2383_v8  ;;  %v2386_v56 = vmul.f32 %v6156_v18, %v2198_v9  ;;  %v1323_v9 = vld [vmem:[%s6823_s4 + $0x68] sm:$0xff]  ;;  %v1330_v8 = vld [vmem:[%s6823_s4 + $0xa0] sm:$0xff] }
0x1ba3   :  { %2485 = vmatprep.mubr.f32.mxu1 %v8110_v46  ;;  %v2354_v55 = vpop.f32.mrf.mxu0  ;;  %v1314_v18 = vld [vmem:[%s6823_s4 + $0x20] sm:$0xff] }
0x1ba4   :  { %v2385_v59 = vmul.f32 %v2354_v55, %v2197_v7  ;;  %v1337_v7 = vld [vmem:[%s6823_s4 + $0xd8] sm:$0xff] }
0x1ba5   :  { %v6159_v63 = vpop.f32.mrf.mxu0  ;;  %v1313_v55 = vld [vmem:[%s6823_s4 + $0x18] sm:$0xff] }
0x1ba6   :  { %5601 = vmatmul.mubr.msk.f32.gmra.mxu1 %vm1511_vm5, %v2384_v53  ;;  %v2388_v11 = vmul.f32 %v6159_v63, %v7359_v50  ;;  %v1341_v50 = vld [vmem:[%s6823_s4 + $0xf8] sm:$0xff]  ;;  %v1312_v63 = vld [vmem:[%s6823_s4 + $0x10] sm:$0xff] }
0x1ba7   :  { %2491 = vmatprep.mubr.f32.mxu1 %v8110_v46  ;;  %v2364_v12 = vpop.f32.mrf.mxu0  ;;  %5840 = vmatprep.subr.mxu1 %v1341_v50  ;;  %v1329_v53 = vld [vmem:[%s6823_s4 + $0x98] sm:$0xff] }
0x1ba8   :  { %v2387_v52 = vmul.f32 %v2364_v12, %v2199_v3  ;;  %v1325_v3 = vld [vmem:[%s6823_s4 + $0x78] sm:$0xff] }
0x1ba9   :  { %v6162_v27 = vpop.f32.mrf.mxu0  ;;  %5841 = vmatpush3.msra.mxu1 %v1325_v3 }
0x1baa   :  { %5602 = vmatmul.mubr.msk.f32.gmra.mxu1 %vm1511_vm5, %v2385_v59  ;;  %v2390_v0 = vmul.f32 %v6162_v27, %v7352_v60  ;;  %5842 = vmatprep.subr.mxu1 %v1340_v4  ;;  %v1322_v60 = vld [vmem:[%s6823_s4 + $0x60] sm:$0xff]  ;;  %v1328_v59 = vld [vmem:[%s6823_s4 + $0x90] sm:$0xff] }
0x1bab   :  { %2497 = vmatprep.mubr.f32.mxu1 %v8110_v46  ;;  %v2374_v47 = vpop.f32.mrf.mxu0  ;;  %5843 = vmatpush3.msra.mxu1 %v1324_v6 }
0x1bac   :  { %v2389_v61 = vmul.f32 %v2374_v47, %v7355_v10  ;;  %v1339_v10 = vld [vmem:[%s6823_s4 + $0xe8] sm:$0xff] }
0x1bad   :  { %5844 = vmatprep.subr.mxu1 %v1339_v10 }
0x1bae   :  { %5603 = vmatmul.mubr.msk.f32.gmra.mxu1 %vm1511_vm5, %v2386_v56 }
0x1baf   :  { %2503 = vmatprep.mubr.f32.mxu1 %v8110_v46  ;;  %5845 = vmatpush3.msra.mxu1 %v1323_v9 }
0x1bb0   :  { %5846 = vmatprep.subr.mxu1 %v1338_v19 }
0x1bb1   :  { %5847 = vmatpush3.msra.mxu1 %v1322_v60 }
0x1bb2   :  { %5604 = vmatmul.mubr.msk.f32.gmra.mxu1 %vm1511_vm5, %v2387_v52  ;;  %5848 = vmatprep.subr.mxu1 %v1337_v7 }
0x1bb3   :  { %2509 = vmatprep.mubr.f32.mxu1 %v8110_v46  ;;  %5849 = vmatpush3.msra.mxu1 %v1321_v29 }
0x1bb4   :  { %5850 = vmatprep.subr.mxu1 %v1336_v31 }
0x1bb5   :  { %5851 = vmatpush3.msra.mxu1 %v1320_v13 }
0x1bb6   :  { %5605 = vmatmul.mubr.msk.f32.gmra.mxu1 %vm1511_vm5, %v2388_v11  ;;  %5852 = vmatprep.subr.mxu1 %v1335_v36 }
0x1bb7   :  { %2515 = vmatprep.mubr.f32.mxu1 %v8110_v46  ;;  %5853 = vmatpush3.msra.mxu1 %v1319_v40 }
0x1bb8   :  { %5854 = vmatprep.subr.mxu1 %v1334_v43 }
0x1bb9   :  { %5855 = vmatpush3.msra.mxu1 %v1318_v20 }
0x1bba   :  { %5606 = vmatmul.mubr.msk.f32.gmra.mxu1 %vm1511_vm5, %v2389_v61  ;;  %5856 = vmatprep.subr.mxu1 %v1333_v62  ;;  %v2692_v62 = vld [vmem:[%s8111_s21 + $0x8] sm:$0xff] }
0x1bbb   :  { %2521 = vmatprep.mubr.f32.mxu1 %v8110_v46  ;;  %5857 = vmatpush3.msra.mxu1 %v1317_v24  ;;  %v2691_v24 = vld [vmem:[%s8111_s21] sm:$0xff] }
0x1bbc   :  { %5858 = vmatprep.subr.mxu1 %v1332_v38 }
0x1bbd   :  { %5859 = vmatpush3.msra.mxu1 %v1316_v15  ;;  %v5609_v15 = vld [vmem:[%s8112_s14] ss:$0 sm:$0xff] }
0x1bbe   :  { %5607 = vmatmul.mubr.msk.f32.gmra.mxu1 %vm1511_vm5, %v2390_v0  ;;  %5860 = vmatprep.subr.mxu1 %v1331_v45 }
0x1bbf   :  { %5861 = vmatpush3.msra.mxu1 %v1315_v49 }
0x1bc0   :  { %5862 = vmatprep.subr.mxu1 %v1330_v8 }
0x1bc1   :  { %5863 = vmatpush3.msra.mxu1 %v1314_v18  ;;  %v6619_v18 = vld [vmem:[%s6773_s3] sm:$0xff] }
0x1bc2   :  { %5864 = vmatprep.subr.mxu1 %v1329_v53  ;;  %v5610_v53 = vld [vmem:[%s8113_s19] ss:$0 sm:$0xff] }
0x1bc3   :  { %5865 = vmatpush3.msra.mxu1 %v1313_v55 }
0x1bc4   :  { %5866 = vmatprep.subr.mxu1 %v1328_v59 }
0x1bc5   :  { %5867 = vmatpush3.msra.mxu1 %v1312_v63 }
0x1c62   :  { %v2481_v56 = vpop.f32.mrf.mxu1 }
0x1c64   :  { %v2483_v12 = vpop.f32.mrf.mxu1 }
0x1c66   :  { %v2487_v52 = vpop.f32.mrf.mxu1 }
0x1c68   :  { %v2489_v27 = vpop.f32.mrf.mxu1 }
0x1c6a   :  { %v2493_v11 = vpop.f32.mrf.mxu1 }
0x1c6c   :  { %v2495_v47 = vpop.f32.mrf.mxu1 }
0x1c6e   :  { %v2499_v61 = vpop.f32.mrf.mxu1 }
0x1c70   :  { %v2501_v0 = vpop.f32.mrf.mxu1 }
0x1c72   :  { %v2505_v50 = vpop.f32.mrf.mxu1 }
0x1c73   :  { %v2536_v20 = vmul.f32 %v2505_v50, %v7298_v32  ;;  %v2530_v32 = vmul.f32 %v2487_v52, %v7280_v54  ;;  %v1327_v54 = vld [vmem:[%s6823_s4 + $0x88] sm:$0xff]  ;;  %v6622_v52 = vld [vmem:[%s6773_s3 + $0x18] sm:$0xff] }
0x1c74   :  { %v2507_v3 = vpop.f32.mrf.mxu1  ;;  %5868 = vmatprep.subr.mxu1 %v1327_v54 }
0x1c75   :  { %v2537_v43 = vmul.f32 %v2507_v3, %v7301_v42  ;;  %v2531_v42 = vmul.f32 %v2489_v27, %v7283_v57  ;;  %v1311_v57 = vld [vmem:[%s6823_s4 + $0x8] sm:$0xff]  ;;  %v6623_v27 = vld [vmem:[%s6773_s3 + $0x20] sm:$0xff] }
0x1c76   :  { %v2511_v4 = vpop.f32.mrf.mxu1  ;;  %5869 = vmatpush3.msra.mxu1 %v1311_v57  ;;  %v7496_v3 = vld [vmem:[%s6778_s8 + $0x8] sm:$0xff] }
0x1c77   :  { %v2538_v40 = vmul.f32 %v2511_v4, %v7304_v51  ;;  %v2694_v51 = vld [vmem:[%s8111_s21 + $0x18] sm:$0xff]  ;;  %v7501_v4 = vld [vmem:[%s6778_s8 + $0x10] sm:$0xff] }
0x1c78   :  { %v2513_v6 = vpop.f32.mrf.mxu1 }
0x1c79   :  { %v2539_v36 = vmul.f32 %v2513_v6, %v7307_v58  ;;  %v2532_v58 = vmul.f32 %v2493_v11, %v7286_v1  ;;  %v6624_v11 = vld [vmem:[%s6773_s3 + $0x28] sm:$0xff]  ;;  %v7506_v6 = vld [vmem:[%s6778_s8 + $0x18] sm:$0xff] }
0x1c7a   :  { %v2517_v10 = vpop.f32.mrf.mxu1 }
0x1c7b   :  { %v2540_v13 = vmul.f32 %v2517_v10, %v7310_v2  ;;  %v2533_v2 = vmul.f32 %v2495_v47, %v7289_v5  ;;  %v6625_v47 = vld [vmem:[%s6773_s3 + $0x30] sm:$0xff]  ;;  %v7511_v10 = vld [vmem:[%s6778_s8 + $0x20] sm:$0xff] }
0x1c7c   :  { %v2519_v9 = vpop.f32.mrf.mxu1 }
0x1c7d   :  { %v2541_v31 = vmul.f32 %v2519_v9, %v7313_v16  ;;  %v2534_v16 = vmul.f32 %v2499_v61, %v7292_v17  ;;  %v2528_v17 = vmul.f32 %v2481_v56, %v7274_v44  ;;  %v1310_v44 = vld [vmem:[%s6823_s4] sm:$0xff]  ;;  %v6620_v56 = vld [vmem:[%s6773_s3 + $0x8] sm:$0xff]  ;;  %v6626_v61 = vld [vmem:[%s6773_s3 + $0x38] sm:$0xff] }
0x1c7e   :  { %v2523_v19 = vpop.f32.mrf.mxu1  ;;  %v7516_v9 = vld [vmem:[%s6778_s8 + $0x28] sm:$0xff] }
0x1c7f   :  { %v2542_v29 = vmul.f32 %v2523_v19, %v7316_v22  ;;  %v2535_v22 = vmul.f32 %v2501_v0, %v7295_v23  ;;  %v2529_v23 = vmul.f32 %v2483_v12, %v7277_v48  ;;  %v1326_v48 = vld [vmem:[%s6823_s4 + $0x80] sm:$0xff]  ;;  %v6621_v12 = vld [vmem:[%s6773_s3 + $0x10] sm:$0xff]  ;;  %s8119_s3 = sld [smem:[#allocation17_spill]]  ;;  %s6723_s4 = smov 34  }
0x1c80   :  { %v2525_v60 = vpop.f32.mrf.mxu1  ;;  %5870 = vmatprep.subr.mxu1 %v1326_v48  ;;  %v7491_v0 = vld [vmem:[%s6778_s8] sm:$0xff]  ;;  %v7521_v19 = vld [vmem:[%s6778_s8 + $0x30] sm:$0xff] }
0x1c81   :  { %v2543_v7 = vmul.f32 %v2525_v60, %v7319_v35  ;;  %5871 = vmatpush3.msra.mxu1 %v1310_v44  ;;  %v2693_v35 = vld [vmem:[%s8111_s21 + $0x10] sm:$0xff]  ;;  %v7526_v60 = vld [vmem:[%s6778_s8 + $0x38] sm:$0xff]  ;;  %s8121_s8 = sld [smem:[#allocation9_spill]] }
0x1c83   :  { %2560 = vmatprep.subr.mxu0 %v2543_v7  ;;  %v2699_v7 = vld [vmem:[%s8114_s30 + $0x18] sm:$0xff] }
0x1c84   :  { %2561 = vmatpush1.msra.mxu0 %v2542_v29  ;;  %6202 = vmatprep.subr.mxu1 %v2699_v7  ;;  %v2698_v29 = vld [vmem:[%s8114_s30 + $0x10] sm:$0xff] }
0x1c85   :  { %2562 = vmatprep.subr.mxu0 %v2541_v31  ;;  %v2697_v31 = vld [vmem:[%s8114_s30 + $0x8] sm:$0xff] }
0x1c86   :  { %2563 = vmatpush1.msra.mxu0 %v2540_v13  ;;  %v2696_v13 = vld [vmem:[%s8114_s30] sm:$0xff] }
0x1c87   :  { %2564 = vmatprep.subr.mxu0 %v2539_v36 }
0x1c88   :  { %2565 = vmatpush1.msra.mxu0 %v2538_v40 }
0x1c89   :  { %2566 = vmatprep.subr.mxu0 %v2537_v43 }
0x1c8a   :  { %2567 = vmatpush1.msra.mxu0 %v2536_v20 }
0x1c8b   :  { %2568 = vmatprep.subr.mxu0 %v2535_v22 }
0x1c8c   :  { %2569 = vmatpush1.msra.mxu0 %v2534_v16 }
0x1c8d   :  { %2570 = vmatprep.subr.mxu0 %v2533_v2 }
0x1c8e   :  { %2571 = vmatpush1.msra.mxu0 %v2532_v58 }
0x1c8f   :  { %2572 = vmatprep.subr.mxu0 %v2531_v42 }
0x1c90   :  { %2573 = vmatpush1.msra.mxu0 %v2530_v32 }
0x1c91   :  { %2574 = vmatprep.subr.mxu0 %v2529_v23 }
0x1c92   :  { %2575 = vmatpush1.msra.mxu0 %v2528_v17 }
0x1c93   :  { %5608 = vmatmul.mubr.msk.f32.vlgmr.msra.gmra.mxu0 %vm285_vm2, %v7368_v41  ;;  %6163 = vmatprep.subr.mxu0 %v8110_v46 }
0x1c94   :  { %6171 = vmatprep.mubr.msk.f32.mxu0 %vm6718_vm3, %v8110_v46  ;;  %6164 = vmatpush3.msra.mxu0 %v2694_v51 }
0x1c95   :  { %6165 = vmatprep.subr.mxu0 %v8110_v46 }
0x1c96   :  { %6166 = vmatpush3.msra.mxu0 %v2693_v35 }
0x1c97   :  { %6167 = vmatprep.subr.mxu0 %v8110_v46 }
0x1c98   :  { %6168 = vmatpush3.msra.mxu0 %v2692_v62 }
0x1c99   :  { %6169 = vmatprep.subr.mxu0 %v8110_v46 }
0x1c9a   :  { %6170 = vmatpush3.msra.mxu0 %v2691_v24 }
0x1d53   :  { %v2610_v1 = vpop.f32.mrf.mxu0 }
0x1d55   :  { %v2612_v5 = vpop.f32.mrf.mxu0 }
0x1d56   :  { %2685 = vmatprep.mubr.f32.mxu1 %v2612_v5 }
0x1d57   :  { %2686 = vmatmul.mubr.f32.vlgmr.msra.gmra.mxu1 %v2610_v1 }
0x1d58   :  { %6203 = vmatpush3.msra.mxu1 %v2699_v7 }
0x1d59   :  { %6204 = vmatprep.subr.mxu1 %v2698_v29 }
0x1d5a   :  { %6205 = vmatpush3.msra.mxu1 %v2698_v29 }
0x1d5b   :  { %6206 = vmatprep.subr.mxu1 %v2697_v31 }
0x1d5c   :  { %6207 = vmatpush3.msra.mxu1 %v2697_v31 }
0x1d5d   :  { %6208 = vmatprep.subr.mxu1 %v2696_v13 }
0x1d5e   :  { %6209 = vmatpush3.msra.mxu1 %v2696_v13 }
0x1d5f   :  { %6236 = vmatprep.subr.mxu1 %v8110_v46 }
0x1e17   :  { %v5872_v38 = vpop.f32.mrf.mxu1 }
0x1e19   :  { %v5873_v45 = vpop.f32.mrf.mxu1 }
0x1e1a   :  { %v5874_v49 = vadd.f32 %v5873_v45, %v5872_v38 }
0x1e1c   :  { %v2688_v8 = vadd.f32 %v5874_v49, %v5609_v15 }
0x1e1e   :  { %6172 = vmatmul.mubr.msk.f32.vlgmr.msra.gmra.mxu0 %vm428_vm4, %v2688_v8 }
0x1e1f   :  { %6176 = vmatprep.mubr.msk.f32.mxu0 %vm1511_vm5, %v6619_v18 }
0x1ede   :  { %v2781_v55 = vpop.f32.mrf.mxu0 }
0x1edf   :  { %v2782_v59 = vadd.f32 %v5610_v53, %v2781_v55 }
0x1ee0   :  { %v6173_v63 = vpop.f32.mrf.mxu0 }
0x1ee1   :  { %2891 = vrot.lane.b32.xlu1 %v2782_v59, %s6722_s24  ;;  %6174 = vmatprep.subr.mxu0 %v2782_v59 }
0x1ee2   :  { %6175 = vmatpush3.msra.mxu0 %v2782_v59 }
0x1ee3   :  { %6177 = vmatmul.mubr.msk.f32.vlgmr.msra.gmra.mxu0 %vm1511_vm5, %v6620_v56 }
0x1ee4   :  { %6179 = vmatprep.mubr.msk.f32.mxu0 %vm1511_vm5, %v6621_v12 }
0x1ee7   :  { %6180 = vmatmul.mubr.msk.f32.gmra.mxu0 %vm1511_vm5, %v6622_v52 }
0x1ee8   :  { %6182 = vmatprep.mubr.msk.f32.mxu0 %vm1511_vm5, %v6623_v27 }
0x1eeb   :  { %6183 = vmatmul.mubr.msk.f32.gmra.mxu0 %vm1511_vm5, %v6624_v11 }
0x1eec   :  { %6185 = vmatprep.mubr.msk.f32.mxu0 %vm1511_vm5, %v6625_v47 }
0x1eef   :  { %6186 = vmatmul.mubr.msk.f32.gmra.mxu0 %vm1511_vm5, %v6626_v61 }
0x1ef0   :  { %6190 = vmatprep.mubr.msk.f32.mxu0 %vm1511_vm5, %v7491_v0 }
0x1f53   :  { %v2892_v50 = vpop.permute.xlu1 %2891 }
0x1f54   :  { %6188 = vmatprep.subr.mxu0 %v2892_v50 }
0x1f55   :  { %6189 = vmatpush3.msra.mxu0 %v2892_v50 }
0x1f56   :  { %6191 = vmatmul.mubr.msk.f32.vlgmr.msra.gmra.mxu0 %vm1511_vm5, %v7496_v3 }
0x1f57   :  { %6193 = vmatprep.mubr.msk.f32.mxu0 %vm1511_vm5, %v7501_v4 }
0x1f5a   :  { %6194 = vmatmul.mubr.msk.f32.gmra.mxu0 %vm1511_vm5, %v7506_v6 }
0x1f5b   :  { %6196 = vmatprep.mubr.msk.f32.mxu0 %vm1511_vm5, %v7511_v10 }
0x1f5e   :  { %6197 = vmatmul.mubr.msk.f32.gmra.mxu0 %vm1511_vm5, %v7516_v9 }
0x1f5f   :  { %6199 = vmatprep.mubr.msk.f32.mxu0 %vm1511_vm5, %v7521_v19 }
0x1f62   :  { %6200 = vmatmul.mubr.msk.f32.gmra.mxu0 %vm1511_vm5, %v7526_v60 }
0x1f63   :  { %6224 = vmatprep.mubr.msk.f32.mxu0 %vm1511_vm5, %v7491_v0 }
0x1fa3   :  { %v7537_v36 = vpop.f32.mrf.mxu0 }
0x1fa5   :  { %v7539_v40 = vpop.f32.mrf.mxu0 }
0x1fa7   :  { %v7541_v43 = vpop.f32.mrf.mxu0 }
0x1fa9   :  { %v7543_v20 = vpop.f32.mrf.mxu0 }
0x1fab   :  { %v7545_v22 = vpop.f32.mrf.mxu0 }
0x1fad   :  { %v7547_v16 = vpop.f32.mrf.mxu0 }
0x1faf   :  { %v7549_v2 = vpop.f32.mrf.mxu0 }
0x1fb1   :  { %v7551_v58 = vpop.f32.mrf.mxu0 }
0x2016   :  { %v6192_v42 = vpop.f32.mrf.mxu0 }
0x2017   :  { %v3000_v32 = vadd.f32 %v6192_v42, %v7537_v36 }
0x2018   :  { %v2960_v23 = vpop.f32.mrf.mxu0 }
0x2019   :  { %v2999_v17 = vadd.f32 %v2960_v23, %v7539_v40  ;;  %v3016_v54 = vmul.f32 0.2, %v3000_v32  ;;  %vm3008_vm8 = vcmp.gt.f32.partialorder %v3000_v32, 0.0 }
0x201a   :  { %v6195_v57 = vpop.f32.mrf.mxu0 }
0x201b   :  { %vm3007_vm9 = vcmp.gt.f32.partialorder %v2999_v17, 0.0  ;;  %v3015_v48 = vmul.f32 0.2, %v2999_v17  ;;  %v3002_v44 = vadd.f32 %v6195_v57, %v7541_v43  ;;  %v3024_v35 = vsel %vm3008_vm8, %v3000_v32, %v3016_v54 }
0x201c   :  { %v2970_v1 = vpop.f32.mrf.mxu0  ;;  %vm3168_vm8 = vcmask 7168  }
0x201d   :  { %v3001_v5 = vadd.f32 %v2970_v1, %v7543_v20  ;;  %v3023_v51 = vsel %vm3007_vm9, %v2999_v17, %v3015_v48  ;;  %v3018_v62 = vmul.f32 0.2, %v3002_v44  ;;  %vm3010_vm12 = vcmp.gt.f32.partialorder %v3002_v44, 0.0 }
0x201e   :  { %v6198_v24 = vpop.f32.mrf.mxu0  ;;  %6210 = vmatprep.mubr.msk.f32.mxu1 %vm428_vm4, %v3023_v51  ;;  %vm8115_vm9 = vcmp.gt.f32.partialorder %v7225_v28, 0.5 }
0x201f   :  { %vm3009_vm13 = vcmp.gt.f32.partialorder %v3001_v5, 0.0  ;;  %v3017_v38 = vmul.f32 0.2, %v3001_v5  ;;  %v3004_v15 = vadd.f32 %v6198_v24, %v7545_v22  ;;  %6211 = vmatmul.mubr.msk.f32.vlgmr.msra.gmra.mxu1 %vm428_vm4, %v3024_v35  ;;  %v3026_v55 = vsel %vm3010_vm12, %v3002_v44, %v3018_v62 }
0x2020   :  { %v2980_v45 = vpop.f32.mrf.mxu0  ;;  %vm8116_vm12 = vcmp.gt.f32.partialorder %v7231_v30, 0.5 }
0x2021   :  { %v3003_v49 = vadd.f32 %v2980_v45, %v7547_v16  ;;  %v3025_v8 = vsel %vm3009_vm13, %v3001_v5, %v3017_v38  ;;  %v3020_v18 = vmul.f32 0.2, %v3004_v15  ;;  %vm3012_vm1 = vcmp.gt.f32.partialorder %v3004_v15, 0.0 }
0x2022   :  { %v6201_v53 = vpop.f32.mrf.mxu0  ;;  %6213 = vmatprep.mubr.msk.f32.mxu1 %vm428_vm4, %v3025_v8  ;;  %vm3877_vm13 = vcmask 271616  }
0x2023   :  { %vm3011_vm14 = vcmp.gt.f32.partialorder %v3003_v49, 0.0  ;;  %v3019_v59 = vmul.f32 0.2, %v3003_v49  ;;  %v3006_v63 = vadd.f32 %v6201_v53, %v7549_v2  ;;  %6214 = vmatmul.mubr.msk.f32.gmra.mxu1 %vm428_vm4, %v3026_v55  ;;  %v3028_v11 = vsel %vm3012_vm1, %v3004_v15, %v3020_v18 }
0x2024   :  { %v2990_v56 = vpop.f32.mrf.mxu0  ;;  %vm3884_vm1 = vcmask 279824  }
0x2025   :  { %v3005_v12 = vadd.f32 %v2990_v56, %v7551_v58  ;;  %v3027_v52 = vsel %vm3011_vm14, %v3003_v49, %v3019_v59  ;;  %v3022_v27 = vmul.f32 0.2, %v3006_v63  ;;  %vm3014_vm15 = vcmp.gt.f32.partialorder %v3006_v63, 0.0 }
0x2026   :  { %6216 = vmatprep.mubr.msk.f32.mxu1 %vm428_vm4, %v3027_v52  ;;  %vm4171_vm14 = vcmask 9216  }
0x2027   :  { %vm3013_vm0 = vcmp.gt.f32.partialorder %v3005_v12, 0.0  ;;  %v3021_v47 = vmul.f32 0.2, %v3005_v12  ;;  %6217 = vmatmul.mubr.msk.f32.gmra.mxu1 %vm428_vm4, %v3028_v11  ;;  %v3030_v50 = vsel %vm3014_vm15, %v3006_v63, %v3022_v27 }
0x2029   :  { %v3029_v61 = vsel %vm3013_vm0, %v3005_v12, %v3021_v47 }
0x202a   :  { %6219 = vmatprep.mubr.msk.f32.mxu1 %vm428_vm4, %v3029_v61 }
0x202b   :  { %6220 = vmatmul.mubr.msk.f32.gmra.mxu1 %vm428_vm4, %v3030_v50 }
0x202c   :  { %6252 = vmatprep.mubr.msk.f32.mxu1 %vm6718_vm3, %v8110_v46 }
0x20df   :  { %v6212_v7 = vpop.f32.mrf.mxu1 }
0x20e0   :  { %v3161_v57 = vsel %vm1956_vm7, %v6212_v7, -1e+30  ;;  %vm8118_vm7 = vcmp.gt.f32.partialorder %v7254_v39, 0.5 }
0x20e1   :  { %v3121_v29 = vpop.f32.mrf.mxu1  ;;  %v3170_v28 = vsel %vm3168_vm8, %v3161_v57, -inf }
0x20e2   :  { %v3160_v23 = vsel %vm1955_vm6, %v3121_v29, -1e+30  ;;  %vm8117_vm6 = vcmp.gt.f32.partialorder %v7251_v37, 0.5 }
0x20e3   :  { %v6215_v31 = vpop.f32.mrf.mxu1  ;;  %v3169_v33 = vsel %vm3168_vm8, %v3160_v23, -inf }
0x20e4   :  { %v3163_v1 = vsel %vm8115_vm9, %v6215_v31, -1e+30 }
0x20e5   :  { %v3131_v13 = vpop.f32.mrf.mxu1  ;;  %v3172_v24 = vsel %vm3168_vm8, %v3163_v1, -inf }
0x20e6   :  { %v3162_v5 = vsel %vm8116_vm12, %v3131_v13, -1e+30 }
0x20e7   :  { %v6218_v42 = vpop.f32.mrf.mxu1  ;;  %v3171_v30 = vsel %vm3168_vm8, %v3162_v5, -inf }
0x20e8   :  { %v3165_v17 = vsel %vm1960_vm10, %v6218_v42, -1e+30  ;;  %vm3530_vm10 = vcmask 1040384  }
0x20e9   :  { %v3141_v32 = vpop.f32.mrf.mxu1  ;;  %v3175_v34 = vsel %vm3168_vm8, %v3165_v17, -inf }
0x20ea   :  { %v3164_v54 = vsel %vm1959_vm11, %v3141_v32, -1e+30  ;;  %v3176_v38 = vmax.f32 %v3170_v28, %v3175_v34  ;;  %vm3870_vm11 = vcmask 254976  }
0x20eb   :  { %v3173_v48 = vsel %vm3168_vm8, %v3164_v54, -inf  ;;  %v6221_v44 = vpop.f32.mrf.mxu1 }
0x20ec   :  { %v3167_v25 = vsel %vm8117_vm6, %v6221_v44, -1e+30  ;;  %v3174_v35 = vmax.f32 %v3169_v33, %v3173_v48  ;;  %v6635_v33 = vld [vmem:[%s6763_s25 + $0x38] sm:$0xff] }
0x20ed   :  { %v3179_v51 = vsel %vm3168_vm8, %v3167_v25, -inf  ;;  %v3151_v26 = vpop.f32.mrf.mxu1 }
0x20ee   :  { %v3166_v62 = vsel %vm8118_vm7, %v3151_v26, -1e+30  ;;  %v3180_v15 = vmax.f32 %v3172_v24, %v3179_v51  ;;  %v3181_v49 = vmax.f32 %v3174_v35, %v3176_v38  ;;  %v6637_v35 = vld [vmem:[%s6763_s25 + $0x28] sm:$0xff]  ;;  %v6638_v24 = vld [vmem:[%s6763_s25 + $0x20] sm:$0xff]  ;;  %v6639_v38 = vld [vmem:[%s6763_s25 + $0x18] sm:$0xff] }
0x20ef   :  { %v3177_v37 = vsel %vm3168_vm8, %v3166_v62, -inf }
0x20f0   :  { %v3178_v45 = vmax.f32 %v3171_v30, %v3177_v37 }
0x20f2   :  { %v3182_v8 = vmax.f32 %v3178_v45, %v3180_v15 }
0x20f4   :  { %v3183_v18 = vmax.f32 %v3181_v49, %v3182_v8  ;;  %v6640_v49 = vld [vmem:[%s6763_s25 + $0x10] sm:$0xff] }
0x20f6   :  { %6222 = vmatprep.subr.mxu0 %v3183_v18 }
0x20f7   :  { %6223 = vmatpush3.msra.mxu0 %v3183_v18 }
0x20f8   :  { %6225 = vmatmul.mubr.msk.f32.vlgmr.msra.gmra.mxu0 %vm1511_vm5, %v7496_v3 }
0x20f9   :  { %6227 = vmatprep.mubr.msk.f32.mxu0 %vm1511_vm5, %v7501_v4 }
0x20fc   :  { %6228 = vmatmul.mubr.msk.f32.gmra.mxu0 %vm1511_vm5, %v7506_v6 }
0x20fd   :  { %6230 = vmatprep.mubr.msk.f32.mxu0 %vm1511_vm5, %v7511_v10 }
0x2100   :  { %6231 = vmatmul.mubr.msk.f32.gmra.mxu0 %vm1511_vm5, %v7516_v9 }
0x2101   :  { %6233 = vmatprep.mubr.msk.f32.mxu0 %vm1511_vm5, %v7521_v19 }
0x2104   :  { %6234 = vmatmul.mubr.msk.f32.gmra.mxu0 %vm1511_vm5, %v7526_v60 }
0x21b8   :  { %v6226_v39 = vpop.f32.mrf.mxu0 }
0x21b9   :  { %v3290_v32 = vsub.f32 %v3161_v57, %v6226_v39  ;;  %v6641_v39 = vld [vmem:[%s6763_s25 + $0x8] sm:$0xff] }
0x21ba   :  { %v3250_v53 = vpop.f32.mrf.mxu0 }
0x21bc   :  { %v6229_v55 = vpop.f32.mrf.mxu0 }
0x21bd   :  { %v3292_v50 = vsub.f32 %v3163_v1, %v6229_v55  ;;  %v6642_v55 = vld [vmem:[%s6763_s25] sm:$0xff] }
0x21be   :  { %v3260_v59 = vpop.f32.mrf.mxu0 }
0x21bf   :  { %v3291_v31 = vsub.f32 %v3162_v5, %v3260_v59  ;;  %v3303_v48 = vmul.f32 1.442695, %v3292_v50 }
0x21c0   :  { %v6232_v63 = vpop.f32.mrf.mxu0 }
0x21c1   :  { %v3294_v56 = vsub.f32 %v3165_v17, %v6232_v63  ;;  %v3289_v17 = vsub.f32 %v3160_v23, %v3250_v53  ;;  %v3301_v44 = vmul.f32 1.442695, %v3291_v31  ;;  %v6636_v23 = vld [vmem:[%s6763_s25 + $0x30] sm:$0xff]  ;;  %s8120_s25 = sld [smem:[#allocation18_spill]] }
0x21c2   :  { %v3270_v12 = vpop.f32.mrf.mxu0 }
0x21c3   :  { %v3293_v27 = vsub.f32 %v3164_v54, %v3270_v12  ;;  %v3307_v47 = vmul.f32 1.442695, %v3294_v56  ;;  %v3299_v54 = vmul.f32 1.442695, %v3290_v32 }
0x21c4   :  { %v6235_v52 = vpop.f32.mrf.mxu0 }
0x21c5   :  { %v3296_v11 = vsub.f32 %v3167_v25, %v6235_v52  ;;  %v3305_v13 = vmul.f32 1.442695, %v3293_v27  ;;  %v3297_v25 = vmul.f32 1.442695, %v3289_v17 }
0x21c6   :  { %v3280_v61 = vpop.f32.mrf.mxu0 }
0x21c7   :  { %v3311_v7 = vmul.f32 1.442695, %v3296_v11  ;;  %v3295_v29 = vsub.f32 %v3166_v62, %v3280_v61  ;;  %v2703_v32 = vld [vmem:[%s8120_s25 + $0x10] sm:$0xff]  ;;  %v2701_v17 = vld [vmem:[%s8120_s25] sm:$0xff] }
0x21c9   :  { %6505 = vpow2.f32 %v3311_v7  ;;  %v3309_v42 = vmul.f32 1.442695, %v3295_v29 }
0x21ca   :  { %6507 = vpow2.f32 %v3307_v47 }
0x21cb   :  { %6509 = vpow2.f32 %v3309_v42  ;;  %v2704_v42 = vld [vmem:[%s8120_s25 + $0x18] sm:$0xff] }
0x21cc   :  { %6511 = vpow2.f32 %v3305_v13 }
0x21cd   :  { %6513 = vpow2.f32 %v3303_v48  ;;  %v2702_v48 = vld [vmem:[%s8120_s25 + $0x8] sm:$0xff] }
0x21ce   :  { %6515 = vpow2.f32 %v3301_v44 }
0x21cf   :  { %6517 = vpow2.f32 %v3299_v54 }
0x21d0   :  { %6519 = vpow2.f32 %v3297_v25 }
0x21d6   :  { %v6506_v1 = vpop.eup %6505 }
0x21d7   :  { %v6508_v5 = vpop.eup %6507  ;;  %v7610_v34 = vmul.f32 %v6635_v33, %v6506_v1 }
0x21d8   :  { %v6510_v57 = vpop.eup %6509  ;;  %v7619_v62 = vmul.f32 %v6637_v35, %v6508_v5 }
0x21d9   :  { %6237 = vmatpush3.msra.mxu1 %v7610_v34  ;;  %v7614_v51 = vmul.f32 %v6636_v23, %v6510_v57  ;;  %v6512_v26 = vpop.eup %6511 }
0x21da   :  { %6238 = vmatprep.subr.mxu1 %v8110_v46  ;;  %v6514_v28 = vpop.eup %6513  ;;  %v3317_v30 = vmul.f32 %v6638_v24, %v6512_v26  ;;  %v3981_v24 = vld [vmem:[%s6873_s17] sm:$0xff] }
0x21db   :  { %6239 = vmatpush3.msra.mxu1 %v7614_v51  ;;  %v6516_v37 = vpop.eup %6515  ;;  %v3316_v15 = vmul.f32 %v6639_v38, %v6514_v28  ;;  %v3982_v28 = vld [vmem:[%s6873_s17 + $0x8] sm:$0xff]  ;;  %v3879_v38 = vld [vmem:[%s8123_s12] sm:$0x3] }
0x21dc   :  { %6240 = vmatprep.subr.mxu1 %v8110_v46  ;;  %v6518_v45 = vpop.eup %6517  ;;  %v3315_v8 = vmul.f32 %v6640_v49, %v6516_v37  ;;  %v3872_v37 = vld [vmem:[%s8122_s6] sm:$0x3]  ;;  %3881 = vrot.lane.b32.xlu1 %v3879_v38, %s6723_s4 }
0x21dd   :  { %6241 = vmatpush3.msra.mxu1 %v7619_v62  ;;  %v6520_v18 = vpop.eup %6519  ;;  %v3314_v53 = vmul.f32 %v6641_v39, %v6518_v45  ;;  %3874 = vrot.lane.b32.xlu0 %v3872_v37, %s6720_s5  ;;  %v3987_v49 = vld [vmem:[%s6878_s13] sm:$0x3]  ;;  %s6724_s13 = smov 112  }
0x21de   :  { %6242 = vmatprep.subr.mxu1 %v8110_v46  ;;  %v3313_v59 = vmul.f32 %v6642_v55, %v6520_v18  ;;  %v3796_v18 = vld [vmem:[%s8125_s27] sm:$0x3]  ;;  %v3996_v55 = vrot.slane %v3987_v49, %v7104_v21 }
0x21df   :  { %6243 = vmatpush3.msra.mxu1 %v3317_v30 }
0x21e0   :  { %6244 = vmatprep.subr.mxu1 %v8110_v46 }
0x21e1   :  { %6245 = vmatpush3.msra.mxu1 %v3316_v15 }
0x21e2   :  { %6246 = vmatprep.subr.mxu1 %v8110_v46 }
0x21e3   :  { %6247 = vmatpush3.msra.mxu1 %v3315_v8 }
0x21e4   :  { %6248 = vmatprep.subr.mxu1 %v8110_v46 }
0x21e5   :  { %6249 = vmatpush3.msra.mxu1 %v3314_v53 }
0x21e6   :  { %6250 = vmatprep.subr.mxu1 %v8110_v46 }
0x21e7   :  { %6251 = vmatpush3.msra.mxu1 %v3313_v59 }
0x21e8   :  { %6253 = vmatmul.mubr.msk.f32.vlgmr.msra.gmra.mxu1 %vm285_vm2, %v7368_v41 }
0x21e9   :  { %6257 = vmatprep.mubr.msk.f32.mxu1 %vm1511_vm5, %v7491_v0  ;;  %v2700_v0 = vld [vmem:[%s8119_s3] sm:$0x1] }
0x21ea   :  { %6269 = vmatprep.subr.msk.mxu0 %vm3530_vm10, %v2700_v0 }
0x21eb   :  { %6270 = vmatpush3.msk.msra.mxu0 %vm3530_vm10, %v2700_v0 }
0x21ec   :  { %6302 = vmatprep.subr.mxu0 %v8110_v46 }
0x22a8   :  { %v3387_v63 = vpop.f32.mrf.mxu1 }
0x22a9   :  { %v3391_v56 = vmax.f32 %v3387_v63, 1e-20 }
0x22aa   :  { %v6254_v12 = vpop.f32.mrf.mxu1 }
0x22ab   :  { %6521 = vrcp.f32 %v3391_v56 }
0x22b8   :  { %v6522_v52 = vpop.eup %6521 }
0x22b9   :  { %6255 = vmatprep.subr.mxu1 %v6522_v52 }
0x22ba   :  { %6256 = vmatpush3.msra.mxu1 %v6522_v52 }
0x22bb   :  { %6258 = vmatmul.mubr.msk.f32.vlgmr.msra.gmra.mxu1 %vm1511_vm5, %v7496_v3  ;;  %6283 = vmatprep.subr.mxu1 %v8110_v46 }
0x22bc   :  { %6260 = vmatprep.mubr.msk.f32.mxu1 %vm1511_vm5, %v7501_v4 }
0x22bf   :  { %6261 = vmatmul.mubr.msk.f32.gmra.mxu1 %vm1511_vm5, %v7506_v6 }
0x22c0   :  { %6263 = vmatprep.mubr.msk.f32.mxu1 %vm1511_vm5, %v7511_v10 }
0x22c3   :  { %6264 = vmatmul.mubr.msk.f32.gmra.mxu1 %vm1511_vm5, %v7516_v9 }
0x22c4   :  { %6266 = vmatprep.mubr.msk.f32.mxu1 %vm1511_vm5, %v7521_v19 }
0x22c7   :  { %6267 = vmatmul.mubr.msk.f32.gmra.mxu1 %vm1511_vm5, %v7526_v60 }
0x22c8   :  { %6299 = vmatprep.mubr.msk.f32.mxu1 %vm6718_vm3, %v8110_v46 }
0x237b   :  { %v6259_v3 = vpop.f32.mrf.mxu1 }
0x237c   :  { %v3499_v10 = vmul.f32 %v6259_v3, %v3314_v53  ;;  %v3992_v53 = vrot.slane %v3987_v49, %v7108_v14 }
0x237d   :  { %v3459_v4 = vpop.f32.mrf.mxu1 }
0x237e   :  { %v3498_v6 = vmul.f32 %v3459_v4, %v3313_v59 }
0x237f   :  { %v6262_v9 = vpop.f32.mrf.mxu1 }
0x2380   :  { %6271 = vmatprep.mubr.msk.f32.mxu0 %vm3168_vm8, %v3498_v6  ;;  %v3501_v27 = vmul.f32 %v6262_v9, %v3316_v15  ;;  %v5663_v15 = vld [vmem:[%s8124_s20] ss:$0 sm:$0xff] }
0x2381   :  { %v3469_v19 = vpop.f32.mrf.mxu1  ;;  %6272 = vmatmul.mubr.msk.f32.vlgmr.msra.gmra.mxu0 %vm3168_vm8, %v3499_v10 }
0x2382   :  { %v3500_v60 = vmul.f32 %v3469_v19, %v3315_v8  ;;  %6303 = vmatpush3.msra.mxu0 %v2704_v42 }
0x2383   :  { %v6265_v11 = vpop.f32.mrf.mxu1  ;;  %6304 = vmatprep.subr.mxu0 %v8110_v46 }
0x2384   :  { %6274 = vmatprep.mubr.msk.f32.mxu0 %vm3168_vm8, %v3500_v60  ;;  %v3503_v50 = vmul.f32 %v6265_v11, %v7619_v62  ;;  %6305 = vmatpush3.msra.mxu0 %v2703_v32 }
0x2385   :  { %v3479_v47 = vpop.f32.mrf.mxu1  ;;  %6275 = vmatmul.mubr.msk.f32.gmra.mxu0 %vm3168_vm8, %v3501_v27  ;;  %6306 = vmatprep.subr.mxu0 %v8110_v46 }
0x2386   :  { %v3502_v61 = vmul.f32 %v3479_v47, %v3317_v30  ;;  %6307 = vmatpush3.msra.mxu0 %v2702_v48  ;;  %v3980_v30 = vld [vmem:[%s8121_s8] sm:$0x3]  ;;  %v3875_v47 = vpop.permute.xlu0 %3874 }
0x2387   :  { %v6268_v7 = vpop.f32.mrf.mxu1  ;;  %6308 = vmatprep.subr.mxu0 %v8110_v46 }
0x2388   :  { %6277 = vmatprep.mubr.msk.f32.mxu0 %vm3168_vm8, %v3502_v61  ;;  %v3505_v13 = vmul.f32 %v6268_v7, %v7610_v34  ;;  %6309 = vmatpush3.msra.mxu0 %v2701_v17 }
0x2389   :  { %v3489_v29 = vpop.f32.mrf.mxu1  ;;  %6278 = vmatmul.mubr.msk.f32.gmra.mxu0 %vm3168_vm8, %v3503_v50 }
0x238a   :  { %v3504_v31 = vmul.f32 %v3489_v29, %v7614_v51 }
0x238c   :  { %6280 = vmatprep.mubr.msk.f32.mxu0 %vm3168_vm8, %v3504_v31 }
0x238d   :  { %6281 = vmatmul.mubr.msk.f32.gmra.mxu0 %vm3168_vm8, %v3505_v13 }
0x238e   :  { %6310 = vmatprep.mubr.msk.f32.mxu0 %vm6718_vm3, %v8110_v46 }
0x2441   :  { %v6273_v44 = vpop.f32.mrf.mxu0 }
0x2443   :  { %v3600_v54 = vpop.f32.mrf.mxu0 }
0x2445   :  { %v6276_v25 = vpop.f32.mrf.mxu0 }
0x2446   :  { %v3642_v62 = vmul.f32 %v6276_v25, %v7541_v43  ;;  %v3639_v43 = vmul.f32 %v3600_v54, %v7539_v40  ;;  %v3983_v40 = vld [vmem:[%s6873_s17 + $0x10] sm:$0xff] }
0x2447   :  { %v3610_v1 = vpop.f32.mrf.mxu0 }
0x2449   :  { %v6279_v5 = vpop.f32.mrf.mxu0 }
0x244a   :  { %v3644_v26 = vmul.f32 %v6279_v5, %v7545_v22  ;;  %v3640_v22 = vmul.f32 %v6273_v44, %v7537_v36  ;;  %v3986_v36 = vld [vmem:[%s6873_s17 + $0x28] sm:$0xff]  ;;  %v3882_v44 = vpop.permute.xlu1 %3881 }
0x244b   :  { %v3620_v33 = vpop.f32.mrf.mxu0  ;;  %4029 = vmatprep.subr.mxu0 %v3986_v36 }
0x244c   :  { %v3643_v35 = vmul.f32 %v3620_v33, %v7547_v16 }
0x244d   :  { %v6282_v34 = vpop.f32.mrf.mxu0 }
0x244e   :  { %v3646_v57 = vmul.f32 %v6282_v34, %v7549_v2  ;;  %v3641_v2 = vmul.f32 %v3610_v1, %v7543_v20  ;;  %v3985_v20 = vld [vmem:[%s6873_s17 + $0x20] sm:$0xff] }
0x244f   :  { %v3630_v23 = vpop.f32.mrf.mxu0 }
0x2450   :  { %v3645_v51 = vmul.f32 %v3630_v23, %v7551_v58  ;;  %6284 = vmatpush3.msra.mxu1 %v3646_v57  ;;  %v3984_v58 = vld [vmem:[%s6873_s17 + $0x18] sm:$0xff]  ;;  %s8126_s17 = sld [smem:[#allocation20_spill]] }
0x2451   :  { %6285 = vmatprep.subr.mxu1 %v8110_v46 }
0x2452   :  { %6286 = vmatpush3.msra.mxu1 %v3645_v51 }
0x2453   :  { %6287 = vmatprep.subr.mxu1 %v8110_v46 }
0x2454   :  { %6288 = vmatpush3.msra.mxu1 %v3644_v26 }
0x2455   :  { %6289 = vmatprep.subr.mxu1 %v8110_v46 }
0x2456   :  { %6290 = vmatpush3.msra.mxu1 %v3643_v35  ;;  %v3893_v3 = vld [vmem:[%s8126_s17 + $0x38] sm:$0xff]  ;;  %v3892_v4 = vld [vmem:[%s8126_s17 + $0x30] sm:$0xff]  ;;  %v3891_v6 = vld [vmem:[%s8126_s17 + $0x28] sm:$0xff] }
0x2457   :  { %6291 = vmatprep.subr.mxu1 %v8110_v46  ;;  %v3890_v10 = vld [vmem:[%s8126_s17 + $0x20] sm:$0xff]  ;;  %v3889_v9 = vld [vmem:[%s8126_s17 + $0x18] sm:$0xff]  ;;  %v3888_v19 = vld [vmem:[%s8126_s17 + $0x10] sm:$0xff] }
0x2458   :  { %6292 = vmatpush3.msra.mxu1 %v3642_v62  ;;  %v3887_v60 = vld [vmem:[%s8126_s17 + $0x8] sm:$0xff]  ;;  %v3886_v11 = vld [vmem:[%s8126_s17] sm:$0xff] }
0x2459   :  { %6293 = vmatprep.subr.mxu1 %v8110_v46  ;;  %v3894_v35 = vld [vmem:[%s8127_s22] sm:$0x3] }
0x245a   :  { %6294 = vmatpush3.msra.mxu1 %v3641_v2  ;;  %v3899_v62 = vrot.slane %v3894_v35, %v7108_v14 }
0x245b   :  { %6295 = vmatprep.subr.mxu1 %v8110_v46 }
0x245c   :  { %6296 = vmatpush3.msra.mxu1 %v3640_v22 }
0x245d   :  { %6297 = vmatprep.subr.mxu1 %v8110_v46 }
0x245e   :  { %6298 = vmatpush3.msra.mxu1 %v3639_v43 }
0x245f   :  { %6300 = vmatmul.mubr.msk.f32.vlgmr.msra.gmra.mxu1 %vm285_vm2, %v7368_v41  ;;  %6313 = vmatprep.subr.mxu1 %v8110_v46  ;;  %vm3999_vm2 = vcmask 195584  }
0x2460   :  { %6315 = vmatprep.mubr.msk.f32.mxu1 %vm6718_vm3, %v8110_v46 }
0x251f   :  { %v3713_v16 = vpop.f32.mrf.mxu1 }
0x2520   :  { %6311 = vmatmul.mubr.msk.f32.vlgmr.msra.gmra.mxu0 %vm428_vm4, %v3713_v16 }
0x2521   :  { %4030 = vmatpush1.msra.mxu0 %v3985_v20  ;;  %4067 = vmatprep.mubr.f32.mxu0 %v8110_v46  ;;  %v6301_v41 = vpop.f32.mrf.mxu1  ;;  %v3903_v20 = vrot.slane %v3894_v35, %v7104_v21 }
0x2522   :  { %4031 = vmatprep.subr.mxu0 %v3984_v58 }
0x2523   :  { %4032 = vmatpush1.msra.mxu0 %v3983_v40 }
0x2524   :  { %4033 = vmatprep.subr.mxu0 %v3982_v28 }
0x2525   :  { %4034 = vmatpush1.msra.mxu0 %v3981_v24 }
0x2526   :  { %5667 = vmatmul.mubr.msk.f32.vlgmr.msra.gmra.mxu0 %vm3999_vm2, %v3980_v30  ;;  %6318 = vmatprep.subr.mxu0 %v8110_v46 }
0x2527   :  { %6320 = vmatprep.mubr.msk.f32.mxu0 %vm6718_vm3, %v8110_v46 }
0x25e0   :  { %v3792_v45 = vpop.f32.mrf.mxu0 }
0x25e1   :  { %v3793_v8 = vadd.f32 %v5663_v15, %v3792_v45 }
0x25e2   :  { %v6312_v39 = vpop.f32.mrf.mxu0 }
0x25e3   :  { %6314 = vmatpush3.msra.mxu1 %v3793_v8 }
0x25e4   :  { %6316 = vmatmul.mubr.msk.f32.vlgmr.msra.gmra.mxu1 %vm1511_vm5, %v3796_v18  ;;  %3933 = vmatprep.subr.mxu1 %v3893_v3  ;;  %vm4080_vm5 = vcmask 123904  }
0x25e5   :  { %3973 = vmatprep.mubr.f32.mxu1 %v8110_v46  ;;  %3934 = vmatpush1.msra.mxu1 %v3892_v4 }
0x25e6   :  { %v4069_v59 = vpop.f32.mrf.mxu0  ;;  %3935 = vmatprep.subr.mxu1 %v3891_v6 }
0x25e7   :  { %v7718_v63 = vadd.f32 %v4069_v59, %v3992_v53  ;;  %3936 = vmatpush1.msra.mxu1 %v3890_v10 }
0x25e8   :  { %v4071_v56 = vpop.f32.mrf.mxu0  ;;  %3937 = vmatprep.subr.mxu1 %v3889_v9 }
0x25e9   :  { %v4079_v12 = vmul.f32 %v7718_v63, %v7718_v63  ;;  %v7722_v52 = vadd.f32 %v4071_v56, %v3996_v55  ;;  %3938 = vmatpush1.msra.mxu1 %v3888_v19 }
0x25ea   :  { %3939 = vmatprep.subr.mxu1 %v3887_v60 }
0x25eb   :  { %4191 = vrot.lane.b32.xlu0 %v4079_v12, %s6724_s13  ;;  %4888 = vrot.lane.b32.xlu1 %v4079_v12, %s6725_s15  ;;  %v7728_v0 = vmul.f32 %v7722_v52, %v7722_v52  ;;  %v4081_v27 = vsel %vm4080_vm5, %v4079_v12, 0.0 }
0x25ec   :  { %3940 = vmatpush1.msra.mxu1 %v3886_v11 }
0x25ed   :  { %6323 = vmatprep.subr.mxu1 %v8110_v46 }
0x25ef   :  { %4308 = vrot.lane.b32.xlu0 %v4079_v12, %s6722_s24  ;;  %5346 = vrot.lane.b32.xlu1 %v7728_v0, %s6726_s16 }
0x25f3   :  { %4424 = vrot.lane.b32.xlu0 %v4079_v12, %s6726_s16 }
0x25f7   :  { %4540 = vrot.lane.b32.xlu0 %v4079_v12, %s6719_s0 }
0x25fb   :  { %4656 = vrot.lane.b32.xlu0 %v4079_v12, %s6727_s18 }
0x25ff   :  { %4772 = vrot.lane.b32.xlu0 %v4079_v12, %s6720_s5 }
0x261e   :  { %4082 = vadd.xlane.f32.xlu0 %v4081_v27 }
0x2634   :  { %5113 = vrot.lane.b32.xlu0 %v7728_v0, %s6724_s13 }
0x2638   :  { %5230 = vrot.lane.b32.xlu0 %v7728_v0, %s6722_s24 }
0x265d   :  { %v4192_v61 = vpop.permute.xlu0 %4191  ;;  %v4889_v54 = vpop.permute.xlu1 %4888 }
0x265e   :  { %v4194_v50 = vsel %vm4080_vm5, %v4192_v61, 0.0  ;;  %v4891_v28 = vsel %vm4080_vm5, %v4889_v54, 0.0 }
0x265f   :  { %4195 = vadd.xlane.f32.xlu1 %v4194_v50 }
0x2661   :  { %v4309_v7 = vpop.permute.xlu0 %4308  ;;  %v5347_v25 = vpop.permute.xlu1 %5346 }
0x2662   :  { %v4311_v29 = vsel %vm4080_vm5, %v4309_v7, 0.0  ;;  %v5349_v24 = vsel %vm4080_vm5, %v5347_v25, 0.0 }
0x2663   :  { %4312 = vadd.xlane.f32.xlu1 %v4311_v29 }
0x2665   :  { %v4425_v31 = vpop.permute.xlu0 %4424 }
0x2666   :  { %v4427_v13 = vsel %vm4080_vm5, %v4425_v31, 0.0 }
0x2667   :  { %4428 = vadd.xlane.f32.xlu1 %v4427_v13 }
0x2669   :  { %v4541_v42 = vpop.permute.xlu0 %4540 }
0x266a   :  { %v4543_v32 = vsel %vm4080_vm5, %v4541_v42, 0.0 }
0x266b   :  { %4544 = vadd.xlane.f32.xlu0 %v4543_v32 }
0x266d   :  { %v4657_v14 = vpop.permute.xlu0 %4656 }
0x266e   :  { %v4659_v36 = vsel %vm4080_vm5, %v4657_v14, 0.0 }
0x2671   :  { %v4773_v21 = vpop.permute.xlu0 %4772 }
0x2672   :  { %v4775_v38 = vsel %vm4080_vm5, %v4773_v21, 0.0 }
0x26a4   :  { %v3866_v48 = vpop.f32.mrf.mxu1 }
0x26a5   :  { %3871 = vst.msk [vmem:[#allocation3] sm:$0x3] %vm3870_vm11, %v3866_v48  ;;  %5666 = vmatmul.mubr.msk.f32.vlgmr.msra.gmra.mxu1 %vm428_vm4, %v3866_v48  ;;  %vm4094_vm4 = vcmask 130048  }
0x26a6   :  { %v6317_v17 = vpop.f32.mrf.mxu1  ;;  %6325 = vmatprep.mubr.msk.f32.mxu1 %vm6718_vm3, %v8110_v46  ;;  %3878 = vst.msk [vmem:[#allocation3] sm:$0x3] %vm3877_vm13, %v3875_v47 }
0x26a7   :  { %3885 = vst.msk [vmem:[#allocation3] sm:$0x3] %vm3884_vm1, %v3882_v44  ;;  %v4083_v30 = vpop.xlane.xlu0 %4082 }
0x26a8   :  { %v4084_v17 = vmax.f32 %v4083_v30, 1e-24 }
0x26ab   :  { %v5114_v37 = vpop.permute.xlu0 %5113 }
0x26ac   :  { %v5116_v15 = vsel %vm4080_vm5, %v5114_v37, 0.0 }
0x26af   :  { %v5231_v45 = vpop.permute.xlu0 %5230 }
0x26b0   :  { %v5233_v49 = vsel %vm4080_vm5, %v5231_v45, 0.0 }
0x26e8   :  { %v4196_v1 = vpop.xlane.xlu1 %4195 }
0x26e9   :  { %v4197_v5 = vmax.f32 %v4196_v1, 1e-24 }
0x26eb   :  { %6523 = vrsqrt.f32 %v4197_v5 }
0x26ec   :  { %v4313_v33 = vpop.xlane.xlu1 %4312 }
0x26ed   :  { %v4314_v34 = vmax.f32 %v4313_v33, 1e-24 }
0x26ef   :  { %6525 = vrsqrt.f32 %v4314_v34 }
0x26f0   :  { %v4429_v8 = vpop.xlane.xlu1 %4428 }
0x26f1   :  { %v4430_v32 = vmax.f32 %v4429_v8, 1e-24 }
0x26f4   :  { %v4545_v39 = vpop.xlane.xlu0 %4544 }
0x26f5   :  { %v4546_v60 = vmax.f32 %v4545_v39, 1e-24 }
0x26f7   :  { %6527 = vrsqrt.f32 %v4546_v60 }
0x26f8   :  { %v6524_v57 = vpop.eup %6523 }
0x26f9   :  { %v4199_v23 = vmul.f32 %v6524_v57, %v7718_v63 }
0x26fb   :  { %4211 = vrot.lane.b32.xlu1 %v4199_v23, %s6724_s13 }
0x26fc   :  { %v6526_v51 = vpop.eup %6525 }
0x26fd   :  { %v4316_v26 = vmul.f32 %v6526_v51, %v7718_v63 }
0x26ff   :  { %4327 = vrot.lane.b32.xlu1 %v4316_v26, %s6722_s24 }
0x2704   :  { %v6528_v50 = vpop.eup %6527 }
0x2705   :  { %v4548_v7 = vmul.f32 %v6528_v50, %v7718_v63 }
0x2765   :  { %v3975_v2 = vpop.f32.mrf.mxu1 }
0x2766   :  { %v7764_v22 = vadd.f32 %v3975_v2, %v3899_v62 }
0x2767   :  { %v3977_v16 = vpop.f32.mrf.mxu1 }
0x2768   :  { %v4087_v43 = vmul.f32 %v7764_v22, %v7764_v22  ;;  %v7777_v58 = vadd.f32 %v3977_v16, %v3903_v20 }
0x276a   :  { %4549 = vrot.lane.b32.xlu0 %v4087_v43, %s6719_s0  ;;  %4201 = vrot.lane.b32.xlu1 %v4087_v43, %s6724_s13  ;;  %v4088_v40 = vsel %vm4080_vm5, %v4087_v43, 0.0  ;;  %v7783_v41 = vmul.f32 %v7777_v58, %v7777_v58 }
0x276c   :  { %v5012_v14 = vsel %vm4080_vm5, %v7783_v41, 0.0 }
0x276d   :  { %v7795_v18 = vpop.permute.xlu1 %4211 }
0x276e   :  { %4665 = vrot.lane.b32.xlu0 %v4087_v43, %s6727_s18  ;;  %4317 = vrot.lane.b32.xlu1 %v4087_v43, %s6722_s24 }
0x2771   :  { %v7797_v53 = vpop.permute.xlu1 %4327 }
0x2772   :  { %4433 = vrot.lane.b32.xlu1 %v4087_v43, %s6726_s16 }
0x2776   :  { %4781 = vrot.lane.b32.xlu1 %v4087_v43, %s6720_s5 }
0x277a   :  { %4897 = vrot.lane.b32.xlu1 %v4087_v43, %s6725_s15 }
0x278d   :  { %4660 = vadd.xlane.f32.xlu0 %v4659_v36  ;;  %v5005_v36 = vsel %vm4080_vm5, %v7728_v0, 0.0 }
0x279e   :  { %4089 = vadd.xlane.f32.xlu1 %v4088_v40 }
0x27a2   :  { %4892 = vadd.xlane.f32.xlu1 %v4891_v28 }
0x27a3   :  { %5123 = vrot.lane.b32.xlu0 %v7783_v41, %s6724_s13 }
0x27a6   :  { %5350 = vadd.xlane.f32.xlu1 %v5349_v24 }
0x27b7   :  { %5239 = vrot.lane.b32.xlu1 %v7783_v41, %s6722_s24 }
0x27bb   :  { %5355 = vrot.lane.b32.xlu1 %v7783_v41, %s6726_s16 }
0x27c2   :  { %4776 = vadd.xlane.f32.xlu0 %v4775_v38 }
0x27c6   :  { %5117 = vadd.xlane.f32.xlu0 %v5116_v15 }
0x27ca   :  { %5234 = vadd.xlane.f32.xlu0 %v5233_v49 }
0x27dc   :  { %v4202_v55 = vpop.permute.xlu1 %4201  ;;  %v4550_v59 = vpop.permute.xlu0 %4549 }
0x27dd   :  { %v4204_v56 = vsel %vm4080_vm5, %v4202_v55, 0.0  ;;  %v4552_v12 = vsel %vm4080_vm5, %v4550_v59, 0.0 }
0x27de   :  { %4205 = vadd.xlane.f32.xlu0 %v4204_v56 }
0x27df   :  { %4553 = vadd.xlane.f32.xlu1 %v4552_v12 }
0x27e0   :  { %v4318_v3 = vpop.permute.xlu1 %4317  ;;  %v4666_v9 = vpop.permute.xlu0 %4665 }
0x27e1   :  { %v4320_v4 = vsel %vm4080_vm5, %v4318_v3, 0.0  ;;  %v4668_v27 = vsel %vm4080_vm5, %v4666_v9, 0.0 }
0x27e2   :  { %4321 = vadd.xlane.f32.xlu0 %v4320_v4 }
0x27e4   :  { %v4434_v6 = vpop.permute.xlu1 %4433 }
0x27e5   :  { %v4436_v10 = vsel %vm4080_vm5, %v4434_v6, 0.0 }
0x27e6   :  { %4437 = vadd.xlane.f32.xlu0 %v4436_v10 }
0x27e8   :  { %v4782_v19 = vpop.permute.xlu1 %4781 }
0x27e9   :  { %v4784_v11 = vsel %vm4080_vm5, %v4782_v19, 0.0 }
0x27ea   :  { %4669 = vadd.xlane.f32.xlu0 %v4668_v27  ;;  %4785 = vadd.xlane.f32.xlu1 %v4784_v11 }
0x27ec   :  { %v4898_v47 = vpop.permute.xlu1 %4897 }
0x27ed   :  { %v4900_v61 = vsel %vm4080_vm5, %v4898_v47, 0.0 }
0x27ee   :  { %4901 = vadd.xlane.f32.xlu1 %v4900_v61 }
0x27ff   :  { %4559 = vrot.lane.b32.xlu1 %v4548_v7, %s6719_s0 }
0x2816   :  { %v4661_v29 = vpop.xlane.xlu0 %4660 }
0x2817   :  { %v4662_v31 = vmax.f32 %v4661_v29, 1e-24 }
0x2819   :  { %6529 = vrsqrt.f32 %v4662_v31 }
0x281a   :  { %v5124_v13 = vpop.permute.xlu0 %5123  ;;  %6531 = vrsqrt.f32 %v4430_v32 }
0x281b   :  { %v5126_v42 = vsel %vm4080_vm5, %v5124_v13, 0.0 }
0x281c   :  { %5127 = vadd.xlane.f32.xlu0 %v5126_v42 }
0x2826   :  { %v6530_v48 = vpop.eup %6529 }
0x2827   :  { %v4090_v44 = vpop.xlane.xlu1 %4089  ;;  %v4664_v54 = vmul.f32 %v6530_v48, %v7718_v63  ;;  %v6532_v1 = vpop.eup %6531 }
0x2828   :  { %v4091_v25 = vmax.f32 %v4090_v44, 1e-24  ;;  %v4432_v5 = vmul.f32 %v6532_v1, %v7718_v63 }
0x2829   :  { %4675 = vrot.lane.b32.xlu1 %v4664_v54, %s6727_s18 }
0x282a   :  { %6533 = vrsqrt.f32 %v4091_v25 }
0x282b   :  { %6535 = vrsqrt.f32 %v4084_v17  ;;  %v4893_v23 = vpop.xlane.xlu1 %4892 }
0x282c   :  { %v4894_v45 = vmax.f32 %v4893_v23, 1e-24 }
0x282f   :  { %v7820_v26 = vpop.xlane.xlu1 %5350 }
0x2832   :  { %4443 = vrot.lane.b32.xlu0 %v4432_v5, %s6726_s16 }
0x2833   :  { %v5240_v35 = vpop.permute.xlu1 %5239 }
0x2834   :  { %v5242_v62 = vsel %vm4080_vm5, %v5240_v35, 0.0 }
0x2837   :  { %v6534_v33 = vpop.eup %6533  ;;  %v5356_v2 = vpop.permute.xlu1 %5355 }
0x2838   :  { %v6536_v34 = vpop.eup %6535  ;;  %v4093_v57 = vmul.f32 %v6534_v33, %v7764_v22  ;;  %v5358_v43 = vsel %vm4080_vm5, %v5356_v2, 0.0 }
0x2839   :  { %v4086_v51 = vmul.f32 %v6536_v34, %v7718_v63 }
0x283a   :  { %6319 = vmatpush3.xpose.msk.msra.mxu0 %vm4094_vm4, %v4093_v57 }
0x283b   :  { %6328 = vmatprep.subr.mxu0 %v8110_v46 }
0x283d   :  { %6321 = vmatmul.mubr.msk.f32.vlgmr.msra.gmra.mxu0 %vm4094_vm4, %v4086_v51 }
0x283e   :  { %6330 = vmatprep.mubr.msk.f32.mxu0 %vm6718_vm3, %v8110_v46 }
0x284b   :  { %v4777_v20 = vpop.xlane.xlu0 %4776 }
0x284c   :  { %v4778_v30 = vmax.f32 %v4777_v20, 1e-24 }
0x284d   :  { %5243 = vadd.xlane.f32.xlu1 %v5242_v62 }
0x284f   :  { %v5118_v16 = vpop.xlane.xlu0 %5117 }
0x2850   :  { %v5119_v48 = vmax.f32 %v5118_v16, 1e-24 }
0x2851   :  { %5013 = vadd.xlane.f32.xlu0 %v5012_v14  ;;  %5359 = vadd.xlane.f32.xlu1 %v5358_v43 }
0x2853   :  { %v5235_v40 = vpop.xlane.xlu0 %5234 }
0x2854   :  { %v5236_v17 = vmax.f32 %v5235_v40, 1e-24 }
0x2855   :  { %5006 = vadd.xlane.f32.xlu0 %v5005_v36 }
0x2867   :  { %v4206_v28 = vpop.xlane.xlu0 %4205 }
0x2868   :  { %v4207_v24 = vmax.f32 %v4206_v28, 1e-24  ;;  %v4554_v21 = vpop.xlane.xlu1 %4553 }
0x2869   :  { %v4555_v37 = vmax.f32 %v4554_v21, 1e-24 }
0x286a   :  { %6537 = vrsqrt.f32 %v4207_v24 }
0x286b   :  { %6539 = vrsqrt.f32 %v4555_v37  ;;  %v4322_v38 = vpop.xlane.xlu0 %4321 }
0x286c   :  { %v4323_v15 = vmax.f32 %v4322_v38, 1e-24  ;;  %6541 = vrsqrt.f32 %v4778_v30 }
0x286e   :  { %6543 = vrsqrt.f32 %v4323_v15 }
0x286f   :  { %v4438_v41 = vpop.xlane.xlu0 %4437 }
0x2870   :  { %v4439_v49 = vmax.f32 %v4438_v41, 1e-24 }
0x2872   :  { %6545 = vrsqrt.f32 %v4439_v49 }
0x2873   :  { %v4670_v0 = vpop.xlane.xlu0 %4669  ;;  %v4786_v8 = vpop.xlane.xlu1 %4785  ;;  %6547 = vrsqrt.f32 %v4894_v45 }
0x2874   :  { %v4671_v39 = vmax.f32 %v4670_v0, 1e-24  ;;  %v4787_v56 = vmax.f32 %v4786_v8, 1e-24 }
0x2876   :  { %6549 = vrsqrt.f32 %v4671_v39 }
0x2877   :  { %v6538_v55 = vpop.eup %6537  ;;  %v4902_v3 = vpop.xlane.xlu1 %4901  ;;  %6551 = vrsqrt.f32 %v4787_v56 }
0x2878   :  { %v6540_v59 = vpop.eup %6539  ;;  %v4209_v12 = vmul.f32 %v6538_v55, %v7764_v22  ;;  %v4903_v9 = vmax.f32 %v4902_v3, 1e-24 }
0x2879   :  { %v4557_v4 = vmul.f32 %v6540_v59, %v7764_v22  ;;  %v6542_v6 = vpop.eup %6541 }
0x287a   :  { %4214 = vrot.lane.b32.xlu1 %v4209_v12, %s6724_s13  ;;  %v4780_v60 = vmul.f32 %v6542_v6, %v7718_v63  ;;  %6553 = vrsqrt.f32 %v4903_v9 }
0x287b   :  { %v6544_v10 = vpop.eup %6543  ;;  %4562 = vrot.lane.b32.xlu0 %v4557_v4, %s6719_s0  ;;  %v4560_v33 = vpop.permute.xlu1 %4559 }
0x287c   :  { %v4325_v19 = vmul.f32 %v6544_v10, %v7764_v22 }
0x287e   :  { %4330 = vrot.lane.b32.xlu1 %v4325_v19, %s6722_s24 }
0x287f   :  { %v6546_v27 = vpop.eup %6545  ;;  %4791 = vrot.lane.b32.xlu0 %v4780_v60, %s6720_s5 }
0x2880   :  { %v4441_v11 = vmul.f32 %v6546_v27, %v7764_v22  ;;  %v6548_v47 = vpop.eup %6547 }
0x2881   :  { %v4896_v61 = vmul.f32 %v6548_v47, %v7718_v63 }
0x2882   :  { %4446 = vrot.lane.b32.xlu1 %v4441_v11, %s6726_s16 }
0x2883   :  { %v6550_v50 = vpop.eup %6549 }
0x2884   :  { %v4673_v7 = vmul.f32 %v6550_v50, %v7764_v22  ;;  %v6552_v29 = vpop.eup %6551 }
0x2885   :  { %v4789_v31 = vmul.f32 %v6552_v29, %v7764_v22 }
0x2886   :  { %4907 = vrot.lane.b32.xlu1 %v4896_v61, %s6725_s15  ;;  %v5352_v61 = vmax.f32 %v7820_v26, 1e-24 }
0x2887   :  { %v6554_v13 = vpop.eup %6553 }
0x2888   :  { %v4905_v42 = vmul.f32 %v6554_v13, %v7764_v22 }
0x288a   :  { %4678 = vrot.lane.b32.xlu1 %v4673_v7, %s6727_s18 }
0x288e   :  { %4794 = vrot.lane.b32.xlu1 %v4789_v31, %s6720_s5 }
0x2892   :  { %4910 = vrot.lane.b32.xlu1 %v4905_v42, %s6725_s15 }
0x289b   :  { %v4676_v34 = vpop.permute.xlu1 %4675 }
0x28a5   :  { %v5128_v32 = vpop.xlane.xlu0 %5127 }
0x28a6   :  { %v5129_v63 = vmax.f32 %v5128_v32, 1e-24 }
0x28a8   :  { %6555 = vrsqrt.f32 %v5129_v63 }
0x28a9   :  { %6557 = vrsqrt.f32 %v5119_v48  ;;  %v4444_v62 = vpop.permute.xlu0 %4443 }
0x28aa   :  { %6559 = vrsqrt.f32 %v5236_v17 }
0x28b5   :  { %v6556_v44 = vpop.eup %6555 }
0x28b6   :  { %v5131_v54 = vmul.f32 %v6556_v44, %v7777_v58  ;;  %v6558_v25 = vpop.eup %6557 }
0x28b7   :  { %v5121_v1 = vmul.f32 %v6558_v25, %v7722_v52  ;;  %v6560_v5 = vpop.eup %6559 }
0x28b8   :  { %5136 = vrot.lane.b32.xlu0 %v5131_v54, %s6724_s13  ;;  %v5238_v22 = vmul.f32 %v6560_v5, %v7722_v52 }
0x28bc   :  { %5133 = vrot.lane.b32.xlu0 %v5121_v1, %s6724_s13 }
0x28c0   :  { %5249 = vrot.lane.b32.xlu0 %v5238_v22, %s6722_s24 }
0x28d6   :  { %v5244_v57 = vpop.xlane.xlu1 %5243 }
0x28d7   :  { %v5245_v23 = vmax.f32 %v5244_v57, 1e-24 }
0x28d9   :  { %6561 = vrsqrt.f32 %v5245_v23 }
0x28da   :  { %v5360_v51 = vpop.xlane.xlu1 %5359  ;;  %v5014_v14 = vpop.xlane.xlu0 %5013 }
0x28db   :  { %v5361_v35 = vmax.f32 %v5360_v51, 1e-24  ;;  %v5015_v40 = vmax.f32 %v5014_v14, 1e-24 }
0x28dd   :  { %6563 = vrsqrt.f32 %v5361_v35 }
0x28de   :  { %v5007_v28 = vpop.xlane.xlu0 %5006  ;;  %6565 = vrsqrt.f32 %v5015_v40 }
0x28df   :  { %v5008_v21 = vmax.f32 %v5007_v28, 1e-24 }
0x28e1   :  { %6567 = vrsqrt.f32 %v5008_v21  ;;  %v8129_v21 = vld [vmem:[#allocation22_spill] sm:$0xff] }
0x28e6   :  { %v6562_v2 = vpop.eup %6561 }
0x28e7   :  { %v5247_v43 = vmul.f32 %v6562_v2, %v7777_v58 }
0x28e9   :  { %5252 = vrot.lane.b32.xlu1 %v5247_v43, %s6722_s24 }
0x28ea   :  { %v6564_v36 = vpop.eup %6563 }
0x28eb   :  { %v5363_v16 = vmul.f32 %v6564_v36, %v7777_v58  ;;  %v6566_v45 = vpop.eup %6565 }
0x28ec   :  { %v4215_v20 = vpop.permute.xlu1 %4214  ;;  %v5017_v39 = vmul.f32 %v6566_v45, %v7777_v58 }
0x28ed   :  { %6324 = vmatpush3.xpose.msk.msra.mxu1 %vm4094_vm4, %v4215_v20  ;;  %5368 = vrot.lane.b32.xlu1 %v5363_v16, %s6726_s16  ;;  %v4563_v30 = vpop.permute.xlu0 %4562  ;;  %v8128_v16 = vlaneseq }
0x28ee   :  { %6333 = vmatprep.subr.mxu1 %v8110_v46  ;;  %v6568_v0 = vpop.eup %6567 }
0x28ef   :  { %v5010_v59 = vmul.f32 %v6568_v0, %v7722_v52  ;;  %v4077_v40 = vand.u32 127, %v8128_v16 }
0x28f0   :  { %6326 = vmatmul.mubr.msk.f32.vlgmr.msra.gmra.mxu1 %vm4094_vm4, %v7795_v18  ;;  %v4331_v24 = vpop.permute.xlu1 %4330 }
0x28f1   :  { %6329 = vmatpush3.xpose.msk.msra.mxu0 %vm4094_vm4, %v4331_v24  ;;  %6335 = vmatprep.mubr.msk.f32.mxu1 %vm6718_vm3, %v8110_v46  ;;  %v4792_v8 = vpop.permute.xlu0 %4791 }
0x28f2   :  { %6338 = vmatprep.subr.mxu0 %v8110_v46 }
0x28f4   :  { %6331 = vmatmul.mubr.msk.f32.vlgmr.msra.gmra.mxu0 %vm4094_vm4, %v7797_v53  ;;  %v4447_v37 = vpop.permute.xlu1 %4446 }
0x28f5   :  { %6334 = vmatpush3.xpose.msk.msra.mxu1 %vm4094_vm4, %v4447_v37  ;;  %6339 = vmatpush3.xpose.msk.msra.mxu0 %vm4094_vm4, %v4563_v30 }
0x28f6   :  { %6340 = vmatprep.mubr.msk.f32.mxu0 %vm6718_vm3, %v8110_v46  ;;  %6343 = vmatprep.subr.mxu1 %v8110_v46 }
0x28f7   :  { %6348 = vmatprep.subr.mxu0 %v8110_v46 }
0x28f8   :  { %6336 = vmatmul.mubr.msk.f32.vlgmr.msra.gmra.mxu1 %vm4094_vm4, %v4444_v62  ;;  %6341 = vmatmul.mubr.msk.f32.vlgmr.msra.gmra.mxu0 %vm4094_vm4, %v4560_v33  ;;  %v4908_v18 = vpop.permute.xlu1 %4907 }
0x28f9   :  { %6345 = vmatprep.mubr.msk.f32.mxu1 %vm6718_vm3, %v8110_v46  ;;  %6350 = vmatprep.mubr.msk.f32.mxu0 %vm6718_vm3, %v8110_v46 }
0x28fc   :  { %v4679_v53 = vpop.permute.xlu1 %4678 }
0x28fd   :  { %v7878_v38 = vpop.f32.mrf.mxu0  ;;  %6344 = vmatpush3.xpose.msk.msra.mxu1 %vm4094_vm4, %v4679_v53 }
0x28fe   :  { %v4172_v15 = vsel %vm4171_vm14, %v7878_v38, -inf  ;;  %6353 = vmatprep.subr.mxu1 %v8110_v46 }
0x28ff   :  { %v6322_v41 = vpop.f32.mrf.mxu0  ;;  %4173 = vmax.xlane.f32.xlu0 %v4172_v15 }
0x2900   :  { %6346 = vmatmul.mubr.msk.f32.vlgmr.msra.gmra.mxu1 %vm4094_vm4, %v4676_v34  ;;  %v4795_v49 = vpop.permute.xlu1 %4794 }
0x2901   :  { %6349 = vmatpush3.xpose.msk.msra.mxu0 %vm4094_vm4, %v4795_v49  ;;  %6355 = vmatprep.mubr.msk.f32.mxu1 %vm6718_vm3, %v8110_v46 }
0x2902   :  { %6358 = vmatprep.subr.mxu0 %v8110_v46 }
0x2904   :  { %6351 = vmatmul.mubr.msk.f32.vlgmr.msra.gmra.mxu0 %vm4094_vm4, %v4792_v8  ;;  %v4911_v55 = vpop.permute.xlu1 %4910 }
0x2905   :  { %6354 = vmatpush3.xpose.msk.msra.mxu1 %vm4094_vm4, %v4911_v55  ;;  %6359 = vmatpush3.xpose.msk.msra.mxu0 %vm4094_vm4, %v5017_v39 }
0x2906   :  { %6360 = vmatprep.mubr.msk.f32.mxu0 %vm6718_vm3, %v8110_v46  ;;  %6363 = vmatprep.subr.mxu1 %v8110_v46 }
0x2907   :  { %6368 = vmatprep.subr.mxu0 %v8110_v46 }
0x2908   :  { %6356 = vmatmul.mubr.msk.f32.vlgmr.msra.gmra.mxu1 %vm4094_vm4, %v4908_v18  ;;  %6361 = vmatmul.mubr.msk.f32.vlgmr.msra.gmra.mxu0 %vm4094_vm4, %v5010_v59 }
0x2909   :  { %6365 = vmatprep.mubr.msk.f32.mxu1 %vm6718_vm3, %v8110_v46  ;;  %6370 = vmatprep.mubr.msk.f32.mxu0 %vm6718_vm3, %v8110_v46 }
0x292a   :  { %v5137_v58 = vpop.permute.xlu0 %5136 }
0x292b   :  { %6364 = vmatpush3.xpose.msk.msra.mxu1 %vm4094_vm4, %v5137_v58 }
0x292c   :  { %6373 = vmatprep.subr.mxu1 %v8110_v46 }
0x292e   :  { %v5134_v56 = vpop.permute.xlu0 %5133 }
0x292f   :  { %6366 = vmatmul.mubr.msk.f32.vlgmr.msra.gmra.mxu1 %vm4094_vm4, %v5134_v56 }
0x2930   :  { %6375 = vmatprep.mubr.msk.f32.mxu1 %vm6718_vm3, %v8110_v46  ;;  %vm7959_vm3 = vcmp.eq.s32.totalorder %v8129_v21, %v4077_v40 }
0x2932   :  { %v5250_v3 = vpop.permute.xlu0 %5249 }
0x295b   :  { %v5253_v12 = vpop.permute.xlu1 %5252 }
0x295c   :  { %6369 = vmatpush3.xpose.msk.msra.mxu0 %vm4094_vm4, %v5253_v12 }
0x295f   :  { %6371 = vmatmul.mubr.msk.f32.vlgmr.msra.gmra.mxu0 %vm4094_vm4, %v5250_v3  ;;  %v5369_v4 = vpop.permute.xlu1 %5368 }
0x2960   :  { %6374 = vmatpush3.xpose.msk.msra.mxu1 %vm4094_vm4, %v5369_v4 }
0x2988   :  { %v4174_v6 = vpop.xlane.xlu0 %4173 }
0x2989   :  { %v4175_v10 = vsub.f32 %v7878_v38, %v4174_v6 }
0x298b   :  { %v4176_v9 = vmul.f32 1.442695, %v4175_v10 }
0x298d   :  { %6569 = vpow2.f32 %v4176_v9 }
0x298e   :  { %6571 = vrsqrt.f32 %v5352_v61 }
0x299a   :  { %v6570_v19 = vpop.eup %6569 }
0x299b   :  { %v4178_v60 = vsel %vm4171_vm14, %v6570_v19, 0.0  ;;  %v6572_v54 = vpop.eup %6571 }
0x299c   :  { %4179 = vadd.xlane.f32.xlu0 %v4178_v60  ;;  %v5354_v33 = vmul.f32 %v6572_v54, %v7722_v52 }
0x29b0   :  { %v7914_v27 = vpop.f32.mrf.mxu1 }
0x29b1   :  { %v4290_v46 = vsel %vm4171_vm14, %v7914_v27, -inf }
0x29b2   :  { %4291 = vmax.xlane.f32.xlu1 %v4290_v46  ;;  %v6327_v11 = vpop.f32.mrf.mxu1 }
0x29b4   :  { %v7918_v47 = vpop.f32.mrf.mxu0 }
0x29b5   :  { %v4406_v50 = vsel %vm4171_vm14, %v7918_v47, -inf }
0x29b6   :  { %4407 = vmax.xlane.f32.xlu1 %v4406_v50  ;;  %v6332_v7 = vpop.f32.mrf.mxu0 }
0x29b8   :  { %v7923_v29 = vpop.f32.mrf.mxu1  ;;  %v7925_v31 = vpop.f32.mrf.mxu0 }
0x29b9   :  { %v4638_v13 = vsel %vm4171_vm14, %v7925_v31, -inf  ;;  %v4522_v42 = vsel %vm4171_vm14, %v7923_v29, -inf }
0x29ba   :  { %4639 = vmax.xlane.f32.xlu0 %v4638_v13  ;;  %v6342_v32 = vpop.f32.mrf.mxu0  ;;  %4523 = vmax.xlane.f32.xlu1 %v4522_v42  ;;  %v6337_v26 = vpop.f32.mrf.mxu1 }
0x29c0   :  { %v7931_v48 = vpop.f32.mrf.mxu1 }
0x29c1   :  { %v4754_v63 = vsel %vm4171_vm14, %v7931_v48, -inf }
0x29c2   :  { %4755 = vmax.xlane.f32.xlu0 %v4754_v63  ;;  %v6347_v17 = vpop.f32.mrf.mxu1 }
0x29c4   :  { %v7935_v44 = vpop.f32.mrf.mxu0 }
0x29c5   :  { %v4870_v23 = vsel %vm4171_vm14, %v7935_v44, -inf }
0x29c6   :  { %v6352_v25 = vpop.f32.mrf.mxu0 }
0x29c8   :  { %v7937_v1 = vpop.f32.mrf.mxu1  ;;  %v7939_v5 = vpop.f32.mrf.mxu0 }
0x29c9   :  { %v4986_v22 = vsel %vm4171_vm14, %v7937_v1, -inf  ;;  %v5094_v2 = vsel %vm4171_vm14, %v7939_v5, -inf }
0x29ca   :  { %v6362_v34 = vpop.f32.mrf.mxu0  ;;  %4987 = vmax.xlane.f32.xlu0 %v4986_v22  ;;  %v6357_v57 = vpop.f32.mrf.mxu1 }
0x29cb   :  { %5365 = vrot.lane.b32.xlu1 %v5354_v33, %s6726_s16 }
0x29ef   :  { %4871 = vmax.xlane.f32.xlu1 %v4870_v23  ;;  %v7947_v51 = vpop.f32.mrf.mxu1 }
0x29f0   :  { %v5212_v35 = vsel %vm4171_vm14, %v7947_v51, -inf }
0x29f1   :  { %5213 = vmax.xlane.f32.xlu0 %v5212_v35  ;;  %v6367_v62 = vpop.f32.mrf.mxu1 }
0x29f3   :  { %5095 = vmax.xlane.f32.xlu1 %v5094_v2 }
0x2a1f   :  { %v7953_v52 = vpop.f32.mrf.mxu0 }
0x2a20   :  { %v5328_v43 = vsel %vm4171_vm14, %v7953_v52, -inf }
0x2a21   :  { %5329 = vmax.xlane.f32.xlu1 %v5328_v43  ;;  %v6372_v14 = vpop.f32.mrf.mxu0 }
0x2a25   :  { %v4180_v36 = vpop.xlane.xlu0 %4179 }
0x2a26   :  { %6573 = vlog2.f32 %v4180_v36 }
0x2a33   :  { %v6574_v20 = vpop.eup %6573 }
0x2a34   :  { %v4182_v28 = vmul.f32 0.6931472, %v6574_v20 }
0x2a36   :  { %v4183_v24 = vadd.f32 %v4182_v28, %v4174_v6 }
0x2a38   :  { %v4184_v37 = vsub.f32 %v7878_v38, %v4183_v24 }
0x2a3a   :  { %v4185_v18 = vsel %vm7959_vm3, %v4184_v37, 0.0 }
0x2a3b   :  { %v7966_v53 = vpop.xlane.xlu1 %4291  ;;  %v4186_v15 = vsel %vm4171_vm14, %v4185_v18, 0.0 }
0x2a3c   :  { %v4293_v41 = vsub.f32 %v7914_v27, %v7966_v53  ;;  %4187 = vadd.xlane.f32.xlu1 %v4186_v15 }
0x2a3e   :  { %v4294_v45 = vmul.f32 1.442695, %v4293_v41 }
0x2a3f   :  { %v7971_v49 = vpop.xlane.xlu1 %4407 }
0x2a40   :  { %6575 = vpow2.f32 %v4294_v45  ;;  %v4409_v0 = vsub.f32 %v7918_v47, %v7971_v49 }
0x2a42   :  { %v4410_v8 = vmul.f32 1.442695, %v4409_v0 }
0x2a43   :  { %v7975_v38 = vpop.xlane.xlu0 %4639  ;;  %v7977_v39 = vpop.xlane.xlu1 %4523 }
0x2a44   :  { %6577 = vpow2.f32 %v4410_v8  ;;  %v4641_v55 = vsub.f32 %v7925_v31, %v7975_v38  ;;  %v4525_v59 = vsub.f32 %v7923_v29, %v7977_v39 }
0x2a46   :  { %v4642_v58 = vmul.f32 1.442695, %v4641_v55  ;;  %v4526_v56 = vmul.f32 1.442695, %v4525_v59 }
0x2a47   :  { %v5366_v12 = vpop.permute.xlu1 %5365 }
0x2a48   :  { %6579 = vpow2.f32 %v4642_v58  ;;  %6376 = vmatmul.mubr.msk.f32.vlgmr.msra.gmra.mxu1 %vm4094_vm4, %v5366_v12 }
0x2a49   :  { %6581 = vpow2.f32 %v4526_v56 }
0x2a4b   :  { %v7984_v3 = vpop.xlane.xlu0 %4755 }
0x2a4c   :  { %v4757_v4 = vsub.f32 %v7931_v48, %v7984_v3 }
0x2a4d   :  { %v6576_v6 = vpop.eup %6575 }
0x2a4e   :  { %v4758_v10 = vmul.f32 1.442695, %v4757_v4  ;;  %v4296_v9 = vsel %vm4171_vm14, %v6576_v6, 0.0 }
0x2a4f   :  { %4297 = vadd.xlane.f32.xlu0 %v4296_v9 }
0x2a50   :  { %6583 = vpow2.f32 %v4758_v10 }
0x2a51   :  { %v6578_v19 = vpop.eup %6577 }
0x2a52   :  { %v4412_v60 = vsel %vm4171_vm14, %v6578_v19, 0.0 }
0x2a53   :  { %v7990_v46 = vpop.xlane.xlu0 %4987  ;;  %4413 = vadd.xlane.f32.xlu0 %v4412_v60 }
0x2a54   :  { %v4989_v11 = vsub.f32 %v7937_v1, %v7990_v46 }
0x2a55   :  { %v6580_v61 = vpop.eup %6579 }
0x2a56   :  { %v6582_v50 = vpop.eup %6581  ;;  %v4990_v7 = vmul.f32 1.442695, %v4989_v11  ;;  %v4644_v13 = vsel %vm4171_vm14, %v6580_v61, 0.0 }
0x2a57   :  { %4645 = vadd.xlane.f32.xlu1 %v4644_v13  ;;  %v4528_v42 = vsel %vm4171_vm14, %v6582_v50, 0.0 }
0x2a58   :  { %6585 = vpow2.f32 %v4990_v7  ;;  %4529 = vadd.xlane.f32.xlu0 %v4528_v42 }
0x2a5d   :  { %v6584_v32 = vpop.eup %6583 }
0x2a5e   :  { %v4760_v26 = vsel %vm4171_vm14, %v6584_v32, 0.0 }
0x2a5f   :  { %4761 = vadd.xlane.f32.xlu1 %v4760_v26 }
0x2a65   :  { %v6586_v63 = vpop.eup %6585 }
0x2a66   :  { %v4992_v17 = vsel %vm4171_vm14, %v6586_v63, 0.0 }
0x2a67   :  { %4993 = vadd.xlane.f32.xlu1 %v4992_v17 }
0x2a78   :  { %v7998_v54 = vpop.xlane.xlu1 %4871 }
0x2a79   :  { %v4873_v25 = vsub.f32 %v7935_v44, %v7998_v54 }
0x2a7a   :  { %v8002_v22 = vpop.xlane.xlu0 %5213 }
0x2a7b   :  { %v4874_v33 = vmul.f32 1.442695, %v4873_v25  ;;  %v5215_v34 = vsub.f32 %v7947_v51, %v8002_v22 }
0x2a7c   :  { %v8006_v57 = vpop.xlane.xlu1 %5095 }
0x2a7d   :  { %6587 = vpow2.f32 %v4874_v33  ;;  %v5216_v23 = vmul.f32 1.442695, %v5215_v34  ;;  %v5097_v35 = vsub.f32 %v7939_v5, %v8006_v57 }
0x2a7f   :  { %6589 = vpow2.f32 %v5216_v23  ;;  %v5098_v62 = vmul.f32 1.442695, %v5097_v35 }
0x2a81   :  { %6591 = vpow2.f32 %v5098_v62 }
0x2a8a   :  { %v6588_v2 = vpop.eup %6587 }
0x2a8b   :  { %v4876_v43 = vsel %vm4171_vm14, %v6588_v2, 0.0 }
0x2a8c   :  { %v6590_v14 = vpop.eup %6589  ;;  %4877 = vadd.xlane.f32.xlu0 %v4876_v43 }
0x2a8d   :  { %v5218_v36 = vsel %vm4171_vm14, %v6590_v14, 0.0 }
0x2a8e   :  { %v6592_v20 = vpop.eup %6591  ;;  %5219 = vadd.xlane.f32.xlu1 %v5218_v36 }
0x2a8f   :  { %v5100_v16 = vsel %vm4171_vm14, %v6592_v20, 0.0 }
0x2a90   :  { %5101 = vadd.xlane.f32.xlu0 %v5100_v16 }
0x2aaa   :  { %v8013_v40 = vpop.xlane.xlu1 %5329 }
0x2aab   :  { %v5331_v28 = vsub.f32 %v7953_v52, %v8013_v40 }
0x2aad   :  { %v5332_v24 = vmul.f32 1.442695, %v5331_v28 }
0x2aaf   :  { %6593 = vpow2.f32 %v5332_v24 }
0x2abc   :  { %v6594_v21 = vpop.eup %6593 }
0x2abd   :  { %v5334_v37 = vsel %vm4171_vm14, %v6594_v21, 0.0 }
0x2abe   :  { %5335 = vadd.xlane.f32.xlu0 %v5334_v37 }
0x2ac5   :  { %v8018_v41 = vpop.xlane.xlu1 %4187 }
0x2ad8   :  { %v4298_v18 = vpop.xlane.xlu0 %4297 }
0x2ad9   :  { %6595 = vlog2.f32 %v4298_v18 }
0x2adc   :  { %v4414_v15 = vpop.xlane.xlu0 %4413 }
0x2add   :  { %6597 = vlog2.f32 %v4414_v15 }
0x2ae0   :  { %v4646_v0 = vpop.xlane.xlu1 %4645 }
0x2ae1   :  { %v4530_v45 = vpop.xlane.xlu0 %4529 }
0x2ae2   :  { %6599 = vlog2.f32 %v4530_v45 }
0x2ae3   :  { %6601 = vlog2.f32 %v4646_v0 }
0x2ae6   :  { %v6596_v8 = vpop.eup %6595 }
0x2ae7   :  { %v4300_v59 = vmul.f32 0.6931472, %v6596_v8 }
0x2ae8   :  { %v4762_v55 = vpop.xlane.xlu1 %4761 }
0x2ae9   :  { %6603 = vlog2.f32 %v4762_v55  ;;  %v4301_v12 = vadd.f32 %v4300_v59, %v7966_v53 }
0x2aea   :  { %v6598_v58 = vpop.eup %6597 }
0x2aeb   :  { %v4416_v4 = vmul.f32 0.6931472, %v6598_v58  ;;  %v4302_v19 = vsub.f32 %v7914_v27, %v4301_v12 }
0x2aed   :  { %v4417_v10 = vadd.f32 %v4416_v4, %v7971_v49  ;;  %v4303_v53 = vsel %vm7959_vm3, %v4302_v19, 0.0 }
0x2aee   :  { %v4304_v32 = vsel %vm4171_vm14, %v4303_v53, 0.0 }
0x2aef   :  { %v6600_v6 = vpop.eup %6599  ;;  %v4418_v42 = vsub.f32 %v7918_v47, %v4417_v10 }
0x2af0   :  { %v4994_v56 = vpop.xlane.xlu1 %4993  ;;  %v4532_v9 = vmul.f32 0.6931472, %v6600_v6  ;;  %v6602_v60 = vpop.eup %6601 }
0x2af1   :  { %6605 = vlog2.f32 %v4994_v56  ;;  %v4648_v7 = vmul.f32 0.6931472, %v6602_v60  ;;  %v4419_v63 = vsel %vm7959_vm3, %v4418_v42, 0.0 }
0x2af2   :  { %v4533_v50 = vadd.f32 %v4532_v9, %v7977_v39  ;;  %v4420_v25 = vsel %vm4171_vm14, %v4419_v63, 0.0 }
0x2af3   :  { %v4649_v27 = vadd.f32 %v4648_v7, %v7975_v38 }
0x2af4   :  { %v4534_v39 = vsub.f32 %v7923_v29, %v4533_v50 }
0x2af5   :  { %v4650_v23 = vsub.f32 %v7925_v31, %v4649_v27 }
0x2af6   :  { %v6604_v49 = vpop.eup %6603  ;;  %v4535_v47 = vsel %vm7959_vm3, %v4534_v39, 0.0 }
0x2af7   :  { %v4764_v26 = vmul.f32 0.6931472, %v6604_v49  ;;  %v4536_v35 = vsel %vm4171_vm14, %v4535_v47, 0.0  ;;  %v4651_v29 = vsel %vm7959_vm3, %v4650_v23, 0.0 }
0x2af8   :  { %v4652_v14 = vsel %vm4171_vm14, %v4651_v29, 0.0 }
0x2af9   :  { %v4765_v33 = vadd.f32 %v4764_v26, %v7984_v3 }
0x2afb   :  { %v4766_v2 = vsub.f32 %v7931_v48, %v4765_v33 }
0x2afd   :  { %v4767_v31 = vsel %vm7959_vm3, %v4766_v2, 0.0 }
0x2afe   :  { %v6606_v17 = vpop.eup %6605 }
0x2aff   :  { %v4996_v34 = vmul.f32 0.6931472, %v6606_v17 }
0x2b01   :  { %v4997_v62 = vadd.f32 %v4996_v34, %v7990_v46  ;;  %v4768_v46 = vsel %vm4171_vm14, %v4767_v31, 0.0 }
0x2b03   :  { %v4998_v36 = vsub.f32 %v7937_v1, %v4997_v62 }
0x2b05   :  { %v4999_v20 = vsel %vm7959_vm3, %v4998_v36, 0.0 }
0x2b06   :  { %v5000_v48 = vsel %vm4171_vm14, %v4999_v20, 0.0 }
0x2b08   :  { %v8023_v11 = vpop.f32.mrf.mxu1 }
0x2b09   :  { %v5444_v61 = vsel %vm4171_vm14, %v8023_v11, -inf }
0x2b0a   :  { %v6377_v13 = vpop.f32.mrf.mxu1  ;;  %5445 = vmax.xlane.f32.xlu0 %v5444_v61 }
0x2b0e   :  { %4305 = vadd.xlane.f32.xlu0 %v4304_v32 }
0x2b12   :  { %4421 = vadd.xlane.f32.xlu0 %v4420_v25 }
0x2b15   :  { %v4878_v38 = vpop.xlane.xlu0 %4877 }
0x2b16   :  { %6607 = vlog2.f32 %v4878_v38  ;;  %4537 = vadd.xlane.f32.xlu0 %v4536_v35 }
0x2b17   :  { %v5220_v3 = vpop.xlane.xlu1 %5219 }
0x2b18   :  { %6609 = vlog2.f32 %v5220_v3 }
0x2b19   :  { %v5102_v43 = vpop.xlane.xlu0 %5101 }
0x2b1a   :  { %6611 = vlog2.f32 %v5102_v43  ;;  %4653 = vadd.xlane.f32.xlu0 %v4652_v14 }
0x2b1e   :  { %4769 = vadd.xlane.f32.xlu0 %v4768_v46 }
0x2b22   :  { %5001 = vadd.xlane.f32.xlu0 %v5000_v48 }
0x2b23   :  { %v6608_v16 = vpop.eup %6607 }
0x2b24   :  { %v4880_v28 = vmul.f32 0.6931472, %v6608_v16 }
0x2b25   :  { %v6610_v24 = vpop.eup %6609 }
0x2b26   :  { %v4881_v21 = vadd.f32 %v4880_v28, %v7998_v54  ;;  %v5222_v37 = vmul.f32 0.6931472, %v6610_v24 }
0x2b27   :  { %v6612_v18 = vpop.eup %6611 }
0x2b28   :  { %v5223_v15 = vadd.f32 %v5222_v37, %v8002_v22  ;;  %v5104_v45 = vmul.f32 0.6931472, %v6612_v18  ;;  %v4882_v1 = vsub.f32 %v7935_v44, %v4881_v21 }
0x2b2a   :  { %v5105_v0 = vadd.f32 %v5104_v45, %v8006_v57  ;;  %v4883_v8 = vsel %vm7959_vm3, %v4882_v1, 0.0  ;;  %v5224_v55 = vsub.f32 %v7947_v51, %v5223_v15 }
0x2b2b   :  { %v4884_v59 = vsel %vm4171_vm14, %v4883_v8, 0.0 }
0x2b2c   :  { %4885 = vadd.xlane.f32.xlu1 %v4884_v59  ;;  %v5225_v54 = vsel %vm7959_vm3, %v5224_v55, 0.0  ;;  %v5106_v58 = vsub.f32 %v7939_v5, %v5105_v0 }
0x2b2d   :  { %v5226_v22 = vsel %vm4171_vm14, %v5225_v54, 0.0 }
0x2b2e   :  { %5227 = vadd.xlane.f32.xlu0 %v5226_v22  ;;  %v5107_v44 = vsel %vm7959_vm3, %v5106_v58, 0.0 }
0x2b2f   :  { %v5108_v57 = vsel %vm4171_vm14, %v5107_v44, 0.0 }
0x2b30   :  { %5109 = vadd.xlane.f32.xlu1 %v5108_v57 }
0x2b47   :  { %v5336_v56 = vpop.xlane.xlu0 %5335 }
0x2b48   :  { %6613 = vlog2.f32 %v5336_v56 }
0x2b55   :  { %v6614_v51 = vpop.eup %6613 }
0x2b56   :  { %v5338_v12 = vmul.f32 0.6931472, %v6614_v51 }
0x2b58   :  { %v5339_v4 = vadd.f32 %v5338_v12, %v8013_v40 }
0x2b5a   :  { %v5340_v6 = vsub.f32 %v7953_v52, %v5339_v4 }
0x2b5c   :  { %v5341_v5 = vsel %vm7959_vm3, %v5340_v6, 0.0 }
0x2b5d   :  { %v5342_v10 = vsel %vm4171_vm14, %v5341_v5, 0.0 }
0x2b5e   :  { %5343 = vadd.xlane.f32.xlu1 %v5342_v10 }
0x2b93   :  { %v5446_v9 = vpop.xlane.xlu0 %5445 }
0x2b94   :  { %v5447_v19 = vsub.f32 %v8023_v11, %v5446_v9 }
0x2b96   :  { %v5448_v60 = vmul.f32 1.442695, %v5447_v19 }
0x2b97   :  { %v4306_v61 = vpop.xlane.xlu0 %4305 }
0x2b98   :  { %6615 = vpow2.f32 %v5448_v60  ;;  %v4307_v52 = vadd.f32 %v4306_v61, %v8018_v41 }
0x2b9b   :  { %v4422_v50 = vpop.xlane.xlu0 %4421 }
0x2b9c   :  { %v4423_v42 = vadd.f32 %v4422_v50, %v4307_v52 }
0x2b9f   :  { %v4538_v13 = vpop.xlane.xlu0 %4537 }
0x2ba0   :  { %v4539_v49 = vadd.f32 %v4538_v13, %v4423_v42 }
0x2ba3   :  { %v4654_v40 = vpop.xlane.xlu0 %4653 }
0x2ba4   :  { %v4655_v27 = vadd.f32 %v4654_v40, %v4539_v49 }
0x2ba5   :  { %v6616_v7 = vpop.eup %6615 }
0x2ba6   :  { %v5450_v53 = vsel %vm4171_vm14, %v6616_v7, 0.0 }
0x2ba7   :  { %5451 = vadd.xlane.f32.xlu1 %v5450_v53  ;;  %v4770_v32 = vpop.xlane.xlu0 %4769 }
0x2ba8   :  { %v4771_v26 = vadd.f32 %v4770_v32, %v4655_v27 }
0x2bab   :  { %v5002_v17 = vpop.xlane.xlu0 %5001 }
0x2bb5   :  { %v4886_v63 = vpop.xlane.xlu1 %4885 }
0x2bb6   :  { %v4887_v39 = vadd.f32 %v4886_v63, %v4771_v26 }
0x2bb8   :  { %v5003_v25 = vadd.f32 %v5002_v17, %v4887_v39 }
0x2bb9   :  { %v5110_v33 = vpop.xlane.xlu1 %5109 }
0x2bba   :  { %v5111_v34 = vadd.f32 %v5110_v33, %v5003_v25 }
0x2be7   :  { %v5344_v47 = vpop.xlane.xlu1 %5343 }
0x2c30   :  { %v5452_v23 = vpop.xlane.xlu1 %5451 }
0x2c31   :  { %6617 = vlog2.f32 %v5452_v23 }
0x2c3e   :  { %v6618_v38 = vpop.eup %6617 }
0x2c3f   :  { %v5454_v35 = vmul.f32 0.6931472, %v6618_v38 }
0x2c41   :  { %v5455_v62 = vadd.f32 %v5454_v35, %v5446_v9 }
0x2c43   :  { %v5456_v29 = vsub.f32 %v8023_v11, %v5455_v62 }
0x2c45   :  { %v5457_v41 = vsel %vm7959_vm3, %v5456_v29, 0.0 }
0x2c46   :  { %v5458_v2 = vsel %vm4171_vm14, %v5457_v41, 0.0 }
0x2c47   :  { %5459 = vadd.xlane.f32.xlu0 %v5458_v2 }
0x2c48   :  { %6654 = shalt.err (!%p6651_p4)
}
0x2c49   :  { %5483 = dma.vmem_to_hbm [thread:$0]  %s5481_s26, 32, %s6883_s9, [#allocation4]   ;;  %v5228_v3 = vpop.xlane.xlu0 %5227  ;;  %vm5462_vm15 = vcmask 1041408   ;;  %vm5472_vm0 = vcmask 0  }
0x2c4a   :  { %v5229_v11 = vadd.f32 %v5228_v3, %v5111_v34  ;;  %s6729_s1 = smov [#allocation5]  }
0x2c4b   :  { %s5490_s2 = sshll.u32 %s6729_s1, 4  ;;  %s5491_s2 = int_to_ptr.vmem [resolvable:$true] %s5490_s2 }
0x2c4c   :  { %v5345_v43 = vadd.f32 %v5344_v47, %v5229_v11  ;;  %s6663_s9 = scalar_lea.vmem %s5491_s2, 16  ;;  %s6667_s7 = scalar_lea.vmem %s5491_s2, 32 }
0x2c4d   :  { %p6664_p5 = scmp.ne.s32.totalorder %s5491_s2, %s6663_s9  ;;  %p6668_p6 = scmp.lt.s32.totalorder %s5491_s2, %s5491_s2 }
0x2c4e   :  { %p6669_p7 = scmp.lt.s32.totalorder %s6667_s7, %s6663_s9 }
0x2c50   :  { %p6670_p8 = por %p6669_p7, %p6668_p6 }
0x2c52   :  { %p6671_p9 = pnand %p6670_p8, %p6664_p5 }
0x2cd0   :  { %v5460_v30 = vpop.xlane.xlu0 %5459 }
0x2cd1   :  { %v5461_v14 = vadd.f32 %v5460_v30, %v5345_v43 }
0x2cd3   :  { %v5463_v31 = vsel %vm5462_vm15, %v5461_v14, 0.0 }
0x2cd4   :  { %v5464_v36 = vrot.slane %v5463_v31, 4 }
0x2cd6   :  { %v5465_v46 = vadd.f32 %v5464_v36, %v5463_v31 }
0x2cd8   :  { %v5466_v20 = vrot.slane %v5465_v46, 2 }
0x2cda   :  { %v5467_v48 = vadd.f32 %v5466_v20, %v5465_v46 }
0x2cdc   :  { %v5468_v16 = vrot.slane %v5467_v48, 1 }
0x2cde   :  { %v5469_v28 = vadd.f32 %v5468_v16, %v5467_v48 }
0x2ce0   :  { %v5470_v24 = vsub.f32 0.0, %v5469_v28 }
0x2ce2   :  { %v5471_v21 = vmul.f32 0.041666668, %v5470_v24 }
0x2ce4   :  { %5473 = vst.msk [vmem:[#allocation5] sm:$0x1] %vm5472_vm0, %v5471_v21 }
0x2ce5   :  { %6674 = shalt.err (!%p6671_p9)
}
0x2ce6   :  { %5493 = dma.vmem_to_hbm [thread:$0]  %s5491_s2, 16, %s6888_s29, [#allocation6]  }
0x2ce7   :  { %6683 = dma.done.wait [#allocation4], 32  }
0x2ce8   :  { %6684 = vsyncadd [#allocation4], 4294967264 }
0x2ce9   :  { %6685 = dma.done.wait [#allocation6], 16  }
0x2cea   :  { %6686 = vsyncadd [#allocation6], 4294967280 }
0x2ceb   :  { %5500 = vsyncpa [#allocation4], 1 }
0x2cec   :  { %5501 = vsyncpa [#allocation6], 1 }

</bundles_post_ra>
